<compile_context>
chip_gen: v6e
topology: v6e:2x2x1
jax: 0.10.0
libtpu: 0.0.40
codegen_flags: <defaults>
</compile_context>

<pallas_src>
import functools

import jax
import jax.numpy as jnp
from jax import lax
from jax.experimental import pallas as pl
from jax.experimental.pallas import tpu as pltpu


# ----------------------------- Pallas kernels ------------------------------

def _prep_kernel(x_ref, xc_ref, cov_ref, *, inv_n):
    """Per-shape: center over points, emit centered cloud + 3x3 second moment.

    x_ref block: (1, 3, N) -- lane-dense (points on the lane axis).
    The unit-RMS scale of IMCP.normalize_shape is recovered in the wrapper from
    trace(cov) (== sum(c*c)/N), so it needs no extra output / kernel.
    """
    x = x_ref[0]                                            # (3, N)
    c = x - jnp.mean(x, axis=1, keepdims=True)              # centered
    xc_ref[0] = c
    cov_ref[0] = lax.dot_general(c, c, (((1,), (1,)), ((), ())),
                                 preferred_element_type=jnp.float32) * inv_n


def _transform_mean_kernel(x_ref, rs_ref, r_ref, t_ref,
                           txa_ref, xr_ref, mv_ref, acc_ref, *, inv_k):
    """Per-shape fused transform + consensus-mean accumulation.

    rs = inv_rms_scale * (pose_R @ R_inertia)   -> transformed_x branch
    r  =                  pose_R @ R_inertia    -> aligned-original branch
    Outputs tx already augmented for the NN kernel: rows [-2*tx ; |tx|^2].
    """
    @pl.when(pl.program_id(0) == 0)
    def _():
        acc_ref[...] = jnp.zeros_like(acc_ref)

    x = x_ref[0]                                            # (3, N) centered
    t = t_ref[0]                                            # (3, 1)
    tx = lax.dot_general(rs_ref[0], x, (((1,), (0,)), ((), ())),
                         preferred_element_type=jnp.float32) + t   # (3, N)
    xr = lax.dot_general(r_ref[0], x, (((1,), (0,)), ((), ())),
                         preferred_element_type=jnp.float32) + t   # (3, N)

    xr_ref[0] = xr
    txa_ref[0] = jnp.concatenate(
        [-2.0 * tx, jnp.sum(tx * tx, axis=0, keepdims=True)], axis=0)  # (4, N)
    acc_ref[...] += tx

    @pl.when(pl.program_id(0) == pl.num_programs(0) - 1)
    def _():
        mv_ref[...] = acc_ref[...] * inv_k


def _nn_kernel(txa_ref, mva_ref, idx_ref, minv_ref, mini_ref, *, tn):
    """Hard NN correspondence: for every consensus point m, nearest point of shape k.

    The reduction axis (points of shape k) is tiled over the grid's second axis with
    a running (min, argmin) carry in VMEM scratch, so no full (N, M) distance matrix
    or (N, M) iota is ever materialized.  Output is lane-dense (1, M) int32.
    dist^2(tx_n, mv_m) = |tx_n|^2 - 2 tx_n.mv_m + |mv_m|^2 ; the |mv_m|^2 term is
    constant per m and dropped, the rest comes out of a single (4,TN)x(4,M) dot
    with the augmented operands.
    """
    j = pl.program_id(1)

    @pl.when(j == 0)
    def _():
        minv_ref[...] = jnp.full_like(minv_ref, jnp.inf)
        mini_ref[...] = jnp.zeros_like(mini_ref)

    e = lax.dot_general(txa_ref[0], mva_ref[...],            # (TN, M)
                        (((0,), (0,)), ((), ())),
                        preferred_element_type=jnp.float32)

    tile_min = jnp.min(e, axis=0, keepdims=True)             # (1, M)
    row = lax.broadcasted_iota(jnp.int32, e.shape, 0)
    # first-occurrence argmin within the tile (matches torch.argmin tie-break)
    tile_idx = jnp.min(jnp.where(e <= tile_min, row, jnp.int32(tn)),
                       axis=0, keepdims=True) + j * tn

    better = tile_min < minv_ref[...]                        # strict: keep earlier tile
    mini_ref[...] = jnp.where(better, tile_idx, mini_ref[...])
    minv_ref[...] = jnp.minimum(tile_min, minv_ref[...])

    @pl.when(j == pl.num_programs(1) - 1)
    def _():
        idx_ref[0] = mini_ref[...]


def _pca_gram_kernel(x_ref, mean_ref, xc_ref, g_ref):
    """Single full-block call: sample mean, centered data, gram = X_c X_c^T."""
    x = x_ref[...]                                           # (K, D)
    m = jnp.mean(x, axis=0, keepdims=True)                   # (1, D)
    xc = x - m
    mean_ref[...] = m
    xc_ref[...] = xc
    g_ref[...] = lax.dot_general(xc, xc, (((1,), (1,)), ((), ())),
                                 preferred_element_type=jnp.float32)


def _components_kernel(u_ref, xc_ref, s_ref, o_ref):
    """PCA components: inv_s * (U^T @ X_c), one lane-dense (K, D) store."""
    o_ref[...] = s_ref[...] * lax.dot_general(
        u_ref[...], xc_ref[...], (((0,), (0,)), ((), ())),
        preferred_element_type=jnp.float32)


# ------------------------------- wrappers -----------------------------------

def prep_shapes(x3n):
    K, _, N = x3n.shape
    return pl.pallas_call(
        functools.partial(_prep_kernel, inv_n=1.0 / N),
        out_shape=(jax.ShapeDtypeStruct((K, 3, N), jnp.float32),
                   jax.ShapeDtypeStruct((K, 3, 3), jnp.float32)),
        grid=(K,),
        in_specs=[pl.BlockSpec((1, 3, N), lambda k: (k, 0, 0))],
        out_specs=(pl.BlockSpec((1, 3, N), lambda k: (k, 0, 0)),
                   pl.BlockSpec((1, 3, 3), lambda k: (k, 0, 0))),
        compiler_params=pltpu.CompilerParams(dimension_semantics=("parallel",)),
    )(x3n)


def transform_and_mean(xc, rs, r, t):
    K, _, N = xc.shape
    return pl.pallas_call(
        functools.partial(_transform_mean_kernel, inv_k=1.0 / K),
        out_shape=(jax.ShapeDtypeStruct((K, 4, N), jnp.float32),   # augmented tx
                   jax.ShapeDtypeStruct((K, 3, N), jnp.float32),   # aligned originals
                   jax.ShapeDtypeStruct((3, N), jnp.float32)),     # consensus mean
        grid=(K,),
        in_specs=[pl.BlockSpec((1, 3, N), lambda k: (k, 0, 0)),
                  pl.BlockSpec((1, 3, 3), lambda k: (k, 0, 0)),
                  pl.BlockSpec((1, 3, 3), lambda k: (k, 0, 0)),
                  pl.BlockSpec((1, 3, 1), lambda k: (k, 0, 0))],
        out_specs=(pl.BlockSpec((1, 4, N), lambda k: (k, 0, 0)),
                   pl.BlockSpec((1, 3, N), lambda k: (k, 0, 0)),
                   pl.BlockSpec((3, N), lambda k: (0, 0))),
        scratch_shapes=[pltpu.VMEM((3, N), jnp.float32)],
        compiler_params=pltpu.CompilerParams(dimension_semantics=("arbitrary",)),
    )(xc, rs, r, t)


def correspondence_nn(tx_aug, mv_aug, tn=128):
    K, _, N = tx_aug.shape
    M = mv_aug.shape[1]
    assert N % tn == 0, "point count must be a multiple of the 128-lane tile"
    return pl.pallas_call(
        functools.partial(_nn_kernel, tn=tn),
        out_shape=jax.ShapeDtypeStruct((K, 1, M), jnp.int32),
        grid=(K, N // tn),
        in_specs=[pl.BlockSpec((1, 4, tn), lambda k, j: (k, 0, j)),
                  pl.BlockSpec((4, M), lambda k, j: (0, 0))],
        out_specs=pl.BlockSpec((1, 1, M), lambda k, j: (k, 0, 0)),
        scratch_shapes=[pltpu.VMEM((1, M), jnp.float32),
                        pltpu.VMEM((1, M), jnp.int32)],
        compiler_params=pltpu.CompilerParams(
            dimension_semantics=("parallel", "arbitrary")),
    )(tx_aug, mv_aug)


def pca_gram(flat):
    K, D = flat.shape
    return pl.pallas_call(
        _pca_gram_kernel,
        out_shape=(jax.ShapeDtypeStruct((1, D), jnp.float32),
                   jax.ShapeDtypeStruct((K, D), jnp.float32),
                   jax.ShapeDtypeStruct((K, K), jnp.float32)),
    )(flat)


def pca_components(u, flat_c, inv_s_col):
    K, D = flat_c.shape
    return pl.pallas_call(
        _components_kernel,
        out_shape=jax.ShapeDtypeStruct((K, D), jnp.float32),
    )(u, flat_c, inv_s_col)


# -------------------------- ShapeModel forward pass --------------------------

def shape_model_forward(x):
    x = x.astype(jnp.float32)
    K, N, dim = x.shape
    x3n = jnp.transpose(x, (0, 2, 1))                         # (K, 3, N) lane-dense

    # ---- center + second moments (Pallas, fused) ----
    xc, cov = prep_shapes(x3n)                                # (K,3,N), (K,3,3)

    # principal-inertia rotation; shared by the normalized and the centered-only
    # branches (their covariances differ by a positive isotropic scale only).
    _, v = jnp.linalg.eigh(cov)                               # ascending eigvals
    R = jnp.swapaxes(v[..., ::-1], -1, -2)                    # rows = principal axes
    # IMCP.normalize_shape stand-in: unit-RMS scale; sum(c*c)/N == trace(cov).
    # NOTE: divides by N (per-point-norm RMS), cov by N (second moment), as before.
    inv_scale = lax.rsqrt(jnp.einsum("kii->k", cov) + 1e-12)  # (K,)

    # TODO(synk): IMCP.IMCP membership/pose and intrinsic_consensus_shape sources are
    # unavailable; deterministic identity group pose is used and folded into R below.
    pose_R = jnp.tile(jnp.eye(3, dtype=jnp.float32)[None], (K, 1, 1))
    pose_t = jnp.zeros((K, 3, 1), jnp.float32)

    r_full = jnp.einsum("kij,kjl->kil", pose_R, R)            # pose o inertia rotation
    rs_full = inv_scale[:, None, None] * r_full               # + unit-RMS scaling

    # ---- fused transform of both branches + consensus mean (Pallas) ----
    # TODO(synk): CPD.mv consensus shape unavailable; mean of aligned shapes is used.
    tx_aug, xr, mv = transform_and_mean(xc, rs_full, r_full, pose_t)

    # ---- correspondence (Pallas NN) ----
    # TODO(synk): CPD.correspondence (soft EM) unavailable; hard NN of each consensus
    # point onto shape k, so idx indexes points of x[k] like the module's reorder().
    mv_aug = jnp.concatenate([mv, jnp.ones((1, N), jnp.float32)], axis=0)  # (4, N)
    idx = correspondence_nn(tx_aug, mv_aug)                   # (K, 1, N) int32

    # ---- reorder the aligned original shapes by correspondence (gather; glue) ----
    permuted = jnp.take_along_axis(xr, jnp.broadcast_to(idx, (K, 3, N)), axis=2)
    permuted = jnp.transpose(permuted, (0, 2, 1))             # back to (K, N, 3)
    flat = permuted.reshape(K, N * dim)                       # final_shapes

    # ---- PCA fit on flattened permuted shapes (Pallas gram trick) ----
    mean_row, flat_c, gram = pca_gram(flat)                   # (1,D), (K,D), (K,K)
    w, U = jnp.linalg.eigh(gram)                              # ascending
    w = jnp.maximum(w[::-1], 0.0)
    U = U[:, ::-1]
    eig_vals = w / max(K - 1, 1)                              # explained_variance_
    s = jnp.sqrt(w)
    inv_s = jnp.where(s > 1e-8, 1.0 / s, 0.0)
    eig_vecs = pca_components(U, flat_c, inv_s[:, None])      # components_ (rows)

    return {
        "final_shapes": flat,                                 # (K, N*3)
        "mv": mv.T,                                           # (N, 3)
        "mean_shape": mean_row.reshape(-1),                   # (N*3,)
        "eig_vals": eig_vals,                                 # (K,)
        "eig_vecs": eig_vecs,                                 # (K, N*3)
        "correspondence": idx[:, 0, :],                       # (K, N)
    }


# --------------------------------- main --------------------------------------

if __name__ == "__main__":
    key = jax.random.PRNGKey(0)
    K, N, dim = 8, 256, 3                                     # (n_masks, n_points, 3)

    k0, k1 = jax.random.split(key)
    base = jax.random.normal(k0, (K, N, dim), dtype=jnp.float32)
    # anisotropic "ellipsoid-ish" point clouds with small per-shape offsets
    x = base * jnp.array([3.0, 2.0, 1.0], dtype=jnp.float32) \
        + 0.1 * jax.random.normal(k1, (K, 1, dim), dtype=jnp.float32)

    out = jax.jit(shape_model_forward)(x)
    jax.block_until_ready(out)

    assert out["final_shapes"].shape == (K, N * dim)
    assert out["mv"].shape == (N, dim)
    assert out["mean_shape"].shape == (N * dim,)
    assert out["eig_vals"].shape == (K,)
    assert out["eig_vecs"].shape == (K, N * dim)
    assert out["correspondence"].shape == (K, N)
    print("KERNEL_OK")
</pallas_src>

<mosaic_0001>
module attributes {stable_mosaic.version = 11 : i64} {
  func.func @_prep_kernel(%arg0: i32, %arg1: memref<1x3x256xf32, #tpu.memory_space<vmem>>, %arg2: memref<1x3x256xf32, #tpu.memory_space<vmem>>, %arg3: memref<1x3x3xf32, #tpu.memory_space<vmem>>) attributes {dimension_semantics = [#tpu.dimension_semantics<parallel>], iteration_bounds = array<i64: 8>, scalar_prefetch = 0 : i64, scratch_operands = 0 : i64, tpu.core_type = #tpu.core_type<tc>, window_params = [{transform_indices = @transform_0, window_bounds = array<i64: 1, 3, 256>}, {transform_indices = @transform_1, window_bounds = array<i64: 1, 3, 256>}, {transform_indices = @transform_2, window_bounds = array<i64: 1, 3, 3>}]} {
    %c0 = arith.constant 0 : index
    %c0_0 = arith.constant 0 : index
    %c0_1 = arith.constant 0 : index
    %0 = vector.load %arg1[%c0, %c0_0, %c0_1] : memref<1x3x256xf32, #tpu.memory_space<vmem>>, vector<1x3x256xf32>
    %1 = vector.shape_cast %0 : vector<1x3x256xf32> to vector<3x256xf32>
    %cst = arith.constant dense<0.000000e+00> : vector<3xf32>
    %2 = vector.multi_reduction <add>, %1, %cst [1] : vector<3x256xf32> to vector<3xf32>
    %3 = vector.shape_cast %2 : vector<3xf32> to vector<3x1xf32>
    %cst_2 = arith.constant 2.560000e+02 : f32
    %4 = vector.broadcast %cst_2 : f32 to vector<3x1xf32>
    %5 = arith.divf %3, %4 : vector<3x1xf32>
    %6 = vector.broadcast %5 : vector<3x1xf32> to vector<3x256xf32>
    %7 = arith.subf %1, %6 : vector<3x256xf32>
    %c0_3 = arith.constant 0 : index
    %c0_4 = arith.constant 0 : index
    %c0_5 = arith.constant 0 : index
    %8 = vector.load %arg2[%c0_3, %c0_4, %c0_5] : memref<1x3x256xf32, #tpu.memory_space<vmem>>, vector<1x3x256xf32>
    %9 = vector.shape_cast %8 : vector<1x3x256xf32> to vector<3x256xf32>
    %10 = vector.shape_cast %7 : vector<3x256xf32> to vector<1x3x256xf32>
    tpu.vector_store %arg2[%c0_3, %c0_4, %c0_5], %10 {strides = array<i32>} : memref<1x3x256xf32, #tpu.memory_space<vmem>>, vector<1x3x256xf32>,
    %cst_6 = arith.constant dense<0.000000e+00> : vector<3x3xf32>
    %11 = tpu.matmul %7, %7, %cst_6 {dimension_numbers = #tpu.dot_dimension_numbers<[1], [1], [0], [0], [0, 0, 1, 0], [], []>} : vector<3x256xf32>, vector<3x256xf32>, vector<3x3xf32> -> vector<3x3xf32>
    %cst_7 = arith.constant 3.906250e-03 : f32
    %12 = vector.broadcast %cst_7 : f32 to vector<3x3xf32>
    %13 = arith.mulf %11, %12 : vector<3x3xf32>
    %c0_8 = arith.constant 0 : index
    %c0_9 = arith.constant 0 : index
    %c0_10 = arith.constant 0 : index
    %14 = vector.load %arg3[%c0_8, %c0_9, %c0_10] : memref<1x3x3xf32, #tpu.memory_space<vmem>>, vector<1x3x3xf32>
    %15 = vector.shape_cast %14 : vector<1x3x3xf32> to vector<3x3xf32>
    %16 = vector.shape_cast %13 : vector<3x3xf32> to vector<1x3x3xf32>
    tpu.vector_store %arg3[%c0_8, %c0_9, %c0_10], %16 {strides = array<i32>} : memref<1x3x3xf32, #tpu.memory_space<vmem>>, vector<1x3x3xf32>,
    return
  }
  func.func @transform_0(%arg0: i32) -> (i32, i32, i32) {
    %c0_i32 = arith.constant 0 : i32
    %c0_i32_0 = arith.constant 0 : i32
    %c0_i32_1 = arith.constant 0 : i32
    return %arg0, %c0_i32, %c0_i32_0 : i32, i32, i32
  }
  func.func @transform_1(%arg0: i32) -> (i32, i32, i32) {
    %c0_i32 = arith.constant 0 : i32
    %c0_i32_0 = arith.constant 0 : i32
    %c0_i32_1 = arith.constant 0 : i32
    return %arg0, %c0_i32, %c0_i32_0 : i32, i32, i32
  }
  func.func @transform_2(%arg0: i32) -> (i32, i32, i32) {
    %c0_i32 = arith.constant 0 : i32
    %c0_i32_0 = arith.constant 0 : i32
    %c0_i32_1 = arith.constant 0 : i32
    return %arg0, %c0_i32, %c0_i32_0 : i32, i32, i32
  }
}

module attributes {stable_mosaic.version = 11 : i64} {
  func.func @_transform_mean_kernel(%arg0: i32, %arg1: memref<1x3x256xf32, #tpu.memory_space<vmem>>, %arg2: memref<1x3x3xf32, #tpu.memory_space<vmem>>, %arg3: memref<1x3x3xf32, #tpu.memory_space<vmem>>, %arg4: memref<1x3x1xf32, #tpu.memory_space<vmem>>, %arg5: memref<1x4x256xf32, #tpu.memory_space<vmem>>, %arg6: memref<1x3x256xf32, #tpu.memory_space<vmem>>, %arg7: memref<3x256xf32, #tpu.memory_space<vmem>>, %arg8: memref<3x256xf32, #tpu.memory_space<vmem>>) attributes {dimension_semantics = [#tpu.dimension_semantics<arbitrary>], iteration_bounds = array<i64: 8>, scalar_prefetch = 0 : i64, scratch_operands = 1 : i64, tpu.core_type = #tpu.core_type<tc>, window_params = [{transform_indices = @transform_0, window_bounds = array<i64: 1, 3, 256>}, {transform_indices = @transform_1, window_bounds = array<i64: 1, 3, 3>}, {transform_indices = @transform_2, window_bounds = array<i64: 1, 3, 3>}, {transform_indices = @transform_3, window_bounds = array<i64: 1, 3, 1>}, {transform_indices = @transform_4, window_bounds = array<i64: 1, 4, 256>}, {transform_indices = @transform_5, window_bounds = array<i64: 1, 3, 256>}, {pipeline_mode = #tpu.pipeline_mode<synchronous>, transform_indices = @transform_6, window_bounds = array<i64: 3, 256>}]} {
    %c0_i32 = arith.constant 0 : i32
    %0 = arith.cmpi eq, %arg0, %c0_i32 : i32
    %1 = arith.extui %0 : i1 to i32
    %c0_i32_0 = arith.constant 0 : i32
    %2 = arith.cmpi ne, %1, %c0_i32_0 : i32
    scf.if %2 {
      %cst_26 = arith.constant 0.000000e+00 : f32
      %35 = vector.broadcast %cst_26 : f32 to vector<3x256xf32>
      %c0_27 = arith.constant 0 : index
      %c0_28 = arith.constant 0 : index
      %36 = vector.load %arg8[%c0_27, %c0_28] : memref<3x256xf32, #tpu.memory_space<vmem>>, vector<3x256xf32>
      tpu.vector_store %arg8[%c0_27, %c0_28], %35 {strides = array<i32>} : memref<3x256xf32, #tpu.memory_space<vmem>>, vector<3x256xf32>,
    } else {
    }
    %c0 = arith.constant 0 : index
    %c0_1 = arith.constant 0 : index
    %c0_2 = arith.constant 0 : index
    %3 = vector.load %arg1[%c0, %c0_1, %c0_2] : memref<1x3x256xf32, #tpu.memory_space<vmem>>, vector<1x3x256xf32>
    %4 = vector.shape_cast %3 : vector<1x3x256xf32> to vector<3x256xf32>
    %c0_3 = arith.constant 0 : index
    %c0_4 = arith.constant 0 : index
    %c0_5 = arith.constant 0 : index
    %5 = vector.load %arg4[%c0_3, %c0_4, %c0_5] : memref<1x3x1xf32, #tpu.memory_space<vmem>>, vector<1x3x1xf32>
    %6 = vector.shape_cast %5 : vector<1x3x1xf32> to vector<3x1xf32>
    %c0_6 = arith.constant 0 : index
    %c0_7 = arith.constant 0 : index
    %c0_8 = arith.constant 0 : index
    %7 = vector.load %arg2[%c0_6, %c0_7, %c0_8] : memref<1x3x3xf32, #tpu.memory_space<vmem>>, vector<1x3x3xf32>
    %8 = vector.shape_cast %7 : vector<1x3x3xf32> to vector<3x3xf32>
    %cst = arith.constant dense<0.000000e+00> : vector<3x256xf32>
    %9 = tpu.matmul %8, %4, %cst {dimension_numbers = #tpu.dot_dimension_numbers<[1], [0], [0], [1], [0, 0, 1, 1], [], []>} : vector<3x3xf32>, vector<3x256xf32>, vector<3x256xf32> -> vector<3x256xf32>
    %10 = vector.broadcast %6 : vector<3x1xf32> to vector<3x256xf32>
    %11 = arith.addf %9, %10 : vector<3x256xf32>
    %c0_9 = arith.constant 0 : index
    %c0_10 = arith.constant 0 : index
    %c0_11 = arith.constant 0 : index
    %12 = vector.load %arg3[%c0_9, %c0_10, %c0_11] : memref<1x3x3xf32, #tpu.memory_space<vmem>>, vector<1x3x3xf32>
    %13 = vector.shape_cast %12 : vector<1x3x3xf32> to vector<3x3xf32>
    %cst_12 = arith.constant dense<0.000000e+00> : vector<3x256xf32>
    %14 = tpu.matmul %13, %4, %cst_12 {dimension_numbers = #tpu.dot_dimension_numbers<[1], [0], [0], [1], [0, 0, 1, 1], [], []>} : vector<3x3xf32>, vector<3x256xf32>, vector<3x256xf32> -> vector<3x256xf32>
    %15 = vector.broadcast %6 : vector<3x1xf32> to vector<3x256xf32>
    %16 = arith.addf %14, %15 : vector<3x256xf32>
    %c0_13 = arith.constant 0 : index
    %c0_14 = arith.constant 0 : index
    %c0_15 = arith.constant 0 : index
    %17 = vector.load %arg6[%c0_13, %c0_14, %c0_15] : memref<1x3x256xf32, #tpu.memory_space<vmem>>, vector<1x3x256xf32>
    %18 = vector.shape_cast %17 : vector<1x3x256xf32> to vector<3x256xf32>
    %19 = vector.shape_cast %16 : vector<3x256xf32> to vector<1x3x256xf32>
    tpu.vector_store %arg6[%c0_13, %c0_14, %c0_15], %19 {strides = array<i32>} : memref<1x3x256xf32, #tpu.memory_space<vmem>>, vector<1x3x256xf32>,
    %cst_16 = arith.constant -2.000000e+00 : f32
    %20 = vector.broadcast %cst_16 : f32 to vector<3x256xf32>
    %21 = arith.mulf %20, %11 : vector<3x256xf32>
    %22 = arith.mulf %11, %11 : vector<3x256xf32>
    %cst_17 = arith.constant dense<0.000000e+00> : vector<256xf32>
    %23 = vector.multi_reduction <add>, %22, %cst_17 [0] : vector<3x256xf32> to vector<256xf32>
    %24 = vector.shape_cast %23 : vector<256xf32> to vector<1x256xf32>
    %25 = tpu.concatenate %21, %24 in 0 : vector<3x256xf32>, vector<1x256xf32> -> vector<4x256xf32>
    %c0_18 = arith.constant 0 : index
    %c0_19 = arith.constant 0 : index
    %c0_20 = arith.constant 0 : index
    %26 = vector.load %arg5[%c0_18, %c0_19, %c0_20] : memref<1x4x256xf32, #tpu.memory_space<vmem>>, vector<1x4x256xf32>
    %27 = vector.shape_cast %26 : vector<1x4x256xf32> to vector<4x256xf32>
    %28 = vector.shape_cast %25 : vector<4x256xf32> to vector<1x4x256xf32>
    tpu.vector_store %arg5[%c0_18, %c0_19, %c0_20], %28 {strides = array<i32>} : memref<1x4x256xf32, #tpu.memory_space<vmem>>, vector<1x4x256xf32>,
    %c0_21 = arith.constant 0 : index
    %c0_22 = arith.constant 0 : index
    %29 = vector.load %arg8[%c0_21, %c0_22] : memref<3x256xf32, #tpu.memory_space<vmem>>, vector<3x256xf32>
    %30 = arith.addf %29, %11 : vector<3x256xf32>
    %c0_23 = arith.constant 0 : index
    %c0_24 = arith.constant 0 : index
    %31 = vector.load %arg8[%c0_23, %c0_24] : memref<3x256xf32, #tpu.memory_space<vmem>>, vector<3x256xf32>
    tpu.vector_store %arg8[%c0_23, %c0_24], %30 {strides = array<i32>} : memref<3x256xf32, #tpu.memory_space<vmem>>, vector<3x256xf32>,
    %c7_i32 = arith.constant 7 : i32
    %32 = arith.cmpi eq, %arg0, %c7_i32 : i32
    %33 = arith.extui %32 : i1 to i32
    %c0_i32_25 = arith.constant 0 : i32
    %34 = arith.cmpi ne, %33, %c0_i32_25 : i32
    scf.if %34 {
      %c0_26 = arith.constant 0 : index
      %c0_27 = arith.constant 0 : index
      %35 = vector.load %arg8[%c0_26, %c0_27] : memref<3x256xf32, #tpu.memory_space<vmem>>, vector<3x256xf32>
      %cst_28 = arith.constant 1.250000e-01 : f32
      %36 = vector.broadcast %cst_28 : f32 to vector<3x256xf32>
      %37 = arith.mulf %35, %36 : vector<3x256xf32>
      %c0_29 = arith.constant 0 : index
      %c0_30 = arith.constant 0 : index
      %38 = vector.load %arg7[%c0_29, %c0_30] : memref<3x256xf32, #tpu.memory_space<vmem>>, vector<3x256xf32>
      tpu.vector_store %arg7[%c0_29, %c0_30], %37 {strides = array<i32>} : memref<3x256xf32, #tpu.memory_space<vmem>>, vector<3x256xf32>,
    } else {
    }
    return
  }
  func.func @transform_0(%arg0: i32) -> (i32, i32, i32) {
    %c0_i32 = arith.constant 0 : i32
    %c0_i32_0 = arith.constant 0 : i32
    %c0_i32_1 = arith.constant 0 : i32
    return %arg0, %c0_i32, %c0_i32_0 : i32, i32, i32
  }
  func.func @transform_1(%arg0: i32) -> (i32, i32, i32) {
    %c0_i32 = arith.constant 0 : i32
    %c0_i32_0 = arith.constant 0 : i32
    %c0_i32_1 = arith.constant 0 : i32
    return %arg0, %c0_i32, %c0_i32_0 : i32, i32, i32
  }
  func.func @transform_2(%arg0: i32) -> (i32, i32, i32) {
    %c0_i32 = arith.constant 0 : i32
    %c0_i32_0 = arith.constant 0 : i32
    %c0_i32_1 = arith.constant 0 : i32
    return %arg0, %c0_i32, %c0_i32_0 : i32, i32, i32
  }
  func.func @transform_3(%arg0: i32) -> (i32, i32, i32) {
    %c0_i32 = arith.constant 0 : i32
    %c0_i32_0 = arith.constant 0 : i32
    %c0_i32_1 = arith.constant 0 : i32
    return %arg0, %c0_i32, %c0_i32_0 : i32, i32, i32
  }
  func.func @transform_4(%arg0: i32) -> (i32, i32, i32) {
    %c0_i32 = arith.constant 0 : i32
    %c0_i32_0 = arith.constant 0 : i32
    %c0_i32_1 = arith.constant 0 : i32
    return %arg0, %c0_i32, %c0_i32_0 : i32, i32, i32
  }
  func.func @transform_5(%arg0: i32) -> (i32, i32, i32) {
    %c0_i32 = arith.constant 0 : i32
    %c0_i32_0 = arith.constant 0 : i32
    %c0_i32_1 = arith.constant 0 : i32
    return %arg0, %c0_i32, %c0_i32_0 : i32, i32, i32
  }
  func.func @transform_6(%arg0: i32) -> (i32, i32) {
    %c0_i32 = arith.constant 0 : i32
    %c0_i32_0 = arith.constant 0 : i32
    %c0_i32_1 = arith.constant 0 : i32
    return %c0_i32, %c0_i32_0 : i32, i32
  }
}

module attributes {stable_mosaic.version = 11 : i64} {
  func.func @_nn_kernel(%arg0: i32, %arg1: i32, %arg2: memref<1x4x128xf32, #tpu.memory_space<vmem>>, %arg3: memref<4x256xf32, #tpu.memory_space<vmem>>, %arg4: memref<1x1x256xi32, #tpu.memory_space<vmem>>, %arg5: memref<1x256xf32, #tpu.memory_space<vmem>>, %arg6: memref<1x256xi32, #tpu.memory_space<vmem>>) attributes {dimension_semantics = [#tpu.dimension_semantics<parallel>, #tpu.dimension_semantics<arbitrary>], iteration_bounds = array<i64: 8, 2>, scalar_prefetch = 0 : i64, scratch_operands = 2 : i64, tpu.core_type = #tpu.core_type<tc>, window_params = [{transform_indices = @transform_0, window_bounds = array<i64: 1, 4, 128>}, {pipeline_mode = #tpu.pipeline_mode<synchronous>, transform_indices = @transform_1, window_bounds = array<i64: 4, 256>}, {transform_indices = @transform_2, window_bounds = array<i64: 1, 1, 256>}]} {
    %c0_i32 = arith.constant 0 : i32
    %0 = arith.cmpi eq, %arg1, %c0_i32 : i32
    %1 = arith.extui %0 : i1 to i32
    %c0_i32_0 = arith.constant 0 : i32
    %2 = arith.cmpi ne, %1, %c0_i32_0 : i32
    scf.if %2 {
      %cst_19 = arith.constant 0x7F800000 : f32
      %30 = vector.broadcast %cst_19 : f32 to vector<1x256xf32>
      %c0_20 = arith.constant 0 : index
      %c0_21 = arith.constant 0 : index
      %31 = vector.load %arg5[%c0_20, %c0_21] : memref<1x256xf32, #tpu.memory_space<vmem>>, vector<1x256xf32>
      tpu.vector_store %arg5[%c0_20, %c0_21], %30 {strides = array<i32>} : memref<1x256xf32, #tpu.memory_space<vmem>>, vector<1x256xf32>,
      %c0_i32_22 = arith.constant 0 : i32
      %32 = vector.broadcast %c0_i32_22 : i32 to vector<1x256xi32>
      %c0_23 = arith.constant 0 : index
      %c0_24 = arith.constant 0 : index
      %33 = vector.load %arg6[%c0_23, %c0_24] : memref<1x256xi32, #tpu.memory_space<vmem>>, vector<1x256xi32>
      tpu.vector_store %arg6[%c0_23, %c0_24], %32 {strides = array<i32>} : memref<1x256xi32, #tpu.memory_space<vmem>>, vector<1x256xi32>,
    } else {
    }
    %c0 = arith.constant 0 : index
    %c0_1 = arith.constant 0 : index
    %c0_2 = arith.constant 0 : index
    %3 = vector.load %arg2[%c0, %c0_1, %c0_2] : memref<1x4x128xf32, #tpu.memory_space<vmem>>, vector<1x4x128xf32>
    %4 = vector.shape_cast %3 : vector<1x4x128xf32> to vector<4x128xf32>
    %c0_3 = arith.constant 0 : index
    %c0_4 = arith.constant 0 : index
    %5 = vector.load %arg3[%c0_3, %c0_4] : memref<4x256xf32, #tpu.memory_space<vmem>>, vector<4x256xf32>
    %cst = arith.constant dense<0.000000e+00> : vector<128x256xf32>
    %6 = tpu.matmul %4, %5, %cst {dimension_numbers = #tpu.dot_dimension_numbers<[0], [0], [1], [1], [0, 1, 1, 1], [], []>} : vector<4x128xf32>, vector<4x256xf32>, vector<128x256xf32> -> vector<128x256xf32>
    %cst_5 = arith.constant dense<0x7F800000> : vector<256xf32>
    %7 = vector.multi_reduction <minimumf>, %6, %cst_5 [0] : vector<128x256xf32> to vector<256xf32>
    %8 = vector.shape_cast %7 : vector<256xf32> to vector<1x256xf32>
    %9 = tpu.iota {dimensions = array<i32: 0>} : vector<128x256xi32>
    %10 = vector.broadcast %8 : vector<1x256xf32> to vector<128x256xf32>
    %11 = arith.cmpf ole, %6, %10 : vector<128x256xf32>
    %c128_i32 = arith.constant 128 : i32
    %12 = vector.broadcast %c128_i32 : i32 to vector<128x256xi32>
    %13 = arith.select %11, %9, %12 : vector<128x256xi1>, vector<128x256xi32>
    %cst_6 = arith.constant dense<2147483647> : vector<256xi32>
    %14 = vector.multi_reduction <minsi>, %13, %cst_6 [0] : vector<128x256xi32> to vector<256xi32>
    %15 = vector.shape_cast %14 : vector<256xi32> to vector<1x256xi32>
    %c128_i32_7 = arith.constant 128 : i32
    %16 = arith.muli %arg1, %c128_i32_7 : i32
    %17 = vector.broadcast %16 : i32 to vector<1x256xi32>
    %18 = arith.addi %15, %17 : vector<1x256xi32>
    %c0_8 = arith.constant 0 : index
    %c0_9 = arith.constant 0 : index
    %19 = vector.load %arg5[%c0_8, %c0_9] : memref<1x256xf32, #tpu.memory_space<vmem>>, vector<1x256xf32>
    %20 = arith.cmpf olt, %8, %19 : vector<1x256xf32>
    %c0_10 = arith.constant 0 : index
    %c0_11 = arith.constant 0 : index
    %21 = vector.load %arg6[%c0_10, %c0_11] : memref<1x256xi32, #tpu.memory_space<vmem>>, vector<1x256xi32>
    %22 = arith.select %20, %18, %21 : vector<1x256xi1>, vector<1x256xi32>
    %c0_12 = arith.constant 0 : index
    %c0_13 = arith.constant 0 : index
    %23 = vector.load %arg6[%c0_12, %c0_13] : memref<1x256xi32, #tpu.memory_space<vmem>>, vector<1x256xi32>
    tpu.vector_store %arg6[%c0_12, %c0_13], %22 {strides = array<i32>} : memref<1x256xi32, #tpu.memory_space<vmem>>, vector<1x256xi32>,
    %c0_14 = arith.constant 0 : index
    %c0_15 = arith.constant 0 : index
    %24 = vector.load %arg5[%c0_14, %c0_15] : memref<1x256xf32, #tpu.memory_space<vmem>>, vector<1x256xf32>
    %25 = arith.minimumf %8, %24 : vector<1x256xf32>
    %c0_16 = arith.constant 0 : index
    %c0_17 = arith.constant 0 : index
    %26 = vector.load %arg5[%c0_16, %c0_17] : memref<1x256xf32, #tpu.memory_space<vmem>>, vector<1x256xf32>
    tpu.vector_store %arg5[%c0_16, %c0_17], %25 {strides = array<i32>} : memref<1x256xf32, #tpu.memory_space<vmem>>, vector<1x256xf32>,
    %c1_i32 = arith.constant 1 : i32
    %27 = arith.cmpi eq, %arg1, %c1_i32 : i32
    %28 = arith.extui %27 : i1 to i32
    %c0_i32_18 = arith.constant 0 : i32
    %29 = arith.cmpi ne, %28, %c0_i32_18 : i32
    scf.if %29 {
      %c0_19 = arith.constant 0 : index
      %c0_20 = arith.constant 0 : index
      %30 = vector.load %arg6[%c0_19, %c0_20] : memref<1x256xi32, #tpu.memory_space<vmem>>, vector<1x256xi32>
      %c0_21 = arith.constant 0 : index
      %c0_22 = arith.constant 0 : index
      %c0_23 = arith.constant 0 : index
      %31 = vector.load %arg4[%c0_21, %c0_22, %c0_23] : memref<1x1x256xi32, #tpu.memory_space<vmem>>, vector<1x1x256xi32>
      %32 = vector.shape_cast %31 : vector<1x1x256xi32> to vector<1x256xi32>
      %33 = vector.shape_cast %30 : vector<1x256xi32> to vector<1x1x256xi32>
      tpu.vector_store %arg4[%c0_21, %c0_22, %c0_23], %33 {strides = array<i32>} : memref<1x1x256xi32, #tpu.memory_space<vmem>>, vector<1x1x256xi32>,
    } else {
    }
    return
  }
  func.func @transform_0(%arg0: i32, %arg1: i32) -> (i32, i32, i32) {
    %c0_i32 = arith.constant 0 : i32
    %c0_i32_0 = arith.constant 0 : i32
    return %arg0, %c0_i32, %arg1 : i32, i32, i32
  }
  func.func @transform_1(%arg0: i32, %arg1: i32) -> (i32, i32) {
    %c0_i32 = arith.constant 0 : i32
    %c0_i32_0 = arith.constant 0 : i32
    %c0_i32_1 = arith.constant 0 : i32
    return %c0_i32, %c0_i32_0 : i32, i32
  }
  func.func @transform_2(%arg0: i32, %arg1: i32) -> (i32, i32, i32) {
    %c0_i32 = arith.constant 0 : i32
    %c0_i32_0 = arith.constant 0 : i32
    %c0_i32_1 = arith.constant 0 : i32
    return %arg0, %c0_i32, %c0_i32_0 : i32, i32, i32
  }
}

module attributes {stable_mosaic.version = 11 : i64} {
  func.func @_pca_gram_kernel(%arg0: memref<8x768xf32, #tpu.memory_space<vmem>>, %arg1: memref<1x768xf32, #tpu.memory_space<vmem>>, %arg2: memref<8x768xf32, #tpu.memory_space<vmem>>, %arg3: memref<8x8xf32, #tpu.memory_space<vmem>>) attributes {dimension_semantics = [], scalar_prefetch = 0 : i64, scratch_operands = 0 : i64, tpu.core_type = #tpu.core_type<tc>} {
    %c0 = arith.constant 0 : index
    %c0_0 = arith.constant 0 : index
    %0 = vector.load %arg0[%c0, %c0_0] : memref<8x768xf32, #tpu.memory_space<vmem>>, vector<8x768xf32>
    %cst = arith.constant dense<0.000000e+00> : vector<768xf32>
    %1 = vector.multi_reduction <add>, %0, %cst [0] : vector<8x768xf32> to vector<768xf32>
    %2 = vector.shape_cast %1 : vector<768xf32> to vector<1x768xf32>
    %cst_1 = arith.constant 8.000000e+00 : f32
    %3 = vector.broadcast %cst_1 : f32 to vector<1x768xf32>
    %4 = arith.divf %2, %3 : vector<1x768xf32>
    %5 = vector.broadcast %4 : vector<1x768xf32> to vector<8x768xf32>
    %6 = arith.subf %0, %5 : vector<8x768xf32>
    %c0_2 = arith.constant 0 : index
    %c0_3 = arith.constant 0 : index
    %7 = vector.load %arg1[%c0_2, %c0_3] : memref<1x768xf32, #tpu.memory_space<vmem>>, vector<1x768xf32>
    tpu.vector_store %arg1[%c0_2, %c0_3], %4 {strides = array<i32>} : memref<1x768xf32, #tpu.memory_space<vmem>>, vector<1x768xf32>,
    %c0_4 = arith.constant 0 : index
    %c0_5 = arith.constant 0 : index
    %8 = vector.load %arg2[%c0_4, %c0_5] : memref<8x768xf32, #tpu.memory_space<vmem>>, vector<8x768xf32>
    tpu.vector_store %arg2[%c0_4, %c0_5], %6 {strides = array<i32>} : memref<8x768xf32, #tpu.memory_space<vmem>>, vector<8x768xf32>,
    %cst_6 = arith.constant dense<0.000000e+00> : vector<8x8xf32>
    %9 = tpu.matmul %6, %6, %cst_6 {dimension_numbers = #tpu.dot_dimension_numbers<[1], [1], [0], [0], [0, 0, 1, 0], [], []>} : vector<8x768xf32>, vector<8x768xf32>, vector<8x8xf32> -> vector<8x8xf32>
    %c0_7 = arith.constant 0 : index
    %c0_8 = arith.constant 0 : index
    %10 = vector.load %arg3[%c0_7, %c0_8] : memref<8x8xf32, #tpu.memory_space<vmem>>, vector<8x8xf32>
    tpu.vector_store %arg3[%c0_7, %c0_8], %9 {strides = array<i32>} : memref<8x8xf32, #tpu.memory_space<vmem>>, vector<8x8xf32>,
    return
  }
}

module attributes {stable_mosaic.version = 11 : i64} {
  func.func @_components_kernel(%arg0: memref<8x8xf32, #tpu.memory_space<vmem>>, %arg1: memref<8x768xf32, #tpu.memory_space<vmem>>, %arg2: memref<8x1xf32, #tpu.memory_space<vmem>>, %arg3: memref<8x768xf32, #tpu.memory_space<vmem>>) attributes {dimension_semantics = [], scalar_prefetch = 0 : i64, scratch_operands = 0 : i64, tpu.core_type = #tpu.core_type<tc>} {
    %c0 = arith.constant 0 : index
    %c0_0 = arith.constant 0 : index
    %0 = vector.load %arg2[%c0, %c0_0] : memref<8x1xf32, #tpu.memory_space<vmem>>, vector<8x1xf32>
    %c0_1 = arith.constant 0 : index
    %c0_2 = arith.constant 0 : index
    %1 = vector.load %arg0[%c0_1, %c0_2] : memref<8x8xf32, #tpu.memory_space<vmem>>, vector<8x8xf32>
    %c0_3 = arith.constant 0 : index
    %c0_4 = arith.constant 0 : index
    %2 = vector.load %arg1[%c0_3, %c0_4] : memref<8x768xf32, #tpu.memory_space<vmem>>, vector<8x768xf32>
    %cst = arith.constant dense<0.000000e+00> : vector<8x768xf32>
    %3 = tpu.matmul %1, %2, %cst {dimension_numbers = #tpu.dot_dimension_numbers<[0], [0], [1], [1], [0, 1, 1, 1], [], []>} : vector<8x8xf32>, vector<8x768xf32>, vector<8x768xf32> -> vector<8x768xf32>
    %4 = vector.broadcast %0 : vector<8x1xf32> to vector<8x768xf32>
    %5 = arith.mulf %4, %3 : vector<8x768xf32>
    %c0_5 = arith.constant 0 : index
    %c0_6 = arith.constant 0 : index
    %6 = vector.load %arg3[%c0_5, %c0_6] : memref<8x768xf32, #tpu.memory_space<vmem>>, vector<8x768xf32>
    tpu.vector_store %arg3[%c0_5, %c0_6], %5 {strides = array<i32>} : memref<8x768xf32, #tpu.memory_space<vmem>>, vector<8x768xf32>,
    return
  }
}

</mosaic_0001>

<bundles_post_ra>
// kernel: custom-call.4
= control target key start
LH: loop header
LB: loop body
LE: loop exit
PB: predicated region body
PF: predicated region fallthrough
CT: control target
= control target key end

     0   :  { %s1724_s30 = smov 0   ;;  %s1726_s10 = smov 0   ;;  %s2050_s0 = inlined_call_operand.vmem [shape: f32[8,2,2], index: 0, kind: input, shape index: {}]   ;;  %s2051_s1 = inlined_call_operand.vmem [shape: f32[8,2,2], index: 1, kind: input, shape index: {}]   ;;  %s2052_s2 = inlined_call_operand.vmem [shape: f32[8,2,2], index: 2, kind: input, shape index: {}]   ;;  %s2053_s3 = inlined_call_operand.vmem [shape: f32[8,2,2], index: 3, kind: input, shape index: {}]   ;;  %s2054_s4 = inlined_call_operand.vmem [shape: f32[8,2], index: 4, kind: output, shape index: {0}]   ;;  %s2055_s5 = inlined_call_operand.vmem [shape: f32[8,2], index: 5, kind: output, shape index: {1}]   ;;  %s2056_s6 = inlined_call_operand.vmem [shape: f32[8,2,2], index: 6, kind: output, shape index: {2}]   ;;  %s2057_s7 = inlined_call_operand.vmem [shape: f32[8,2,2], index: 7, kind: output, shape index: {3}]   ;;  %s2058_s8 = inlined_call_operand.vmem [shape: f32[8,2,2], index: 8, kind: output, shape index: {4}]   ;;  %s2059_s9 = inlined_call_operand.vmem [shape: f32[8,2,2], index: 9, kind: output, shape index: {5}]  }
   0x1   :  { %s1728_s11 = smov 0  }
   0x2 LB: > { %s1740_s12 = sadd.s32 4294967295, %s1661_s11   ;;  %s1743_s13 = sadd.s32 1, %s1661_s11   ;;  %s1661_s11 = sphi %s1728_s11, %s2078_s11   ;;  %s1657_s10 = sphi %s1726_s10, %s2077_s10   ;;  %s1653_s30 = sphi %s1724_s30, %s2076_s30  }
   0x3   : > { %s20_s14 = sshrl.u32 %s1661_s11, 3  ;;  %s21_s15 = sshrl.u32 %s1743_s13, 3 }
   0x4   : > { %s22_s16 = ssub.s32 %s20_s14, %s21_s15  ;;  %s25_s17 = sadd.s32 1, %s1657_s10 }
   0x5   : > { %p23_p0 = scmp.eq.s32.totalorder %s22_s16, 0  ;;  %p35_p1 = scmp.ne.s32.totalorder %s1657_s10, %s1653_s30 }
   0x6   : > { %p36_p2 = scmp.eq.s32.totalorder %s1740_s12, 7  ;;  %p1522_p4 = scmp.ge.s32.totalorder %s1661_s11, 8 }
   0x7   : > { %s1752_s18 = scalar_select %p23_p0, %s1657_s10, %s25_s17  }
   0x8   : > { %p1754_p3 = por %p36_p2, %p35_p1  ;;  %86 = sbr.rel (%p1522_p4) target bundleno = 18 (0x12), region = 16 }
   0x9   : > { %2060 = sst [smem:[#allocation31_spill]] %s1752_s18  ;;  %s88_s20 = sand.u32 (!%p1522_p4), 1, %s1661_s11  }
   0xa   : > { %s1524_s21 = sshll.u32 (!%p1522_p4), %s1661_s11, 1  ;;  %s1523_s22 = sshll.u32 (!%p1522_p4), %s88_s20, 1 }
   0xb   : > { %s92_s25 = scalar_lea.vmem (!%p1522_p4), %s2050_s0, %s1524_s21  ;;  %s90_s26 = scalar_lea.vmem (!%p1522_p4), [#allocation1], %s1523_s22 }
   0xc   : > { %s131_s29 = scalar_lea.vmem (!%p1522_p4), %s2051_s1, %s1524_s21  ;;  %s170_s16 = scalar_lea.vmem (!%p1522_p4), %s2052_s2, %s1524_s21 }
   0xd   : > { %v109_v0 = vld [vmem:[%s92_s25] sm:$0x3]  ;;  %s129_s17 = scalar_lea.vmem [#allocation3], %s1523_s22  ;;  %s209_s23 = scalar_lea.vmem %s2053_s3, %s1524_s21 }
   0xe   : > { %110 = vst [vmem:[%s90_s26] sm:$0x3] %v109_v0  ;;  %v148_v1 = vld [vmem:[%s131_s29] sm:$0x3]  ;;  %s168_s24 = scalar_lea.vmem [#allocation5], %s1523_s22  ;;  %s207_s25 = scalar_lea.vmem [#allocation7], %s1523_s22 }
   0xf   : > { %149 = vst [vmem:[%s129_s17] sm:$0x3] %v148_v1  ;;  %v187_v2 = vld [vmem:[%s170_s16] sm:$0x3] }
  0x10   : > { %188 = vst [vmem:[%s168_s24] sm:$0x3] %v187_v2  ;;  %v226_v3 = vld [vmem:[%s209_s23] sm:$0x3] }
  0x11   : > { %227 = vst [vmem:[%s207_s25] sm:$0x3] %v226_v3 }
  0x12 PF: > { %p1531_p5 = scmp.ge.s32.totalorder %s1661_s11, 1  ;;  %p244_p6 = scmp.lt.s32.totalorder %s1661_s11, 9 }
  0x14   : > { %p245_p7 = pnand %p1531_p5, %p244_p6 }
  0x16   : > { %248 = sbr.rel (%p245_p7) target bundleno = 986 (0x3da), region = 140 }
  0x1b   : > { %s267_s26 = sand.u32 1, %s1740_s12   ;;  %s285_s27 = sand.u32 1, %s1653_s30   ;;  %v349_v4 = vlaneseq  ;;  %v1671_v5 = vmov 0.0  }
  0x1c   : > { %s1777_s28 = sshll.u32 %s267_s26, 1  ;;  %s1779_s18 = sshll.u32 %s285_s27, 3  ;;  %344 = vst [vmem:[#allocation10] sm:$0xff] %v1671_v5  ;;  %345 = vst [vmem:[#allocation12] sm:$0xff] %v1671_v5 }
  0x1d   : > { %346 = vst [vmem:[#allocation14] sm:$0xff] %v1671_v5  ;;  %347 = vst [vmem:[#allocation16] sm:$0xff] %v1671_v5  ;;  %v1781_v6 = vand.u32 127, %v349_v4  ;;  %v1783_v7 = vshrl.u32 %v349_v4, 7  ;;  %s269_s11 = scalar_lea.vmem [#allocation1], %s1777_s28  ;;  %s273_s30 = scalar_lea.vmem [#allocation3], %s1777_s28 }
  0x1e   : > { %v313_v8 = vld [vmem:[%s269_s11] sm:$0x3]  ;;  %v318_v9 = vld [vmem:[%s273_s30] sm:$0x3]  ;;  %s277_s21 = scalar_lea.vmem [#allocation5], %s1777_s28  ;;  %s281_s22 = scalar_lea.vmem [#allocation7], %s1777_s28 }
  0x1f   : > { %314 = vst [vmem:[#allocation0] sm:$0x3] %v313_v8  ;;  %319 = vst [vmem:[#allocation2] sm:$0x3] %v318_v9  ;;  %v323_v10 = vld [vmem:[%s277_s21] sm:$0x3]  ;;  %v351_v6 = vmov %v1781_v6  ;;  %v354_v7 = vmov %v1783_v7 }
  0x20   : > { %v328_v11 = vld [vmem:[%s281_s22] sm:$0x3]  ;;  %324 = vst [vmem:[#allocation4] sm:$0x3] %v323_v10  ;;  %v364_v6 = vmov %v1781_v6  ;;  %v367_v7 = vmov %v1783_v7  ;;  %s332_s29 = smov [#allocation18]  ;;  %s335_s14 = smov [#allocation19]  ;;  %vm358_vm0 = vcmp.eq.s32.totalorder %v354_v7, %v351_v6 }
  0x21   : > { %329 = vst [vmem:[#allocation6] sm:$0x3] %v328_v11  ;;  %vm371_vm1 = vcmp.eq.s32.totalorder %v367_v7, %v364_v6  ;;  %s348_s15 = smov [#allocation10]  ;;  %s361_s16 = smov [#allocation16]  ;;  %vm1411_vm2 = vcmp.lt.s32.totalorder %v1781_v6, 2  ;;  %v1403_v6 = vmov %v1781_v6  ;;  %v1406_v7 = vmov %v1783_v7 }
  0x22   : > { %s338_s17 = smov [#allocation20]  ;;  %s341_s20 = smov [#allocation21]  ;;  %vm1416_vm3 = vcmp.eq.s32.totalorder %v1406_v7, %v1403_v6  ;;  %v1454_v6 = vmov %v1781_v6  ;;  %v1423_v7 = vmov %v1783_v7 }
  0x23   : > { %v355_v12 = vld [vmem:[%s348_s15] sm:$0x3]  ;;  %s1407_s30 = smov [#allocation18]  ;;  %s1424_s21 = smov [#allocation19]  ;;  %v1420_v6 = vmov %v1781_v6  ;;  %v1457_v7 = vmov %v1783_v7 }
  0x24   : > { %v368_v13 = vld [vmem:[%s361_s16] sm:$0x3]  ;;  %v359_v16 = vsel %vm358_vm0, 1.0, %v355_v12  ;;  %s1441_s22 = smov [#allocation20]  ;;  %v1437_v6 = vmov %v1781_v6  ;;  %v1440_v7 = vmov %v1783_v7  ;;  %vm1467_vm4 = vcmp.eq.s32.totalorder %v1457_v7, %v1454_v6 }
  0x25   : > { %v372_v17 = vsel %vm371_vm1, 1.0, %v368_v13  ;;  %360 = vst [vmem:[%s348_s15] sm:$0x3] %v359_v16 }
  0x26   : > { %v333_v14 = vld [vmem:[#allocation0] sm:$0xff]  ;;  %v336_v15 = vld [vmem:[#allocation2] sm:$0xff]  ;;  %373 = vst [vmem:[%s361_s16] sm:$0x3] %v372_v17 }
  0x27   : > { %334 = vst [vmem:[%s332_s29] sm:$0xff] %v333_v14  ;;  %337 = vst [vmem:[%s335_s14] sm:$0xff] %v336_v15  ;;  %v339_v18 = vld [vmem:[#allocation4] sm:$0xff]  ;;  %s1458_s29 = smov [#allocation21] }
  0x28   : > { %v342_v19 = vld [vmem:[#allocation6] sm:$0xff]  ;;  %340 = vst [vmem:[%s338_s17] sm:$0xff] %v339_v18 }
  0x29   : > { %343 = vst [vmem:[%s341_s20] sm:$0xff] %v342_v19 }
  0x2e   : > { %v1413_v20 = vld [vmem:[%s1407_s30] sm:$0x3] }
  0x2f   : > { %v1430_v21 = vld [vmem:[%s1424_s21] sm:$0x3]  ;;  %v1414_v22 = vsel %vm1411_vm2, %v1413_v20, 0.0 }
  0x30   : > { %v1431_v23 = vsel %vm1411_vm2, %v1430_v21, 0.0  ;;  %v1447_v24 = vld [vmem:[%s1441_s22] sm:$0x3]  ;;  %v1415_v26 = vmul.f32 %v1414_v22, %v1414_v22 }
  0x31   : > { %v1464_v25 = vld [vmem:[%s1458_s29] sm:$0x3]  ;;  %v1432_v27 = vmul.f32 %v1431_v23, %v1431_v23  ;;  %v1448_v28 = vsel %vm1411_vm2, %v1447_v24, 0.0 }
  0x32   : > { %v1465_v29 = vsel %vm1411_vm2, %v1464_v25, 0.0  ;;  %v1449_v30 = vmul.f32 %v1448_v28, %v1448_v28  ;;  %v1417_v33 = vsel %vm1416_vm3, 0.0, %v1415_v26 }
  0x33   : > { %v1434_v31 = vadd.f32 %v1432_v27, %v1415_v26  ;;  %v1466_v32 = vmul.f32 %v1465_v29, %v1465_v29  ;;  %v1433_v34 = vadd.f32 %v1432_v27, %v1417_v33 }
  0x35   : > { %v1451_v35 = vadd.f32 %v1449_v30, %v1434_v31  ;;  %v1450_v36 = vadd.f32 %v1449_v30, %v1433_v34  ;;  %v1468_v37 = vsel %vm1467_vm4, 0.0, %v1466_v32 }
  0x37   : > { %v1470_v38 = vadd.f32 %v1466_v32, %v1451_v35  ;;  %v1469_v39 = vadd.f32 %v1468_v37, %v1450_v36 }
  0x39   : > { %1471 = vadd.xlane.f32.xlu0 %v1470_v38 }
  0x3d   : > { %1479 = vadd.xlane.f32.xlu0 %v1469_v39 }
  0xc2   : > { %v1472_v40 = vpop.xlane.xlu0 %1471 }
  0xc3   : > { %v1473_v41 = vrot.slane %v1472_v40, 4 }
  0xc5   : > { %v1474_v42 = vadd.f32 %v1473_v41, %v1472_v40 }
  0xc6   : > { %v1480_v43 = vpop.xlane.xlu0 %1479 }
  0xc7   : > { %v1475_v44 = vrot.slane %v1474_v42, 2  ;;  %v1481_v45 = vrot.slane %v1480_v43, 4 }
  0xc9   : > { %v1482_v46 = vadd.f32 %v1481_v45, %v1480_v43  ;;  %v1476_v47 = vadd.f32 %v1475_v44, %v1474_v42 }
  0xcb   : > { %v1483_v48 = vrot.slane %v1482_v46, 2  ;;  %v1477_v50 = vrot.slane %v1476_v47, 1 }
  0xcd   : > { %v1484_v49 = vadd.f32 %v1483_v48, %v1482_v46  ;;  %v1478_v53 = vadd.f32 %v1477_v50, %v1476_v47 }
  0xcf   : > { %v1485_v51 = vrot.slane %v1484_v49, 1 }
  0xd1   : > { %v1486_v52 = vadd.f32 %v1485_v51, %v1484_v49 }
  0xd3   : > { %1572 = vpush %v1486_v52 }
  0xd4   : > { %1574 = vpush %v1478_v53 }
 0x104   : > { %s1573_s14 = spop %1572 }
 0x105   : > { %s1575_s15 = spop %1574 }
 0x106   : > { %s1489_s16 = smul.f32 1e-10, %s1575_s15 }
 0x108   : > { %p1490_p8 = scmp.le.f32.partialorder %s1573_s14, %s1489_s16 }
 0x109   : > { %s1817_s17 = smov (!%p1490_p8), 0  }
 0x10a   : > { %1493 = sbr.rel (%p1490_p8) target bundleno = 948 (0x3b4), region = 475 }
 0x10f LB: >> { %s1822_s20 = smov 0   ;;  %s1665_s17 = sphi %s1817_s17, %s2062_s17  }
 0x110 LB: >>> { %s478_s30 = smov [#allocation18]  ;;  %v482_v6 = vmov %v1781_v6  ;;  %v485_v7 = vmov %v1783_v7  ;;  %s498_s21 = smov [#allocation19]  ;;  %vm801_vm14 = vcmp.eq.s32.totalorder %v1783_v7, 0  ;;  %vm813_vm15 = vcmp.eq.s32.totalorder %v1783_v7, 1  ;;  %s1669_s20 = sphi %s1822_s20, %s477_s20  }
 0x111   : >>> { %v502_v6 = vmov %v1781_v6  ;;  %v505_v7 = vmov %v1783_v7  ;;  %v486_v54 = vld [vmem:[%s478_s30] sm:$0x3]  ;;  %vm489_vm5 = vcmp.eq.s32.totalorder %v485_v7, %v482_v6  ;;  %s518_s22 = smov [#allocation21]  ;;  %s479_s29 = smov [#allocation22] }
 0x112   : >>> { %vm509_vm6 = vcmp.eq.s32.totalorder %v505_v7, %v502_v6  ;;  %v522_v6 = vmov %v1781_v6  ;;  %v525_v7 = vmov %v1783_v7  ;;  %v490_v55 = vsel %vm489_vm5, %v486_v54, 0.0  ;;  %v506_v56 = vld [vmem:[%s498_s21] sm:$0x3]  ;;  %s499_s14 = smov [#allocation23]  ;;  %s519_s15 = smov [#allocation24] }
 0x113   : >>> { %vm529_vm7 = vcmp.eq.s32.totalorder %v525_v7, %v522_v6  ;;  %v491_v57 = vrot.slane %v490_v55, 4  ;;  %v510_v58 = vsel %vm509_vm6, %v506_v56, 0.0  ;;  %v526_v59 = vld [vmem:[%s518_s22] sm:$0x3]  ;;  %s542_s16 = smov [#allocation23]  ;;  %s540_s30 = smov [#allocation22]  ;;  %v591_v6 = vmov %v1781_v6 }
 0x114   : >>> { %v511_v60 = vrot.slane %v510_v58, 4  ;;  %v530_v61 = vsel %vm529_vm7, %v526_v59, 0.0  ;;  %s544_s21 = smov [#allocation24]  ;;  %s579_s22 = smov [#allocation25]  ;;  %v594_v7 = vmov %v1783_v7  ;;  %v606_v6 = vmov %v1781_v6 }
 0x115   : >>> { %v492_v62 = vadd.f32 %v491_v57, %v490_v55  ;;  %v531_v63 = vrot.slane %v530_v61, 4  ;;  %v609_v7 = vmov %v1783_v7  ;;  %vm596_vm12 = vcmp.eq.s32.totalorder %v594_v7, %v591_v6  ;;  %s1841_s24 = smov [#allocation20]  ;;  %s1847_s23 = smov [#allocation12] }
 0x116   : >>> { %v512_v0 = vadd.f32 %v511_v60, %v510_v58  ;;  %vm611_vm13 = vcmp.eq.s32.totalorder %v609_v7, %v606_v6  ;;  %s841_s11 = smov [#allocation29]  ;;  %s1853_s27 = smov [#allocation16]  ;;  %v627_v55 = vld [vmem:[%s1841_s24] sm:$0x3]  ;;  %v704_v6 = vmov %v1781_v6  ;;  %v707_v7 = vmov %v1783_v7 }
 0x117   : >>> { %v493_v1 = vrot.slane %v492_v62, 2  ;;  %v532_v2 = vadd.f32 %v531_v63, %v530_v61  ;;  %v850_v58 = vld [vmem:[%s1847_s23] sm:$0x3]  ;;  %s619_s26 = smov [#allocation30]  ;;  %s843_s25 = smov [#allocation30]  ;;  %v718_v6 = vmov %v1781_v6  ;;  %v721_v7 = vmov %v1783_v7 }
 0x118   : >>> { %v513_v3 = vrot.slane %v512_v0, 2  ;;  %v852_v61 = vld [vmem:[%s1853_s27] sm:$0x3]  ;;  %vm711_vm0 = vcmp.eq.s32.totalorder %v707_v7, %v704_v6  ;;  %v677_v6 = vmov %v1781_v6  ;;  %v680_v7 = vmov %v1783_v7  ;;  %s477_s20 = sadd.s32 1, %s1669_s20  }
 0x119   : >>> { %v494_v4 = vadd.f32 %v493_v1, %v492_v62  ;;  %v533_v5 = vrot.slane %v532_v2, 2  ;;  %v691_v6 = vmov %v1781_v6  ;;  %v694_v7 = vmov %v1783_v7  ;;  %p474_p9 = scmp.ge.s32.totalorder %s477_s20, 3  }
 0x11a   : >>> { %v514_v8 = vadd.f32 %v513_v3, %v512_v0  ;;  %vm726_vm1 = vcmp.eq.s32.totalorder %v721_v7, %v718_v6  ;;  %vm685_vm3 = vcmp.eq.s32.totalorder %v680_v7, %v677_v6  ;;  %vm698_vm4 = vcmp.eq.s32.totalorder %v694_v7, %v691_v6 }
 0x11b   : >>> { %v495_v9 = vrot.slane %v494_v4, 1  ;;  %v534_v10 = vadd.f32 %v533_v5, %v532_v2  ;;  %vm740_vm5 = vcmp.eq.s32.totalorder %v1781_v6, 0  ;;  %vm744_vm6 = vcmp.eq.s32.totalorder %v1781_v6, 1 }
 0x11c   : >>> { %v515_v11 = vrot.slane %v514_v8, 1  ;;  %v378_v6 = vmov (%p474_p9), %v1781_v6  ;;  %v381_v7 = vmov (%p474_p9), %v1783_v7 }
 0x11d   : >>> { %v496_v12 = vadd.f32 %v495_v9, %v494_v4  ;;  %v535_v13 = vrot.slane %v534_v10, 1  ;;  %v431_v6 = vmov (%p474_p9), %v1781_v6  ;;  %vm393_vm7 = vcmp.eq.s32.totalorder (%p474_p9), %v381_v7, %v378_v6 }
 0x11e   : >>> { %v516_v14 = vadd.f32 %v515_v11, %v514_v8  ;;  %v434_v7 = vmov (%p474_p9), %v1783_v7  ;;  %v397_v6 = vmov (%p474_p9), %v1781_v6 }
 0x11f   : >>> { %497 = vst [vmem:[%s479_s29] sm:$0x1] %v496_v12  ;;  %v536_v15 = vadd.f32 %v535_v13, %v534_v10  ;;  %s581_s29 = smov [#allocation26]  ;;  %v400_v7 = vmov (%p474_p9), %v1783_v7  ;;  %v414_v6 = vmov (%p474_p9), %v1781_v6 }
 0x120   : >>> { %517 = vst [vmem:[%s499_s14] sm:$0x1] %v516_v14  ;;  %s538_s14 = smov [#allocation27]  ;;  %v417_v7 = vmov (%p474_p9), %v1783_v7 }
 0x121   : >>> { %537 = vst [vmem:[%s519_s15] sm:$0x1] %v536_v15  ;;  %s539_s15 = smov [#allocation28]  ;;  %s583_s14 = smov %s538_s14 }
 0x122   : >>> { %s585_s15 = smov %s539_s15 }
 0x126   : >>> { %v541_v18 = vld [vmem:[%s540_s30] sm:$0xff]  ;;  %s602_s30 = smov [#allocation28] }
 0x127   : >>> { %v543_v16 = vld [vmem:[%s542_s16] sm:$0xff]  ;;  %v564_v33 = vand.u32 2147483647, %v541_v18  ;;  %s587_s16 = smov [#allocation27] }
 0x128   : >>> { %v547_v17 = vmul.f32 2.0, %v543_v16  ;;  %v545_v19 = vld [vmem:[%s544_s21] sm:$0xff]  ;;  %v565_v36 = vand.u32 2147483647, %v543_v16  ;;  %s600_s21 = smov [#allocation29] }
 0x129   : >>> { %v546_v20 = vsub.f32 %v545_v19, %v541_v18  ;;  %v566_v34 = vand.u32 2147483647, %v545_v19 }
 0x12a   : >>> { %1623 = vrcp.f32 %v547_v17 }
 0x12b   : >>> { %v567_v35 = vmin.f32 %v564_v33, %v566_v34 }
 0x12d   : >>> { %v568_v37 = vmul.f32 1.1920929e-08, %v567_v35 }
 0x12f   : >>> { %vm569_vm11 = vcmp.le.f32.partialorder %v565_v36, %v568_v37 }
 0x137   : >>> { %v1624_v21 = vpop.eup %1623 }
 0x138   : >>> { %v549_v22 = vmul.f32 %v1624_v21, %v546_v20 }
 0x13a   : >>> { %v551_v23 = vmul.f32 %v549_v22, %v549_v22  ;;  %vm550_vm10 = vcmp.ge.f32.partialorder %v549_v22, 0.0 }
 0x13c   : >>> { %v552_v24 = vadd.f32 1.0, %v551_v23 }
 0x13e   : >>> { %1625 = vrsqrt.f32 %v552_v24  ;;  %vm555_vm8 = vcmp.eq.f32.partialorder %v552_v24, inf  ;;  %v558_v26 = vand.u32 2147483648, %v552_v24  ;;  %vm557_vm9 = vcmp.eq.f32.partialorder %v552_v24, 0.0 }
 0x14b   : >>> { %v1626_v25 = vpop.eup %1625 }
 0x14c   : >>> { %v554_v27 = vmul.f32 %v1626_v25, %v552_v24 }
 0x14e   : >>> { %v556_v28 = vsel %vm555_vm8, %v552_v24, %v554_v27  ;;  %vm446_vm8 = vcmp.eq.s32.totalorder (%p474_p9), %v434_v7, %v431_v6 }
 0x14f   : >>> { %v559_v29 = vsel %vm557_vm9, %v558_v26, %v556_v28 }
 0x150   : >>> { %v560_v30 = vxor.u32 2147483648, %v559_v29 }
 0x152   : >>> { %v561_v31 = vsel %vm550_vm10, %v559_v29, %v560_v30 }
 0x153   : >>> { %v562_v32 = vadd.f32 %v561_v31, %v549_v22 }
 0x155   : >>> { %1627 = vrcp.f32 %v562_v32 }
 0x162   : >>> { %v1628_v38 = vpop.eup %1627 }
 0x163   : >>> { %v570_v39 = vsel %vm569_vm11, 0.0, %v1628_v38 }
 0x164   : >>> { %v571_v40 = vmul.f32 %v570_v39, %v570_v39  ;;  %v575_v41 = vmul.f32 %v570_v39, %v543_v16 }
 0x166   : >>> { %v572_v42 = vadd.f32 1.0, %v571_v40  ;;  %v576_v43 = vsub.f32 %v541_v18, %v575_v41  ;;  %v578_v44 = vadd.f32 %v575_v41, %v545_v19 }
 0x168   : >>> { %1629 = vrsqrt.f32 %v572_v42  ;;  %580 = vst [vmem:[%s579_s22] sm:$0xff] %v576_v43  ;;  %582 = vst [vmem:[%s581_s29] sm:$0xff] %v578_v44  ;;  %s617_s22 = smov [#allocation29]  ;;  %s1837_s29 = smov [#allocation18] }
 0x169   : >>> { %v625_v53 = vld [vmem:[%s1837_s29] sm:$0x3] }
 0x175   : >>> { %v1630_v45 = vpop.eup %1629 }
 0x176   : >>> { %584 = vst [vmem:[%s583_s14] sm:$0xff] %v1630_v45  ;;  %v574_v46 = vmul.f32 %v1630_v45, %v570_v39  ;;  %s615_s14 = smov [#allocation30] }
 0x178   : >>> { %586 = vst [vmem:[%s585_s15] sm:$0xff] %v574_v46  ;;  %s1839_s15 = smov [#allocation19] }
 0x179   : >>> { %v626_v54 = vld [vmem:[%s1839_s15] sm:$0x3] }
 0x17d   : >>> { %v588_v47 = vld [vmem:[%s587_s16] ss:$0 sm:$0xff]  ;;  %s1843_s16 = smov [#allocation21] }
 0x17e   : >>> { %v597_v48 = vsel %vm596_vm12, %v588_v47, 0.0  ;;  %v628_v56 = vld [vmem:[%s1843_s16] sm:$0x3] }
 0x17f   : >>> { %598 = vadd.xlane.f32.xlu0 %v597_v48  ;;  %v603_v49 = vld [vmem:[%s602_s30] ss:$0 sm:$0xff]  ;;  %s1845_s30 = smov [#allocation10] }
 0x180   : >>> { %v612_v50 = vsel %vm611_vm13, %v603_v49, 0.0  ;;  %v849_v57 = vld [vmem:[%s1845_s30] sm:$0x3] }
 0x183   : >>> { %613 = vadd.xlane.f32.xlu0 %v612_v50 }
 0x208   : >>> { %v599_v51 = vpop.xlane.xlu0 %598 }
 0x209   : >>> { %601 = vst [vmem:[%s600_s21] sm:$0xff] %v599_v51  ;;  %s1849_s21 = smov [#allocation14] }
 0x20a   : >>> { %v851_v59 = vld [vmem:[%s1849_s21] sm:$0x3] }
 0x20c   : >>> { %v614_v52 = vpop.xlane.xlu0 %613 }
 0x20d   : >>> { %616 = vst [vmem:[%s615_s14] sm:$0xff] %v614_v52  ;;  %s1873_s14 = smov [#allocation21] }
 0x210   : >>> { %v618_v60 = vld [vmem:[%s617_s22] sm:$0xff]  ;;  %s1871_s22 = smov [#allocation20] }
 0x211   : >>> { %v842_v62 = vld [vmem:[%s841_s11] sm:$0xff]  ;;  %v629_v63 = vmul.f32 %v625_v53, %v618_v60  ;;  %v632_v0 = vmul.f32 %v626_v54, %v618_v60  ;;  %v636_v1 = vmul.f32 %v627_v55, %v618_v60  ;;  %v639_v2 = vmul.f32 %v628_v56, %v618_v60  ;;  %s1869_s11 = smov [#allocation10] }
 0x212   : >>> { %v853_v3 = vmul.f32 %v849_v57, %v842_v62  ;;  %v856_v4 = vmul.f32 %v850_v58, %v842_v62  ;;  %v860_v5 = vmul.f32 %v851_v59, %v842_v62  ;;  %v863_v8 = vmul.f32 %v852_v61, %v842_v62 }
 0x214   : >>> { %v620_v9 = vld [vmem:[%s619_s26] sm:$0xff]  ;;  %s647_s26 = smov [#allocation28] }
 0x215   : >>> { %v844_v10 = vld [vmem:[%s843_s25] sm:$0xff]  ;;  %v630_v11 = vmul.f32 %v627_v55, %v620_v9  ;;  %v633_v12 = vmul.f32 %v628_v56, %v620_v9  ;;  %v635_v13 = vmul.f32 %v625_v53, %v620_v9  ;;  %v638_v14 = vmul.f32 %v626_v54, %v620_v9  ;;  %s645_s25 = smov [#allocation27] }
 0x216   : >>> { %v854_v15 = vmul.f32 %v851_v59, %v844_v10  ;;  %v857_v16 = vmul.f32 %v852_v61, %v844_v10  ;;  %v859_v17 = vmul.f32 %v849_v57, %v844_v10  ;;  %v862_v18 = vmul.f32 %v850_v58, %v844_v10  ;;  %v646_v27 = vld [vmem:[%s645_s25] ss:$0 sm:$0xff]  ;;  %s674_s25 = smov [#allocation25] }
 0x217   : >>> { %v631_v19 = vsub.f32 %v629_v63, %v630_v11  ;;  %v634_v20 = vsub.f32 %v632_v0, %v633_v12  ;;  %v637_v21 = vadd.f32 %v636_v1, %v635_v13  ;;  %v640_v22 = vadd.f32 %v639_v2, %v638_v14  ;;  %v648_v28 = vld [vmem:[%s647_s26] ss:$0 sm:$0xff]  ;;  %s673_s26 = smov [#allocation18] }
 0x218   : >>> { %v855_v23 = vsub.f32 %v853_v3, %v854_v15  ;;  %v858_v24 = vsub.f32 %v856_v4, %v857_v16  ;;  %v861_v25 = vadd.f32 %v860_v5, %v859_v17  ;;  %v864_v26 = vadd.f32 %v863_v8, %v862_v18  ;;  %v681_v63 = vld [vmem:[%s674_s25] ss:$0 sm:$0xff]  ;;  %s917_s25 = sadd.s32 (%p474_p9), 1, %s1665_s17  }
 0x219   : >>> { %642 = vst [vmem:[%s1839_s15] sm:$0x3] %v634_v20  ;;  %644 = vst [vmem:[%s1843_s16] sm:$0x3] %v640_v22  ;;  %s1875_s15 = smov [#allocation18]  ;;  %s715_s16 = smov [#allocation26] }
 0x21a   : >>> { %641 = vst [vmem:[%s1837_s29] sm:$0x3] %v631_v19  ;;  %643 = vst [vmem:[%s1841_s24] sm:$0x3] %v637_v21  ;;  %s1877_s24 = smov [#allocation14]  ;;  %s1885_s29 = smov [#allocation19]  ;;  %v722_v59 = vld [vmem:[%s715_s16] ss:$0 sm:$0xff] }
 0x21b   : >>> { %865 = vst [vmem:[%s1845_s30] sm:$0x3] %v855_v23  ;;  %866 = vst [vmem:[%s1847_s23] sm:$0x3] %v858_v24  ;;  %s1879_s23 = smov [#allocation12]  ;;  %s701_s30 = smov [#allocation20] }
 0x21c   : >>> { %867 = vst [vmem:[%s1849_s21] sm:$0x3] %v861_v25  ;;  %868 = vst [vmem:[%s1853_s27] sm:$0x3] %v864_v26  ;;  %s1883_s27 = smov [#allocation16]  ;;  %s714_s21 = smov [#allocation21] }
 0x21d   : >>> { %s817_s16 = smov [#allocation19]  ;;  %p470_p10 = scmp.ge.s32.totalorder (%p474_p9), %s917_s25, 15 }
 0x21e   : >> { %s2062_s17 = smov (%p474_p9), %s917_s25 }
 0x220   : >>> { %v656_v30 = vld [vmem:[%s1873_s14] sm:$0x3] }
 0x221   : >>> { %v655_v29 = vld [vmem:[%s1871_s22] sm:$0x3]  ;;  %v664_v36 = vmul.f32 %v656_v30, %v648_v28  ;;  %v667_v42 = vmul.f32 %v656_v30, %v646_v27 }
 0x222   : >>> { %v653_v31 = vld [vmem:[%s1875_s15] sm:$0x3]  ;;  %v663_v35 = vmul.f32 %v655_v29, %v646_v27  ;;  %v666_v37 = vmul.f32 %v655_v29, %v648_v28 }
 0x223   : >>> { %v871_v32 = vld [vmem:[%s1869_s11] ss:$0 sm:$0xff]  ;;  %v1551_v34 = vld [vmem:[%s1869_s11 + $0x1] ss:$0 sm:$0xff]  ;;  %v657_v48 = vmul.f32 %v653_v31, %v646_v27  ;;  %v660_v49 = vmul.f32 %v653_v31, %v648_v28 }
 0x224   : >>> { %v1550_v33 = vld [vmem:[%s1869_s11 - $0x1] sm:$0x2]  ;;  %v1553_v40 = vld [vmem:[%s1877_s24 + $0x1] sm:$0x1]  ;;  %v665_v47 = vsub.f32 %v663_v35, %v664_v36  ;;  %v668_v53 = vadd.f32 %v667_v42, %v666_v37 }
 0x225   : >>> { %v878_v38 = vsel %vm801_vm14, %v871_v32, %v1550_v33  ;;  %v882_v39 = vld [vmem:[%s1877_s24] ss:$0 sm:$0xff]  ;;  %v890_v43 = vsel %vm813_vm15, %v1551_v34, %v1553_v40  ;;  %v1555_v45 = vld [vmem:[%s1879_s23 + $0x1] ss:$0 sm:$0xff] }
 0x226   : >>> { %v895_v41 = vld [vmem:[%s1879_s23] ss:$0 sm:$0xff]  ;;  %881 = vst [vmem:[%s1869_s11] sm:$0x3] %v878_v38  ;;  %892 = vst [vmem:[%s1877_s24] sm:$0x3] %v890_v43  ;;  %v1557_v51 = vld [vmem:[%s1883_s27 + $0x1] sm:$0x1] }
 0x227   : >>> { %v1554_v44 = vld [vmem:[%s1879_s23 - $0x1] sm:$0x2]  ;;  %1552 = vst [vmem:[%s1869_s11 + $0x1] sm:$0x1] %v882_v39  ;;  %v914_v54 = vsel %vm813_vm15, %v1555_v45, %v1557_v51  ;;  %671 = vst [vmem:[%s1871_s22] sm:$0x3] %v665_v47  ;;  %s688_s11 = smov [#allocation19] }
 0x228   : >>> { %v906_v46 = vld [vmem:[%s1883_s27] ss:$0 sm:$0xff]  ;;  %v902_v50 = vsel %vm801_vm14, %v895_v41, %v1554_v44  ;;  %672 = vst [vmem:[%s1873_s14] sm:$0x3] %v668_v53  ;;  %s1927_s22 = smov [#allocation20]  ;;  %s1672_s14 = smov 1  }
 0x229   : >>> { %v654_v52 = vld [vmem:[%s1885_s29] sm:$0x3]  ;;  %905 = vst [vmem:[%s1879_s23] sm:$0x3] %v902_v50  ;;  %916 = vst [vmem:[%s1883_s27] sm:$0x3] %v914_v54  ;;  %s730_s24 = smov [#allocation19]  ;;  %s1930_s27 = smov [#allocation21] }
 0x22a   : >>> { %v658_v55 = vmul.f32 %v654_v52, %v648_v28  ;;  %v661_v56 = vmul.f32 %v654_v52, %v646_v27  ;;  %1556 = vst [vmem:[%s1879_s23 + $0x1] sm:$0x1] %v906_v46  ;;  %s1673_s23 = smov 127  }
 0x22c   : >>> { %v659_v57 = vsub.f32 %v657_v48, %v658_v55  ;;  %v662_v58 = vadd.f32 %v661_v56, %v660_v49 }
 0x22e   : >>> { %669 = vst [vmem:[%s1875_s15] sm:$0x3] %v659_v57  ;;  %670 = vst [vmem:[%s1885_s29] sm:$0x3] %v662_v58  ;;  %v708_v60 = vld [vmem:[%s701_s30] sm:$0x3]  ;;  %s729_s15 = smov [#allocation18]  ;;  %s793_s29 = smov [#allocation18] }
 0x22f   : >>> { %v712_v61 = vsel %vm711_vm0, 0.0, %v708_v60  ;;  %v723_v62 = vld [vmem:[%s714_s21] sm:$0x3] }
 0x230   : >>> { %713 = vst [vmem:[%s701_s30] sm:$0x3] %v712_v61  ;;  %v727_v0 = vsel %vm726_vm1, %v722_v59, %v723_v62  ;;  %s794_s30 = smov [#allocation20] }
 0x231   : >>> { %728 = vst [vmem:[%s714_s21] sm:$0x3] %v727_v0  ;;  %s818_s21 = smov [#allocation21] }
 0x235   : >>> { %v682_v1 = vld [vmem:[%s673_s26] sm:$0x3] }
 0x236   : >>> { %v695_v2 = vld [vmem:[%s688_s11] sm:$0x3]  ;;  %v686_v3 = vsel %vm685_vm3, %v681_v63, %v682_v1 }
 0x237   : >>> { %v699_v4 = vsel %vm698_vm4, 0.0, %v695_v2  ;;  %687 = vst [vmem:[%s673_s26] sm:$0x3] %v686_v3  ;;  %v767_v5 = vld [vmem:[%s1927_s22] sm:$0x3]  ;;  %s382_s26 = smov (%p474_p9), [#allocation18] }
 0x238   : >>> { %700 = vst [vmem:[%s688_s11] sm:$0x3] %v699_v4  ;;  %768 = vrot.lane.b32.xlu0 %v767_v5, %s1672_s14  ;;  %v763_v11 = vld [vmem:[%s1930_s27] sm:$0x3]  ;;  %s401_s11 = smov (%p474_p9), [#allocation19] }
 0x239   : >>> { %v784_v12 = vld [vmem:[%s1930_s27] sm:$0x3] }
 0x23a   : >>> { %v766_v30 = vld [vmem:[%s1927_s22] sm:$0x3] }
 0x23e   : >>> { %v735_v8 = vld [vmem:[%s729_s15] sm:$0x3] }
 0x23f   : >>> { %736 = vrot.lane.b32.xlu1 %v735_v8, %s1672_s14  ;;  %v731_v9 = vld [vmem:[%s730_s24] sm:$0x3] }
 0x240   : >>> { %v752_v10 = vld [vmem:[%s730_s24] sm:$0x3] }
 0x241   : >>> { %v734_v18 = vld [vmem:[%s729_s15] sm:$0x3] }
 0x243   : >>> { %732 = vrot.lane.b32.xlu1 %v731_v9, %s1672_s14 }
 0x247   : >>> { %753 = vrot.lane.b32.xlu1 %v752_v10, %s1673_s23 }
 0x24b   : >>> { %764 = vrot.lane.b32.xlu1 %v763_v11, %s1672_s14  ;;  %s435_s14 = smov (%p474_p9), [#allocation21] }
 0x24f   : >>> { %785 = vrot.lane.b32.xlu1 %v784_v12, %s1673_s23 }
 0x2aa   : >>> { %v769_v20 = vpop.permute.xlu0 %768 }
 0x2ab   : >>> { %v773_v22 = vsel %vm740_vm5, %v767_v5, %v769_v20 }
 0x2b1   : >>> { %v737_v13 = vpop.permute.xlu1 %736 }
 0x2b2   : >>> { %v741_v14 = vsel %vm740_vm5, %v735_v8, %v737_v13 }
 0x2b5   : >>> { %v733_v15 = vpop.permute.xlu1 %732 }
 0x2b6   : >>> { %v745_v16 = vsel %vm744_vm6, %v733_v15, %v741_v14 }
 0x2b7   : >>> { %v751_v17 = vsel %vm1411_vm2, %v745_v16, 0.0 }
 0x2b8   : >>> { %759 = vst [vmem:[%s729_s15] sm:$0x3] %v751_v17 }
 0x2b9   : >>> { %v754_v19 = vpop.permute.xlu1 %753 }
 0x2ba   : >>> { %v758_v21 = vsel %vm744_vm6, %v734_v18, %v754_v19 }
 0x2bb   : >>> { %760 = vst [vmem:[%s730_s24] sm:$0x3] %v758_v21 }
 0x2bd   : >>> { %v765_v23 = vpop.permute.xlu1 %764 }
 0x2be   : >>> { %v777_v24 = vsel %vm744_vm6, %v765_v23, %v773_v22 }
 0x2bf   : >>> { %v795_v25 = vld [vmem:[%s793_s29] ss:$0 sm:$0xff]  ;;  %v1543_v27 = vld [vmem:[%s793_s29 + $0x1] ss:$0 sm:$0xff]  ;;  %v783_v29 = vsel %vm1411_vm2, %v777_v24, 0.0 }
 0x2c0   : >>> { %v1542_v26 = vld [vmem:[%s793_s29 - $0x1] sm:$0x2]  ;;  %791 = vst [vmem:[%s1927_s22] sm:$0x3] %v783_v29  ;;  %s418_s22 = smov (%p474_p9), [#allocation20] }
 0x2c1   : >>> { %v802_v28 = vsel %vm801_vm14, %v795_v25, %v1542_v26  ;;  %v786_v31 = vpop.permute.xlu1 %785 }
 0x2c2   : >>> { %805 = vst [vmem:[%s793_s29] sm:$0x3] %v802_v28  ;;  %v819_v32 = vld [vmem:[%s817_s16] ss:$0 sm:$0xff]  ;;  %v1547_v34 = vld [vmem:[%s817_s16 + $0x1] ss:$0 sm:$0xff]  ;;  %v790_v35 = vsel %vm744_vm6, %v766_v30, %v786_v31 }
 0x2c3   : >>> { %v1546_v33 = vld [vmem:[%s817_s16 - $0x1] sm:$0x2]  ;;  %792 = vst [vmem:[%s1930_s27] sm:$0x3] %v790_v35 }
 0x2c4   : >>> { %v826_v36 = vsel %vm801_vm14, %v819_v32, %v1546_v33 }
 0x2c5   : >>> { %829 = vst [vmem:[%s817_s16] sm:$0x3] %v826_v36 }
 0x2c7   : >>> { %v806_v37 = vld [vmem:[%s794_s30] ss:$0 sm:$0xff]  ;;  %v1545_v38 = vld [vmem:[%s794_s30 + $0x1] sm:$0x1] }
 0x2c8   : >>> { %1544 = vst [vmem:[%s793_s29 + $0x1] sm:$0x1] %v806_v37  ;;  %v814_v39 = vsel %vm813_vm15, %v1543_v27, %v1545_v38 }
 0x2c9   : >>> { %816 = vst [vmem:[%s794_s30] sm:$0x3] %v814_v39 }
 0x2ca   : >>> { %v830_v40 = vld [vmem:[%s818_s21] ss:$0 sm:$0xff]  ;;  %v1549_v41 = vld [vmem:[%s818_s21 + $0x1] sm:$0x1] }
 0x2cb   : >>> { %1548 = vst [vmem:[%s817_s16 + $0x1] sm:$0x1] %v830_v40  ;;  %v838_v42 = vsel %vm813_vm15, %v1547_v34, %v1549_v41 }
 0x2cc   : >>> { %840 = vst [vmem:[%s818_s21] sm:$0x3] %v838_v42  ;;  %476 = sbr.rel (!%p474_p9) target bundleno = 272 (0x110), region = 470 }
 0x2cf   : >> { %v388_v43 = vld [vmem:[%s382_s26] sm:$0x3] (%p474_p9) }
 0x2d0   : >> { %v389_v45 = vsel (%p474_p9), %vm1411_vm2, %v388_v43, 0.0  ;;  %v424_v47 = vld [vmem:[%s418_s22] sm:$0x3] (%p474_p9) }
 0x2d1   : >> { %v390_v49 = vmul.f32 %v389_v45, %v389_v45  ;;  %v425_v51 = vsel %vm1411_vm2, %v424_v47, 0.0 }
 0x2d2   : >> { %v407_v44 = vld [vmem:[%s401_s11] sm:$0x3]  ;;  %v426_v53 = vmul.f32 %v425_v51, %v425_v51 }
 0x2d3   : >> { %v408_v46 = vsel %vm1411_vm2, %v407_v44, 0.0  ;;  %v441_v48 = vld [vmem:[%s435_s14] sm:$0x3]  ;;  %v394_v56 = vsel %vm393_vm7, 0.0, %v390_v49 }
 0x2d4   : >> { %v409_v50 = vmul.f32 %v408_v46, %v408_v46  ;;  %v442_v52 = vsel %vm1411_vm2, %v441_v48, 0.0 }
 0x2d5   : >> { %v443_v55 = vmul.f32 %v442_v52, %v442_v52 }
 0x2d6   : >> { %v411_v54 = vadd.f32 %v409_v50, %v390_v49  ;;  %v410_v57 = vadd.f32 %v409_v50, %v394_v56 }
 0x2d7   : >> { %v447_v60 = vsel %vm446_vm8, 0.0, %v443_v55 }
 0x2d8   : >> { %v428_v58 = vadd.f32 %v426_v53, %v411_v54  ;;  %v427_v59 = vadd.f32 %v426_v53, %v410_v57 }
 0x2da   : >> { %v449_v61 = vadd.f32 %v443_v55, %v428_v58  ;;  %v448_v62 = vadd.f32 %v447_v60, %v427_v59 }
 0x2dc   : >> { %450 = vadd.xlane.f32.xlu0 %v449_v61 }
 0x2e0   : >> { %458 = vadd.xlane.f32.xlu0 %v448_v62 }
 0x365   : >> { %v451_v63 = vpop.xlane.xlu0 %450 }
 0x366   : >> { %v452_v0 = vrot.slane %v451_v63, 4 }
 0x368   : >> { %v453_v1 = vadd.f32 %v452_v0, %v451_v63 }
 0x369   : >> { %v459_v2 = vpop.xlane.xlu0 %458 }
 0x36a   : >> { %v454_v3 = vrot.slane %v453_v1, 2  ;;  %v460_v4 = vrot.slane %v459_v2, 4 }
 0x36c   : >> { %v461_v5 = vadd.f32 %v460_v4, %v459_v2  ;;  %v455_v8 = vadd.f32 %v454_v3, %v453_v1 }
 0x36e   : >> { %v462_v9 = vrot.slane %v461_v5, 2  ;;  %v456_v11 = vrot.slane %v455_v8, 1 }
 0x370   : >> { %v463_v10 = vadd.f32 %v462_v9, %v461_v5  ;;  %v457_v14 = vadd.f32 %v456_v11, %v455_v8 }
 0x372   : >> { %v464_v12 = vrot.slane %v463_v10, 1 }
 0x374   : >> { %v465_v13 = vadd.f32 %v464_v12, %v463_v10 }
 0x376   : >> { %1576 = vpush %v465_v13 }
 0x377   : >> { %1578 = vpush %v457_v14 }
 0x3a7   : >> { %s1577_s20 = spop %1576 }
 0x3a8   : >> { %s1579_s15 = spop %1578 }
 0x3a9   : >> { %s468_s24 = smul.f32 1e-10, %s1579_s15 }
 0x3ab   : >> { %p469_p11 = scmp.le.f32.partialorder %s1577_s20, %s468_s24 }
 0x3ad   : >> { %p471_p12 = por %p470_p10, %p469_p11 }
 0x3af   : > { %919 = sbr.rel (!%p471_p12) target bundleno = 271 (0x10f), region = 481 }
 0x3b4 PF: > { %s924_s23 = smov [#allocation18]  ;;  %v928_v6 = vmov %v1781_v6  ;;  %v931_v7 = vmov %v1783_v7  ;;  %v968_v15 = vld [vmem:[#allocation10] sm:$0x3]  ;;  %v976_v16 = vld [vmem:[#allocation12] sm:$0x3]  ;;  %s2063_s17 = scalar_lea.vmem [#allocation11], %s1777_s28 }
 0x3b5   : > { %v948_v6 = vmov %v1781_v6  ;;  %v951_v7 = vmov %v1783_v7  ;;  %v932_v17 = vld [vmem:[%s924_s23] sm:$0x3]  ;;  %vm935_vm9 = vcmp.eq.s32.totalorder %v931_v7, %v928_v6  ;;  %971 = vst [vmem:[%s2063_s17] sm:$0x3] %v968_v15  ;;  %s2064_s27 = scalar_lea.vmem [#allocation13], %s1777_s28  ;;  %v984_v18 = vld [vmem:[#allocation14] sm:$0x3] }
 0x3b6   : > { %vm955_vm10 = vcmp.eq.s32.totalorder %v951_v7, %v948_v6  ;;  %979 = vst [vmem:[%s2064_s27] sm:$0x3] %v976_v16  ;;  %v992_v19 = vld [vmem:[#allocation16] sm:$0x3]  ;;  %v936_v20 = vsel %vm935_vm9, %v932_v17, 0.0  ;;  %s944_s29 = smov [#allocation21]  ;;  %s2065_s16 = scalar_lea.vmem [#allocation15], %s1777_s28 }
 0x3b7   : > { %987 = vst [vmem:[%s2065_s16] sm:$0x3] %v984_v18  ;;  %s2066_s30 = scalar_lea.vmem [#allocation17], %s1777_s28  ;;  %v937_v21 = vrot.slane %v936_v20, 4  ;;  %v952_v22 = vld [vmem:[%s944_s29] sm:$0x3]  ;;  %s920_s21 = sand.u32 7, %s1740_s12  }
 0x3b8   : > { %995 = vst [vmem:[%s2066_s30] sm:$0x3] %v992_v19  ;;  %v956_v23 = vsel %vm955_vm10, %v952_v22, 0.0  ;;  %s2067_s25 = scalar_lea.vmem [#allocation8], %s1779_s18  ;;  %s2068_s11 = scalar_lea.vmem [#allocation9], %s1779_s18 }
 0x3b9   : > { %v938_v24 = vadd.f32 %v937_v21, %v936_v20  ;;  %v957_v25 = vrot.slane %v956_v23, 4  ;;  %s921_s26 = scalar_lea.vmem %s2067_s25, %s920_s21 [#allocation8]  ;;  %s923_s22 = scalar_lea.vmem %s2068_s11, %s920_s21 [#allocation9] }
 0x3ba   : > { %s925_s26 = smov %s921_s26  ;;  %s945_s22 = smov %s923_s22 }
 0x3bb   : > { %v939_v6 = vrot.slane %v938_v24, 2  ;;  %v958_v7 = vadd.f32 %v957_v25, %v956_v23  ;;  %s1023_s14 = sshrl.u32 (%p1754_p3), %s1740_s12, 3  ;;  %s2069_s20 = scalar_lea.vmem (%p1754_p3), [#allocation8], %s1779_s18 }
 0x3bc   : > { %s1564_s15 = sshll.u32 (%p1754_p3), %s1023_s14, 3 }
 0x3bd   : > { %v940_v26 = vadd.f32 %v939_v6, %v938_v24  ;;  %v959_v27 = vrot.slane %v958_v7, 2  ;;  %s1025_s17 = scalar_lea.vmem (%p1754_p3), %s2054_s4, %s1564_s15 }
 0x3bf   : > { %v941_v28 = vrot.slane %v940_v26, 1  ;;  %v960_v29 = vadd.f32 %v959_v27, %v958_v7 }
 0x3c1   : > { %v942_v30 = vadd.f32 %v941_v28, %v940_v26  ;;  %v961_v31 = vrot.slane %v960_v29, 1  ;;  %1022 = sbr.rel (!%p1754_p3) target bundleno = 972 (0x3cc), region = 158 }
 0x3c3   : > { %943 = vst [vmem:[%s925_s26] sm:$0x1] %v942_v30  ;;  %v962_v32 = vadd.f32 %v961_v31, %v960_v29 }
 0x3c5   : > { %963 = vst [vmem:[%s945_s22] sm:$0x1] %v962_v32 }
 0x3ca   : > { %v1054_v33 = vld [vmem:[%s2069_s20] sm:$0xff] }
 0x3cb   : > { %1055 = vst [vmem:[%s1025_s17] sm:$0xff] %v1054_v33 }
 0x3cc PF: > { %1061 = sbr.rel (!%p1754_p3) target bundleno = 980 (0x3d4), region = 196  ;;  %s1062_s27 = sshrl.u32 (%p1754_p3), %s1740_s12, 3 }
 0x3cd   : > { %s2070_s29 = scalar_lea.vmem (%p1754_p3), [#allocation9], %s1779_s18  ;;  %s1565_s16 = sshll.u32 (%p1754_p3), %s1062_s27, 3 }
 0x3ce   : > { %s1064_s25 = scalar_lea.vmem (%p1754_p3), %s2055_s5, %s1565_s16 }
 0x3d2   : > { %v1093_v34 = vld [vmem:[%s2070_s29] sm:$0xff] }
 0x3d3   : > { %1094 = vst [vmem:[%s1064_s25] sm:$0xff] %v1093_v34 }
 0x3d4 PF: > { %s1566_s26 = sshll.u32 %s1740_s12, 1  ;;  %s2071_s19 = scalar_lea.vmem [#allocation11], %s1777_s28 }
 0x3d5   : > { %v1116_v35 = vld [vmem:[%s2071_s19] sm:$0x3]  ;;  %s2072_s11 = scalar_lea.vmem [#allocation13], %s1777_s28  ;;  %s1099_s14 = scalar_lea.vmem %s2056_s6, %s1566_s26 }
 0x3d6   : > { %v1151_v36 = vld [vmem:[%s2072_s11] sm:$0x3]  ;;  %s1134_s24 = scalar_lea.vmem %s2057_s7, %s1566_s26  ;;  %s2073_s23 = scalar_lea.vmem [#allocation15], %s1777_s28  ;;  %1117 = vst [vmem:[%s1099_s14] sm:$0x3] %v1116_v35 }
 0x3d7   : > { %v1186_v37 = vld [vmem:[%s2073_s23] sm:$0x3]  ;;  %s2074_s17 = scalar_lea.vmem [#allocation17], %s1777_s28  ;;  %1152 = vst [vmem:[%s1134_s24] sm:$0x3] %v1151_v36  ;;  %s1169_s29 = scalar_lea.vmem %s2058_s8, %s1566_s26 }
 0x3d8   : > { %v1221_v38 = vld [vmem:[%s2074_s17] sm:$0x3]  ;;  %s1204_s21 = scalar_lea.vmem %s2059_s9, %s1566_s26  ;;  %1187 = vst [vmem:[%s1169_s29] sm:$0x3] %v1186_v37 }
 0x3d9   : > { %1222 = vst [vmem:[%s1204_s21] sm:$0x3] %v1221_v38 }
 0x3da PF: > { %s2075_s25 = sld [smem:[#allocation31_spill]]  ;;  %p13_p13 = scmp.ge.s32.totalorder %s1743_s13, 10  }
 0x3db   : > { %s2076_s30 = smov %s1657_s10  ;;  %s2078_s11 = smov %s1743_s13 }
 0x3dc   :  { %15 = sbr.rel (!%p13_p13) target bundleno = 2 (0x2), region = 492 }
 0x3e0   : > { %s2077_s10 = smov %s2075_s25 }

// kernel: shape_model_forward.5
= control target key start
LH: loop header
LB: loop body
LE: loop exit
PB: predicated region body
PF: predicated region fallthrough
CT: control target
= control target key end

     0   :  { %s388_s9 = smov 0   ;;  %s412_s0 = inlined_call_operand.vmem [shape: f32[8,3,256], index: 0, kind: input, shape index: {}]   ;;  %s413_s1 = inlined_call_operand.vmem [shape: f32[8,3,256], index: 1, kind: output, shape index: {0}]   ;;  %s414_s2 = inlined_call_operand.vmem [shape: f32[8,3,3], index: 2, kind: output, shape index: {1}]  }
   0x1 LB: > { %s340_s10 = sadd.s32 4294967295, %s370_s9   ;;  %p344_p0 = scmp.ge.s32.totalorder %s370_s9, 1  ;;  %s370_s9 = sphi %s388_s9, %s13_s9  }
   0x2   : > { %p115_p1 = scmp.lt.s32.totalorder %s370_s9, 9 }
   0x4   : > { %p116_p2 = pnand %p344_p0, %p115_p1 }
   0x5   : > { %p141_p3 = scmp.lt.s32.totalorder (!%p116_p2), %s340_s10, 7 }
   0x6   : > { %119 = sbr.rel (%p116_p2) target bundleno = 366 (0x16e), region = 24 }
   0xb   : > { %s416_s10 = smov (!%p141_p3, %s340_s10), 7  ;;  %vm159_vm0 = vcmask 1042432   ;;  %v372_v5 = vmov 839922192   ;;  %v171_v7 = vlaneseq  ;;  %vm252_vm1 = vcmask 18432  }
   0xc   : > { %s352_s11 = sshll.u32 %s416_s10, 3  ;;  %v169_v6 = vunpack.c.l.s4 %v372_v5  ;;  %s349_s18 = sshll.u32 %s416_s10, 2 }
   0xd   : > { %s145_s14 = scalar_lea.vmem %s412_s0, %s352_s11  ;;  %v172_v9 = vshrl.u32 %v171_v7, 7  ;;  %s150_s17 = scalar_lea.vmem %s413_s1, %s352_s11 }
   0xe   : > { %v155_v0 = vld [vmem:[%s145_s14] sm:$0x77]  ;;  %v170_v8 = vunpack.c.0.s8 %v169_v6  ;;  %s154_s21 = scalar_lea.vmem %s414_s2, %s349_s18 }
   0xf   : > { %v157_v1 = vcombine.high %v155_v0, %v155_v0  ;;  %v160_v2 = vsel %vm159_vm0, %v155_v0, 0.0 }
  0x10   : > { %v173_v10 = vsub.s32 %v170_v8, %v172_v9 }
  0x11   : > { %v161_v3 = vsel %vm159_vm0, %v157_v1, 0.0 }
  0x12   : > { %v162_v4 = vadd.f32 %v161_v3, %v160_v2 }
  0x14   : > { %163 = vadd.xlane.f32.xlu0 %v162_v4 }
  0x9d   : > { %v164_v11 = vpop.xlane.xlu0 %163 }
  0x9e   : > { %v166_v12 = vmul.f32 0.00390625, %v164_v11 }
  0xa0   : > { %v174_v13 = vrot.slane %v166_v12, %v173_v10 }
  0xa2   : > { %v176_v14 = vsub.f32 %v155_v0, %v174_v13 }
  0xa4   : > { %177 = vst [vmem:[%s150_s17] sm:$0x77] %v176_v14  ;;  %v179_v15 = vcombine.high %v176_v14, %v176_v14 }
  0xa6   : > { %211 = vmatprep.subr.mxu0 %v179_v15  ;;  %245 = vmatprep.mubr.f32.mxu0 %v179_v15 }
  0xa7   : > { %212 = vmatpush1.xpose.msra.mxu0 %v176_v14 }
  0xaa   : > { %246 = vmatmul.mubr.f32.vlgmr.msra.gmra.mxu0 %v176_v14 }
 0x16a   : > { %v247_v16 = vpop.f32.mrf.mxu0 }
 0x16b   : > { %v251_v17 = vmul.f32 0.00390625, %v247_v16 }
 0x16c   : > { %v249_v18 = vpop.f32.mrf.mxu0 }
 0x16d   : > { %253 = vst.msk [vmem:[%s154_s21] sm:$0x7] %vm252_vm1, %v251_v17 }
 0x16e PF: > { %s13_s9 = sadd.s32 1, %s370_s9  }
 0x16f   : > { %p10_p4 = scmp.ge.s32.totalorder %s13_s9, 10  }
 0x171   :  { %12 = sbr.rel (!%p10_p4) target bundleno = 1 (0x1), region = 66 }

// kernel: shape_model_forward.6
= control target key start
LH: loop header
LB: loop body
LE: loop exit
PB: predicated region body
PF: predicated region fallthrough
CT: control target
= control target key end

     0   :  { %s743_s21 = smov 0   ;;  %s804_s0 = inlined_call_operand.vmem [shape: f32[8,3,256], index: 0, kind: input, shape index: {}]   ;;  %s805_s1 = inlined_call_operand.vmem [shape: f32[8,3,3], index: 1, kind: input, shape index: {}]   ;;  %s806_s2 = inlined_call_operand.vmem [shape: f32[8,3,3], index: 2, kind: input, shape index: {}]   ;;  %s807_s3 = inlined_call_operand.vmem [shape: f32[8,3,1], index: 3, kind: input, shape index: {}]   ;;  %s808_s4 = inlined_call_operand.vmem [shape: f32[8,4,256], index: 4, kind: output, shape index: {0}]   ;;  %s809_s5 = inlined_call_operand.vmem [shape: f32[8,3,256], index: 5, kind: output, shape index: {1}]   ;;  %s810_s6 = inlined_call_operand.vmem [shape: f32[3,256], index: 6, kind: output, shape index: {2}]  }
   0x1 LB: > { %s749_s22 = sadd.s32 4294967295, %s703_s21   ;;  %p661_p0 = scmp.ge.s32.totalorder %s703_s21, 1  ;;  %s703_s21 = sphi %s743_s21, %s17_s21  }
   0x2   : > { %p239_p1 = scmp.lt.s32.totalorder %s703_s21, 9 }
   0x4   : > { %p240_p2 = pnand %p661_p0, %p239_p1 }
   0x5   : > { %p286_p3 = scmp.lt.s32.totalorder (!%p240_p2), %s749_s22, 7  ;;  %p671_p4 = scmp.ne.s32.totalorder (!%p240_p2), %s749_s22, 0 }
   0x6   : > { %243 = sbr.rel (%p240_p2) target bundleno = 244 (0xf4), region = 36 }
   0xb   : > { %s287_s23 = scalar_select %p286_p3, %s749_s22, 7 }
   0xc   : > { %316 = sbr.rel (%p671_p4) target bundleno = 19 (0x13), region = 40 }
   0xd   : > { %s755_s24 = sshll.u32 %s287_s23, 3  ;;  %s664_s25 = sshll.u32 %s287_s23, 2 }
   0xe   : > { %s290_s28 = scalar_lea.vmem %s804_s0, %s755_s24  ;;  %s294_s7 = scalar_lea.vmem %s805_s1, %s664_s25 }
   0xf   : > { %s298_s10 = scalar_lea.vmem %s806_s2, %s664_s25  ;;  %s302_s13 = scalar_lea.vmem %s807_s3, %s664_s25 }
  0x10   : > { %s307_s16 = scalar_lea.vmem %s808_s4, %s755_s24  ;;  %s312_s19 = scalar_lea.vmem %s809_s5, %s755_s24 }
  0x11   : > { %v705_v0 = vmov 0.0  }
  0x12   : > { %317 = vst [vmem:[#allocation2] sm:$0x77] %v705_v0 }
  0x13 PF: > { %v318_v1 = vld [vmem:[%s290_s28] sm:$0x77]  ;;  %vm332_vm0 = vcmask 1042432   ;;  %v706_v3 = vmov 0.0   ;;  %vm328_vm1 = vcmask 23552   ;;  %v707_v6 = vmov 0  }
  0x14   : > { %v327_v2 = vcombine.high %v318_v1, %v318_v1  ;;  %401 = vmatprep.mubr.f32.mxu0 %v706_v3  ;;  %476 = vmatprep.mubr.f32.mxu1 %v706_v3  ;;  %v320_v4 = vld [vmem:[%s294_s7] sm:$0x7]  ;;  %p678_p5 = scmp.ne.s32.totalorder %s749_s22, 7 }
  0x15   : > { %v408_v5 = vld [vmem:[%s298_s10] sm:$0x7]  ;;  %695 = vset.pattern.permute.xlu0 %v707_v6 }
  0x16   : > { %672 = vmatprep.subr.msk.mxu0 %vm332_vm0, %v327_v2  ;;  %675 = vmatprep.subr.msk.mxu1 %vm332_vm0, %v327_v2  ;;  %v319_v7 = vld [vmem:[%s302_s13] sm:$0x7] }
  0x17   : > { %673 = vmatpush1.msk.msra.mxu0 %vm332_vm0, %v318_v1  ;;  %676 = vmatpush1.msk.msra.mxu1 %vm332_vm0, %v318_v1 }
  0x18   : > { %674 = vmatmul.mubr.msk.f32.vlgmr.msra.gmra.mxu0 %vm328_vm1, %v320_v4  ;;  %677 = vmatmul.mubr.msk.f32.vlgmr.msra.gmra.mxu1 %vm328_vm1, %v408_v5 }
  0x19   : > { %323 = vperm.xlu0 %695, %v319_v7   ;;  %v513_v18 = vld [vmem:[#allocation2] sm:$0x77] }
  0x94   : > { %v324_v8 = vpop.permute.xlu0 %323 }
  0xd8   : > { %v403_v9 = vpop.f32.mrf.mxu0  ;;  %v478_v10 = vpop.f32.mrf.mxu1 }
  0xd9   : > { %v404_v11 = vadd.f32 %v403_v9, %v324_v8  ;;  %v479_v12 = vadd.f32 %v478_v10, %v324_v8 }
  0xda   : > { %v405_v13 = vpop.f32.mrf.mxu0  ;;  %v480_v14 = vpop.f32.mrf.mxu1 }
  0xdb   : > { %v490_v15 = vmul.f32 %v404_v11, %v404_v11  ;;  %v406_v16 = vadd.f32 %v405_v13, %v324_v8  ;;  %v481_v17 = vadd.f32 %v480_v14, %v324_v8  ;;  %v488_v36 = vmul.f32 -2.0, %v404_v11 }
  0xdd   : > { %v492_v19 = vsel %vm332_vm0, %v490_v15, 0.0  ;;  %v491_v20 = vmul.f32 %v406_v16, %v406_v16  ;;  %v516_v21 = vcombine.low %v404_v11, %v406_v16  ;;  %v485_v23 = vcombine.low %v479_v12, %v481_v17 }
  0xde   : > { %v493_v22 = vrot.slane %v492_v19, 4  ;;  %v489_v37 = vmul.f32 -2.0, %v406_v16 }
  0xdf   : > { %v499_v24 = vsel %vm332_vm0, %v491_v20, 0.0  ;;  %v518_v25 = vadd.f32 %v516_v21, %v513_v18  ;;  %487 = vst [vmem:[%s312_s19] sm:$0x77] %v485_v23 }
  0xe0   : > { %v494_v26 = vadd.f32 %v493_v22, %v492_v19  ;;  %v500_v27 = vrot.slane %v499_v24, 4 }
  0xe1   : > { %519 = vst [vmem:[#allocation2] sm:$0x77] %v518_v25 }
  0xe2   : > { %v495_v28 = vrot.slane %v494_v26, 2  ;;  %v501_v29 = vadd.f32 %v500_v27, %v499_v24 }
  0xe4   : > { %v496_v30 = vadd.f32 %v495_v28, %v494_v26  ;;  %v502_v31 = vrot.slane %v501_v29, 2 }
  0xe6   : > { %v497_v32 = vrot.slane %v496_v30, 1  ;;  %v503_v33 = vadd.f32 %v502_v31, %v501_v29 }
  0xe8   : > { %v498_v34 = vadd.f32 %v497_v32, %v496_v30  ;;  %v504_v35 = vrot.slane %v503_v33, 1 }
  0xea   : > { %v505_v38 = vadd.f32 %v504_v35, %v503_v33  ;;  %v506_v39 = vsel %vm332_vm0, %v488_v36, %v498_v34 }
  0xeb   : > { %523 = sbr.rel (%p678_p5) target bundleno = 244 (0xf4), region = 44 }
  0xec   : > { %v507_v40 = vsel %vm332_vm0, %v489_v37, %v505_v38 }
  0xed   : > { %v510_v41 = vcombine.low %v506_v39, %v507_v40 }
  0xef   : > { %512 = vst [vmem:[%s307_s16] sm:$0xff] %v510_v41 }
  0xf0   : > { %v524_v42 = vld [vmem:[#allocation2] sm:$0x77] }
  0xf1   : > { %v525_v43 = vmul.f32 0.125, %v524_v42 }
  0xf3   : > { %526 = vst [vmem:[%s810_s6] sm:$0x77] %v525_v43 }
  0xf4 PF: > { %s17_s21 = sadd.s32 1, %s703_s21  }
  0xf5   : > { %p14_p6 = scmp.ge.s32.totalorder %s17_s21, 10  }
  0xf7   :  { %16 = sbr.rel (!%p14_p6) target bundleno = 1 (0x1), region = 103 }

// kernel: shape_model_forward.7
= control target key start
LH: loop header
LB: loop body
LE: loop exit
PB: predicated region body
PF: predicated region fallthrough
CT: control target
= control target key end

     0   :  { %s922_s9 = smov 0   ;;  %s924_s10 = smov 0   ;;  %s1356_s0 = inlined_call_operand.vmem [shape: f32[8,4,256], index: 0, kind: input, shape index: {}]   ;;  %s1357_s1 = inlined_call_operand.vmem [shape: f32[4,256], index: 1, kind: input, shape index: {}]   ;;  %s1358_s2 = inlined_call_operand.vmem [shape: s32[8,1,256], index: 2, kind: output, shape index: {}]  }
   0x1   :  { %s926_s11 = smov 0   ;;  %s928_s12 = smov 0  }
   0x2   :  { %s930_s13 = smov 0  }
   0x3 LB: > { %s21_s14 = sadd.s32 1, %s893_s11  ;;  %s24_s15 = sadd.s32 1, %s897_s12  ;;  %s901_s13 = sphi %s930_s13, %s12_s13   ;;  %s897_s12 = sphi %s928_s12, %s1364_s12   ;;  %s893_s11 = sphi %s926_s11, %s1363_s11   ;;  %s889_s10 = sphi %s924_s10, %s1362_s10   ;;  %s885_s9 = sphi %s922_s9, %s1361_s9  }
   0x4   : > { %p22_p0 = scmp.ge.s32.totalorder %s21_s14, 2  ;;  %p789_p1 = scmp.ge.s32.totalorder %s901_s13, 1 }
   0x5   : > { %p129_p2 = scmp.lt.s32.totalorder %s901_s13, 17 }
   0x6   : > { %s1366_s14 = smov (%p22_p0, %s21_s14), 0  ;;  %s1368_s15 = smov (!%p22_p0, %s24_s15), %s897_s12 }
   0x7   : > { %p130_p3 = pnand %p789_p1, %p129_p2  ;;  %p26_p4 = scmp.ge.s32.totalorder %s1368_s15, 8 }
   0x8   : > { %p153_p5 = scmp.lt.s32.totalorder (!%p130_p3), %s889_s10, 7  ;;  %p155_p6 = scmp.lt.s32.totalorder (!%p130_p3), %s885_s9, 1 }
   0x9   : > { %s1370_s15 = smov (%p26_p4, %s1368_s15), 0  ;;  %133 = sbr.rel (%p130_p3) target bundleno = 488 (0x1e8), region = 28 }
   0xa   : > { %p793_p7 = scmp.ne.s32.totalorder (!%p130_p3), %s885_s9, 0 }
   0xe   : > { %s1372_s10 = smov (!%p153_p5, %s889_s10), 7 }
   0xf   : > { %s156_s16 = scalar_select %p155_p6, %s885_s9, 1 }
  0x10   : > { %s790_s17 = sshll.u32 %s1372_s10, 1  ;;  %168 = sbr.rel (%p793_p7) target bundleno = 25 (0x19), region = 32 }
  0x11   : > { %s158_s18 = sadd.s32 %s790_s17, %s156_s16  ;;  %s959_s21 = scalar_lea.vmem %s1358_s2, %s790_s17 }
  0x12   : > { %s791_s22 = sshll.u32 %s158_s18, 2 }
  0x13   : > { %s160_s25 = scalar_lea.vmem %s1356_s0, %s791_s22 }
  0x15   : > { %v169_v0 = vlaneseq  ;;  %v903_v1 = vmov inf   ;;  %v904_v2 = vmov 0  }
  0x17   : > { %vm171_vm0 = vcmp.lt.s32.totalorder %v169_v0, 256 }
  0x18   : > { %173 = vst.msk [vmem:[#allocation2] sm:$0x3] %vm171_vm0, %v903_v1  ;;  %174 = vst.msk [vmem:[#allocation3] sm:$0x3] %vm171_vm0, %v904_v2 }
  0x19 PF: > { %v175_v3 = vld [vmem:[%s160_s25] sm:$0xf]  ;;  %vm260_vm1 = vcmask 1043456   ;;  %v905_v6 = vmov 0.0   ;;  %vm211_vm2 = vcmask 31744   ;;  %s812_s28 = sshll.u32 %s885_s9, 7 }
  0x1a   : > { %v176_v4 = vld [vmem:[%s1357_s1] sm:$0xff]  ;;  %177 = vxpose.xlu0.b32.start.end [1/1] (short) %v175_v3, 128  ;;  %329 = vmatprep.mubr.f32.mxu0 %v905_v6  ;;  %p813_p8 = scmp.ne.s32.totalorder %s885_s9, 1 }
  0x1b   : > { %v210_v5 = vcombine.high %v176_v4, %v176_v4  ;;  %377 = vmatprep.mubr.f32.mxu1 %v905_v6 }
  0x1d   : > { %794 = vmatprep.subr.msk.mxu0 %vm260_vm1, %v210_v5  ;;  %816 = vmatprep.subr.msk.mxu1 %vm260_vm1, %v210_v5 }
  0x1e   : > { %795 = vmatpush1.msk.msra.mxu0 %vm260_vm1, %v176_v4  ;;  %817 = vmatpush1.msk.msra.mxu1 %vm260_vm1, %v176_v4 }
  0x96   : > { %v193_v7 = vpop.trf.xlu0 }
  0x97   : > { %796 = vmatmul.mubr.msk.f32.vlgmr.msra.gmra.mxu0 %vm211_vm2, %v193_v7 }
  0x98   : > { %335 = vmatprep.mubr.f32.mxu0 %v905_v6 }
  0x9a   : > { %v194_v8 = vpop.trf.xlu0 }
  0x9b   : > { %797 = vmatmul.mubr.msk.f32.gmra.mxu0 %vm211_vm2, %v194_v8 }
  0x9c   : > { %341 = vmatprep.mubr.f32.mxu0 %v905_v6 }
  0x9e   : > { %v195_v9 = vpop.trf.xlu0 }
  0x9f   : > { %798 = vmatmul.mubr.msk.f32.gmra.mxu0 %vm211_vm2, %v195_v9 }
  0xa0   : > { %347 = vmatprep.mubr.f32.mxu0 %v905_v6 }
  0xa2   : > { %v196_v10 = vpop.trf.xlu0 }
  0xa3   : > { %799 = vmatmul.mubr.msk.f32.gmra.mxu0 %vm211_vm2, %v196_v10 }
  0xa4   : > { %353 = vmatprep.mubr.f32.mxu0 %v905_v6 }
  0xa6   : > { %v197_v11 = vpop.trf.xlu0 }
  0xa7   : > { %800 = vmatmul.mubr.msk.f32.gmra.mxu0 %vm211_vm2, %v197_v11 }
  0xa8   : > { %359 = vmatprep.mubr.f32.mxu0 %v905_v6 }
  0xaa   : > { %v198_v12 = vpop.trf.xlu0 }
  0xab   : > { %801 = vmatmul.mubr.msk.f32.gmra.mxu0 %vm211_vm2, %v198_v12 }
  0xac   : > { %365 = vmatprep.mubr.f32.mxu0 %v905_v6 }
  0xae   : > { %v199_v13 = vpop.trf.xlu0 }
  0xaf   : > { %802 = vmatmul.mubr.msk.f32.gmra.mxu0 %vm211_vm2, %v199_v13 }
  0xb0   : > { %371 = vmatprep.mubr.f32.mxu0 %v905_v6 }
  0xb2   : > { %v200_v14 = vpop.trf.xlu0 }
  0xb3   : > { %803 = vmatmul.mubr.msk.f32.gmra.mxu0 %vm211_vm2, %v200_v14 }
  0xb6   : > { %v201_v15 = vpop.trf.xlu0 }
  0xb7   : > { %804 = vmatmul.mubr.msk.f32.vlgmr.msra.gmra.mxu1 %vm211_vm2, %v201_v15 }
  0xb8   : > { %383 = vmatprep.mubr.f32.mxu1 %v905_v6 }
  0xba   : > { %v202_v16 = vpop.trf.xlu0 }
  0xbb   : > { %805 = vmatmul.mubr.msk.f32.gmra.mxu1 %vm211_vm2, %v202_v16 }
  0xbc   : > { %389 = vmatprep.mubr.f32.mxu1 %v905_v6 }
  0xbe   : > { %v203_v17 = vpop.trf.xlu0 }
  0xbf   : > { %806 = vmatmul.mubr.msk.f32.gmra.mxu1 %vm211_vm2, %v203_v17 }
  0xc0   : > { %395 = vmatprep.mubr.f32.mxu1 %v905_v6 }
  0xc2   : > { %v204_v18 = vpop.trf.xlu0 }
  0xc3   : > { %807 = vmatmul.mubr.msk.f32.gmra.mxu1 %vm211_vm2, %v204_v18 }
  0xc4   : > { %401 = vmatprep.mubr.f32.mxu1 %v905_v6 }
  0xc6   : > { %v205_v19 = vpop.trf.xlu0 }
  0xc7   : > { %808 = vmatmul.mubr.msk.f32.gmra.mxu1 %vm211_vm2, %v205_v19 }
  0xc8   : > { %407 = vmatprep.mubr.f32.mxu1 %v905_v6 }
  0xca   : > { %v206_v20 = vpop.trf.xlu0 }
  0xcb   : > { %809 = vmatmul.mubr.msk.f32.gmra.mxu1 %vm211_vm2, %v206_v20 }
  0xcc   : > { %413 = vmatprep.mubr.f32.mxu1 %v905_v6 }
  0xce   : > { %v207_v21 = vpop.trf.xlu0 }
  0xcf   : > { %810 = vmatmul.mubr.msk.f32.gmra.mxu1 %vm211_vm2, %v207_v21 }
  0xd0   : > { %419 = vmatprep.mubr.f32.mxu1 %v905_v6 }
  0xd2   : > { %v208_v22 = vpop.trf.xlu0 }
  0xd3   : > { %811 = vmatmul.mubr.msk.f32.gmra.mxu1 %vm211_vm2, %v208_v22 }
 0x157   : > { %v984_v23 = vpop.f32.mrf.mxu0 }
 0x159   : > { %v986_v24 = vpop.f32.mrf.mxu0 }
 0x15b   : > { %v988_v25 = vpop.f32.mrf.mxu0 }
 0x15d   : > { %v990_v26 = vpop.f32.mrf.mxu0 }
 0x15f   : > { %v992_v27 = vpop.f32.mrf.mxu0 }
 0x160   : > { %v426_v47 = vmin.f32 %v984_v23, %v992_v27 }
 0x161   : > { %v994_v28 = vpop.f32.mrf.mxu0 }
 0x162   : > { %v447_v50 = vmin.f32 %v986_v24, %v994_v28 }
 0x163   : > { %v996_v29 = vpop.f32.mrf.mxu0 }
 0x164   : > { %v427_v48 = vmin.f32 %v988_v25, %v996_v29 }
 0x165   : > { %v998_v30 = vpop.f32.mrf.mxu0 }
 0x166   : > { %v448_v51 = vmin.f32 %v990_v26, %v998_v30 }
 0x167   : > { %v1000_v31 = vpop.f32.mrf.mxu0 }
 0x168   : > { %v428_v52 = vmin.f32 %v426_v47, %v1000_v31 }
 0x169   : > { %v1002_v32 = vpop.f32.mrf.mxu0 }
 0x16a   : > { %v449_v56 = vmin.f32 %v447_v50, %v1002_v32  ;;  %v468_v50 = vlaneseq }
 0x16b   : > { %v1004_v33 = vpop.f32.mrf.mxu0 }
 0x16c   : > { %v429_v53 = vmin.f32 %v427_v48, %v1004_v33 }
 0x16d   : > { %v1010_v36 = vpop.f32.mrf.mxu0 }
 0x16e   : > { %v450_v57 = vmin.f32 %v448_v51, %v1010_v36 }
 0x16f   : > { %v1016_v39 = vpop.f32.mrf.mxu0 }
 0x170   : > { %v430_v58 = vmin.f32 %v428_v52, %v1016_v39 }
 0x171   : > { %v1022_v42 = vpop.f32.mrf.mxu0 }
 0x172   : > { %v451_v61 = vmin.f32 %v449_v56, %v1022_v42  ;;  %v1081_v56 = vshrl.u32 %v468_v50, 7 }
 0x173   : > { %v1028_v45 = vpop.f32.mrf.mxu0 }
 0x174   : > { %v431_v59 = vmin.f32 %v429_v53, %v1028_v45 }
 0x175   : > { %v1044_v54 = vpop.f32.mrf.mxu0 }
 0x176   : > { %v452_v62 = vmin.f32 %v450_v57, %v1044_v54 }
 0x177   : > { %v1006_v34 = vpop.f32.mrf.mxu1 }
 0x178   : > { %v432_v63 = vmin.f32 %v430_v58, %v1006_v34  ;;  %v906_v58 = vmov 1966171168  }
 0x179   : > { %v1008_v35 = vpop.f32.mrf.mxu1 }
 0x17a   : > { %v453_v2 = vmin.f32 %v451_v61, %v1008_v35 }
 0x17b   : > { %v1012_v37 = vpop.f32.mrf.mxu1 }
 0x17c   : > { %v433_v0 = vmin.f32 %v431_v59, %v1012_v37  ;;  %v658_v59 = vunpack.c.l.s4 %v906_v58 }
 0x17d   : > { %v1014_v38 = vpop.f32.mrf.mxu1 }
 0x17e   : > { %v454_v3 = vmin.f32 %v452_v62, %v1014_v38  ;;  %v1086_v62 = vadd.s32 8, %v1081_v56 }
 0x17f   : > { %v1018_v40 = vpop.f32.mrf.mxu1 }
 0x180   : > { %v434_v4 = vmin.f32 %v432_v63, %v1018_v40  ;;  %v1089_v63 = vadd.s32 16, %v1081_v56 }
 0x181   : > { %v1020_v41 = vpop.f32.mrf.mxu1 }
 0x182   : > { %v455_v7 = vmin.f32 %v453_v2, %v1020_v41  ;;  %v1095_v2 = vadd.s32 32, %v1081_v56 }
 0x183   : > { %v1024_v43 = vpop.f32.mrf.mxu1 }
 0x184   : > { %v435_v5 = vmin.f32 %v433_v0, %v1024_v43  ;;  %v1092_v0 = vadd.s32 24, %v1081_v56 }
 0x185   : > { %v1026_v44 = vpop.f32.mrf.mxu1 }
 0x186   : > { %v456_v8 = vmin.f32 %v454_v3, %v1026_v44  ;;  %v1098_v3 = vadd.s32 40, %v1081_v56 }
 0x187   : > { %v1030_v46 = vpop.f32.mrf.mxu1 }
 0x188   : > { %v436_v9 = vmin.f32 %v434_v4, %v1030_v46  ;;  %v1101_v4 = vadd.s32 48, %v1081_v56 }
 0x189   : > { %v1036_v49 = vpop.f32.mrf.mxu1 }
 0x18a   : > { %v457_v12 = vmin.f32 %v455_v7, %v1036_v49 }
 0x18b   : > { %v1046_v55 = vpop.f32.mrf.mxu1 }
 0x18c   : > { %v437_v10 = vmin.f32 %v435_v5, %v1046_v55  ;;  %v1104_v5 = vadd.s32 56, %v1081_v56 }
 0x18d   : > { %v1052_v60 = vpop.f32.mrf.mxu1 }
 0x18e   : > { %v458_v13 = vmin.f32 %v456_v8, %v1052_v60  ;;  %v1107_v8 = vsub.s32 0, %v1081_v56 }
 0x18f   : > { %v1058_v1 = vpop.f32.mrf.mxu1 }
 0x190   : > { %v438_v14 = vmin.f32 %v436_v9, %v1058_v1  ;;  %v1110_v9 = vsub.s32 1, %v1081_v56 }
 0x191   : > { %v1064_v6 = vpop.f32.mrf.mxu1 }
 0x192   : > { %v459_v17 = vmin.f32 %v457_v12, %v1064_v6  ;;  %v1113_v12 = vadd.s32 64, %v1081_v56 }
 0x193   : > { %v1070_v11 = vpop.f32.mrf.mxu1 }
 0x194   : > { %v439_v15 = vmin.f32 %v437_v10, %v1070_v11  ;;  %v659_v10 = vunpack.c.0.s8 %v658_v59 }
 0x195   : > { %v1076_v16 = vpop.f32.mrf.mxu1 }
 0x196   : > { %v440_v18 = vmin.f32 %v438_v14, %v439_v15  ;;  %v460_v19 = vmin.f32 %v458_v13, %v1076_v16  ;;  %v1116_v13 = vadd.s32 72, %v1081_v56  ;;  %v1119_v14 = vadd.s32 80, %v1081_v56 }
 0x197   : > { %v1122_v15 = vadd.s32 88, %v1081_v56 }
 0x198   : > { %v441_v20 = vrot.slane %v440_v18, 4  ;;  %v461_v21 = vmin.f32 %v459_v17, %v460_v19  ;;  %v1124_v17 = vld [vmem:[#allocation2] sm:$0x3]  ;;  %v1138_v19 = vadd.s32 104, %v1081_v56 }
 0x19a   : > { %v442_v22 = vmin.f32 %v440_v18, %v441_v20  ;;  %v462_v47 = vrot.slane %v461_v21, 4  ;;  %v1135_v18 = vadd.s32 96, %v1081_v56  ;;  %v1141_v20 = vadd.s32 112, %v1081_v56 }
 0x19c   : > { %v443_v48 = vrot.slane %v442_v22, 2  ;;  %v463_v51 = vmin.f32 %v461_v21, %v462_v47 }
 0x19e   : > { %v444_v52 = vmin.f32 %v442_v22, %v443_v48  ;;  %v464_v57 = vrot.slane %v463_v51, 2 }
 0x1a0   : > { %v445_v53 = vrot.slane %v444_v52, 1  ;;  %v465_v7 = vmin.f32 %v463_v51, %v464_v57 }
 0x1a2   : > { %v1083_v61 = vmin.f32 %v444_v52, %v445_v53  ;;  %v466_v21 = vrot.slane %v465_v7, 1 }
 0x1a4   : > { %vm485_vm3 = vcmp.le.f32.partialorder %v984_v23, %v1083_v61  ;;  %vm487_vm4 = vcmp.le.f32.partialorder %v988_v25, %v1083_v61  ;;  %vm489_vm5 = vcmp.le.f32.partialorder %v992_v27, %v1083_v61  ;;  %vm491_vm6 = vcmp.le.f32.partialorder %v996_v29, %v1083_v61 }
 0x1a5   : > { %v1144_v23 = vadd.s32 120, %v1081_v56  ;;  %v1147_v25 = vsub.s32 %v659_v10, %v1081_v56  ;;  %v681_v27 = vrot.slane %v1124_v17, %v1107_v8  ;;  %v685_v29 = vrot.slane %v1124_v17, %v1110_v9 }
 0x1a6   : > { %v517_v22 = vsel %vm485_vm3, %v1081_v56, 128  ;;  %v519_v47 = vsel %vm487_vm4, %v1086_v62, 128  ;;  %v521_v48 = vsel %vm489_vm5, %v1089_v63, 128  ;;  %v523_v51 = vsel %vm491_vm6, %v1092_v0, 128 }
 0x1a7   : > { %vm493_vm7 = vcmp.le.f32.partialorder %v1000_v31, %v1083_v61  ;;  %vm495_vm8 = vcmp.le.f32.partialorder %v1004_v33, %v1083_v61  ;;  %vm497_vm9 = vcmp.le.f32.partialorder %v1016_v39, %v1083_v61  ;;  %vm499_vm10 = vcmp.le.f32.partialorder %v1028_v45, %v1083_v61 }
 0x1a8   : > { %vm501_vm11 = vcmp.le.f32.partialorder %v1006_v34, %v1083_v61  ;;  %vm503_vm12 = vcmp.le.f32.partialorder %v1012_v37, %v1083_v61  ;;  %vm505_vm13 = vcmp.le.f32.partialorder %v1018_v40, %v1083_v61  ;;  %vm507_vm14 = vcmp.le.f32.partialorder %v1024_v43, %v1083_v61 }
 0x1a9   : > { %vm509_vm15 = vcmp.le.f32.partialorder %v1030_v46, %v1083_v61  ;;  %vm511_vm0 = vcmp.le.f32.partialorder %v1046_v55, %v1083_v61  ;;  %vm549_vm1 = vcmp.lt.s32.totalorder %v517_v22, %v521_v48  ;;  %vm551_vm2 = vcmp.lt.s32.totalorder %v519_v47, %v523_v51 }
 0x1aa   : > { %v525_v31 = vsel %vm493_vm7, %v1095_v2, 128  ;;  %v527_v33 = vsel %vm495_vm8, %v1098_v3, 128  ;;  %v550_v52 = vsel %vm549_vm1, %v517_v22, %v521_v48  ;;  %v552_v53 = vsel %vm551_vm2, %v519_v47, %v523_v51 }
 0x1ab   : > { %vm513_vm3 = vcmp.le.f32.partialorder %v1058_v1, %v1083_v61  ;;  %vm515_vm4 = vcmp.le.f32.partialorder %v1070_v11, %v1083_v61  ;;  %vm553_vm5 = vcmp.lt.s32.totalorder %v550_v52, %v525_v31  ;;  %vm555_vm6 = vcmp.lt.s32.totalorder %v552_v53, %v527_v33 }
 0x1ac   : > { %v529_v57 = vsel %vm497_vm9, %v1101_v4, 128  ;;  %v531_v58 = vsel %vm499_vm10, %v1104_v5, 128  ;;  %v554_v59 = vsel %vm553_vm5, %v550_v52, %v525_v31  ;;  %v556_v10 = vsel %vm555_vm6, %v552_v53, %v527_v33 }
 0x1ad   : > { %v533_v22 = vsel %vm501_vm11, %v1113_v12, 128  ;;  %v535_v47 = vsel %vm503_vm12, %v1116_v13, 128  ;;  %vm557_vm7 = vcmp.lt.s32.totalorder %v554_v59, %v529_v57  ;;  %vm559_vm8 = vcmp.lt.s32.totalorder %v556_v10, %v531_v58 }
 0x1ae   : > { %v537_v39 = vsel %vm505_vm13, %v1119_v14, 128  ;;  %v558_v45 = vsel %vm557_vm7, %v554_v59, %v529_v57  ;;  %v560_v48 = vsel %vm559_vm8, %v556_v10, %v531_v58  ;;  %v1203_v51 = vmin.f32 %v465_v7, %v466_v21 }
 0x1af   : > { %v539_v34 = vsel %vm507_vm14, %v1122_v15, 128  ;;  %v541_v37 = vsel %vm509_vm15, %v1135_v18, 128  ;;  %vm561_vm9 = vcmp.lt.s32.totalorder %v558_v45, %v533_v22  ;;  %vm563_vm10 = vcmp.lt.s32.totalorder %v560_v48, %v535_v47 }
 0x1b0   : > { %v543_v40 = vsel %vm511_vm0, %v1138_v19, 128  ;;  %v545_v7 = vsel %vm513_vm3, %v1141_v20, 128  ;;  %v562_v21 = vsel %vm561_vm9, %v558_v45, %v533_v22  ;;  %v564_v43 = vsel %vm563_vm10, %v560_v48, %v535_v47 }
 0x1b1   : > { %v547_v46 = vsel %vm515_vm4, %v1144_v23, 128  ;;  %vm565_vm11 = vcmp.lt.s32.totalorder %v562_v21, %v537_v39  ;;  %vm567_vm12 = vcmp.lt.s32.totalorder %v564_v43, %v539_v34  ;;  %v688_v31 = vmin.f32 %v1083_v61, %v681_v27 }
 0x1b2   : > { %v566_v33 = vsel %vm565_vm11, %v562_v21, %v537_v39  ;;  %v568_v52 = vsel %vm567_vm12, %v564_v43, %v539_v34  ;;  %vm486_vm13 = vcmp.le.f32.partialorder %v986_v24, %v1203_v51  ;;  %vm488_vm14 = vcmp.le.f32.partialorder %v990_v26, %v1203_v51 }
 0x1b3   : > { %vm569_vm15 = vcmp.lt.s32.totalorder %v566_v33, %v541_v37  ;;  %vm571_vm0 = vcmp.lt.s32.totalorder %v568_v52, %v543_v40  ;;  %vm490_vm1 = vcmp.le.f32.partialorder %v994_v28, %v1203_v51  ;;  %vm492_vm2 = vcmp.le.f32.partialorder %v998_v30, %v1203_v51 }
 0x1b4   : > { %v570_v55 = vsel %vm569_vm15, %v566_v33, %v541_v37  ;;  %v572_v1 = vsel %vm571_vm0, %v568_v52, %v543_v40  ;;  %vm494_vm3 = vcmp.le.f32.partialorder %v1002_v32, %v1203_v51  ;;  %vm496_vm4 = vcmp.le.f32.partialorder %v1010_v36, %v1203_v51 }
 0x1b5   : > { %vm573_vm5 = vcmp.lt.s32.totalorder %v570_v55, %v545_v7  ;;  %vm575_vm6 = vcmp.lt.s32.totalorder %v572_v1, %v547_v46  ;;  %vm498_vm7 = vcmp.le.f32.partialorder %v1022_v42, %v1203_v51  ;;  %vm500_vm8 = vcmp.le.f32.partialorder %v1044_v54, %v1203_v51 }
 0x1b6   : > { %v574_v28 = vsel %vm573_vm5, %v570_v55, %v545_v7  ;;  %v576_v11 = vsel %vm575_vm6, %v572_v1, %v547_v46  ;;  %v518_v27 = vsel %vm486_vm13, %v1081_v56, 128  ;;  %v522_v53 = vsel %vm490_vm1, %v1089_v63, 128 }
 0x1b7   : > { %vm577_vm9 = vcmp.lt.s32.totalorder %v574_v28, %v576_v11  ;;  %vm502_vm10 = vcmp.le.f32.partialorder %v1008_v35, %v1203_v51  ;;  %v520_v57 = vsel %vm488_vm14, %v1086_v62, 128  ;;  %v524_v58 = vsel %vm492_vm2, %v1092_v0, 128 }
 0x1b8   : > { %vm1258_vm11 = vcmp.lt.s32.totalorder %v468_v50, 256  ;;  %v578_v56 = vsel %vm577_vm9, %v574_v28, %v576_v11  ;;  %vm504_vm12 = vcmp.le.f32.partialorder %v1014_v38, %v1203_v51  ;;  %vm506_vm13 = vcmp.le.f32.partialorder %v1020_v41, %v1203_v51 }
 0x1b9   : > { %vm508_vm14 = vcmp.le.f32.partialorder %v1026_v44, %v1203_v51  ;;  %v579_v26 = vrot.slane %v578_v56, 4  ;;  %vm510_vm15 = vcmp.le.f32.partialorder %v1036_v49, %v1203_v51  ;;  %vm512_vm0 = vcmp.le.f32.partialorder %v1052_v60, %v1203_v51 }
 0x1ba   : > { %vm588_vm1 = vcmp.lt.s32.totalorder %v518_v27, %v522_v53  ;;  %v526_v30 = vsel %vm494_vm3, %v1095_v2, 128  ;;  %vm590_vm2 = vcmp.lt.s32.totalorder %v520_v57, %v524_v58  ;;  %v689_v62 = vmin.f32 %v1203_v51, %v685_v29 }
 0x1bb   : > { %v589_v50 = vsel %vm588_vm1, %v518_v27, %v522_v53  ;;  %vm580_vm5 = vcmp.lt.s32.totalorder %v578_v56, %v579_v26  ;;  %v528_v63 = vsel %vm496_vm4, %v1098_v3, 128  ;;  %v591_v0 = vsel %vm590_vm2, %v520_v57, %v524_v58 }
 0x1bc   : > { %vm592_vm6 = vcmp.lt.s32.totalorder %v589_v50, %v526_v30  ;;  %v530_v32 = vsel %vm498_vm7, %v1101_v4, 128  ;;  %vm594_vm3 = vcmp.lt.s32.totalorder %v591_v0, %v528_v63  ;;  %v692_v59 = vcombine.low %v688_v31, %v689_v62 }
 0x1bd   : > { %v593_v2 = vsel %vm592_vm6, %v589_v50, %v526_v30  ;;  %v581_v10 = vsel %vm580_vm5, %v578_v56, %v579_v26  ;;  %v532_v17 = vsel %vm500_vm8, %v1104_v5, 128  ;;  %v595_v29 = vsel %vm594_vm3, %v591_v0, %v528_v63 }
 0x1be   : > { %vm596_vm9 = vcmp.lt.s32.totalorder %v593_v2, %v530_v32  ;;  %v534_v36 = vsel %vm502_vm10, %v1113_v12, 128  ;;  %vm598_vm4 = vcmp.lt.s32.totalorder %v595_v29, %v532_v17  ;;  %v699_v42 = vrot.slane %v692_v59, %v1147_v25 }
 0x1bf   : > { %v597_v3 = vsel %vm596_vm9, %v593_v2, %v530_v32  ;;  %v536_v4 = vsel %vm504_vm12, %v1116_v13, 128  ;;  %v538_v54 = vsel %vm506_vm13, %v1119_v14, 128  ;;  %v599_v5 = vsel %vm598_vm4, %v595_v29, %v532_v17  ;;  %v631_v13 = vld [vmem:[#allocation2] sm:$0x3] }
 0x1c0   : > { %vm600_vm7 = vcmp.lt.s32.totalorder %v597_v3, %v534_v36  ;;  %v582_v22 = vrot.slane %v581_v10, 2  ;;  %vm602_vm8 = vcmp.lt.s32.totalorder %v599_v5, %v536_v4  ;;  %v706_v35 = vrot.slane %v699_v42, %v1147_v25 }
 0x1c1   : > { %v601_v47 = vsel %vm600_vm7, %v597_v3, %v534_v36  ;;  %vm514_vm10 = vcmp.le.f32.partialorder %v1064_v6, %v1203_v51  ;;  %v540_v38 = vsel %vm508_vm14, %v1122_v15, 128  ;;  %v603_v12 = vsel %vm602_vm8, %v599_v5, %v536_v4 }
 0x1c2   : > { %vm604_vm12 = vcmp.lt.s32.totalorder %v601_v47, %v538_v54  ;;  %vm516_vm13 = vcmp.le.f32.partialorder %v1076_v16, %v1203_v51  ;;  %v542_v41 = vsel %vm510_vm15, %v1135_v18, 128  ;;  %vm606_vm1 = vcmp.lt.s32.totalorder %v603_v12, %v540_v38  ;;  %708 = vst.msk [vmem:[#allocation2] sm:$0x3] %vm1258_vm11, %v706_v35 }
 0x1c3   : > { %v605_v14 = vsel %vm604_vm12, %v601_v47, %v538_v54  ;;  %v544_v44 = vsel %vm512_vm0, %v1138_v19, 128  ;;  %v607_v6 = vsel %vm606_vm1, %v603_v12, %v540_v38  ;;  %vm583_vm2 = vcmp.lt.s32.totalorder %v581_v10, %v582_v22 }
 0x1c4   : > { %vm608_vm14 = vcmp.lt.s32.totalorder %v605_v14, %v542_v41  ;;  %v546_v16 = vsel %vm514_vm10, %v1141_v20, 128  ;;  %vm610_vm5 = vcmp.lt.s32.totalorder %v607_v6, %v544_v44  ;;  %v548_v49 = vsel %vm516_vm13, %v1144_v23, 128  ;;  %v645_v23 = vld [vmem:[#allocation3] sm:$0x3] }
 0x1c5   : > { %v609_v15 = vsel %vm608_vm14, %v605_v14, %v542_v41  ;;  %v611_v18 = vsel %vm610_vm5, %v607_v6, %v544_v44  ;;  %v584_v45 = vsel %vm583_vm2, %v581_v10, %v582_v22  ;;  %v628_v21 = vstv %s812_s28 }
 0x1c6   : > { %vm612_vm15 = vcmp.lt.s32.totalorder %v609_v15, %v546_v16  ;;  %vm614_vm6 = vcmp.lt.s32.totalorder %v611_v18, %v548_v49  ;;  %v585_v60 = vrot.slane %v584_v45, 1  ;;  %v636_v46 = vrot.slane %v631_v13, %v1107_v8 }
 0x1c7   : > { %v613_v39 = vsel %vm612_vm15, %v609_v15, %v546_v16  ;;  %v615_v48 = vsel %vm614_vm6, %v611_v18, %v548_v49  ;;  %v640_v31 = vrot.slane %v631_v13, %v1110_v9  ;;  %v649_v52 = vrot.slane %v645_v23, %v1107_v8 }
 0x1c8   : > { %vm616_vm3 = vcmp.lt.s32.totalorder %v613_v39, %v615_v48  ;;  %vm586_vm9 = vcmp.lt.s32.totalorder %v584_v45, %v585_v60  ;;  %v653_v55 = vrot.slane %v645_v23, %v1110_v9  ;;  %vm643_vm8 = vcmp.lt.f32.partialorder %v1083_v61, %v636_v46 }
 0x1c9   : > { %v617_v34 = vsel %vm616_vm3, %v613_v39, %v615_v48  ;;  %v587_v20 = vsel %vm586_vm9, %v584_v45, %v585_v60  ;;  %vm644_vm10 = vcmp.lt.f32.partialorder %v1203_v51, %v640_v31 }
 0x1ca   : > { %v618_v19 = vrot.slane %v617_v34, 4  ;;  %v629_v33 = vadd.s32 %v628_v21, %v587_v20 }
 0x1cc   : > { %vm619_vm0 = vcmp.lt.s32.totalorder %v617_v34, %v618_v19  ;;  %v654_v11 = vsel %vm643_vm8, %v629_v33, %v649_v52 }
 0x1cd   : > { %v620_v37 = vsel %vm619_vm0, %v617_v34, %v618_v19 }
 0x1ce   : > { %v621_v40 = vrot.slane %v620_v37, 2 }
 0x1d0   : > { %vm622_vm4 = vcmp.lt.s32.totalorder %v620_v37, %v621_v40 }
 0x1d1   : > { %v623_v7 = vsel %vm622_vm4, %v620_v37, %v621_v40 }
 0x1d2   : > { %v624_v43 = vrot.slane %v623_v7, 1 }
 0x1d4   : > { %vm625_vm7 = vcmp.lt.s32.totalorder %v623_v7, %v624_v43 }
 0x1d5   : > { %v626_v1 = vsel %vm625_vm7, %v623_v7, %v624_v43 }
 0x1d6   : > { %v630_v28 = vadd.s32 %v628_v21, %v626_v1 }
 0x1d8   : > { %v655_v27 = vsel %vm644_vm10, %v630_v28, %v653_v55 }
 0x1d9   : > { %v656_v53 = vcombine.low %v654_v11, %v655_v27 }
 0x1db   : > { %v663_v57 = vrot.slane %v656_v53, %v1147_v25  ;;  %712 = sbr.rel (%p813_p8) target bundleno = 488 (0x1e8), region = 36 }
 0x1dd   : > { %v670_v58 = vrot.slane %v663_v57, %v1147_v25 }
 0x1df   : > { %675 = vst.msk [vmem:[#allocation3] sm:$0x3] %vm1258_vm11, %v670_v58 }
 0x1e6   : > { %v713_v8 = vld [vmem:[#allocation3] sm:$0x3] }
 0x1e7   : > { %714 = vst.msk [vmem:[%s959_s21] sm:$0x3] %vm1258_vm11, %v713_v8 }
 0x1e8 PF: > { %s12_s13 = sadd.s32 1, %s901_s13   ;;  %s1361_s9 = smov %s893_s11 }
 0x1e9   : > { %p9_p9 = scmp.ge.s32.totalorder %s12_s13, 18   ;;  %s1362_s10 = smov %s897_s12 }
 0x1ea   : > { %s1363_s11 = smov %s1366_s14  ;;  %s1364_s12 = smov %s1370_s15 }
 0x1eb   :  { %11 = sbr.rel (!%p9_p9) target bundleno = 3 (0x3), region = 66 }

// kernel: custom-call.5
= control target key start
LH: loop header
LB: loop body
LE: loop exit
PB: predicated region body
PF: predicated region fallthrough
CT: control target
= control target key end

     0   :  { %v300_v3 = vlaneseq  ;;  %v1769_v5 = vmov 0.0   ;;  %s289_s17 = smov [#allocation22]  ;;  %s292_s18 = smov [#allocation23]  ;;  %s2052_s0 = inlined_call_operand.vmem [shape: f32[4,4], index: 0, kind: input, shape index: {}]   ;;  %s2053_s1 = inlined_call_operand.vmem [shape: f32[4,4], index: 1, kind: input, shape index: {}]   ;;  %s2054_s2 = inlined_call_operand.vmem [shape: f32[4,4], index: 2, kind: input, shape index: {}]   ;;  %s2055_s3 = inlined_call_operand.vmem [shape: f32[4,4], index: 3, kind: input, shape index: {}]   ;;  %s2056_s4 = inlined_call_operand.vmem [shape: f32[4], index: 4, kind: output, shape index: {0}]   ;;  %s2057_s5 = inlined_call_operand.vmem [shape: f32[4], index: 5, kind: output, shape index: {1}]   ;;  %s2058_s6 = inlined_call_operand.vmem [shape: f32[4,4], index: 6, kind: output, shape index: {2}]   ;;  %s2059_s7 = inlined_call_operand.vmem [shape: f32[4,4], index: 7, kind: output, shape index: {3}]   ;;  %s2060_s8 = inlined_call_operand.vmem [shape: f32[4,4], index: 8, kind: output, shape index: {4}]   ;;  %s2061_s9 = inlined_call_operand.vmem [shape: f32[4,4], index: 9, kind: output, shape index: {5}]  }
   0x1   :  { %v72_v0 = vld [vmem:[%s2052_s0] sm:$0xf]  ;;  %295 = vst [vmem:[#allocation12] sm:$0xff] %v1769_v5  ;;  %296 = vst [vmem:[#allocation14] sm:$0xff] %v1769_v5  ;;  %s299_s0 = smov [#allocation12]  ;;  %s1467_s19 = smov [#allocation20] }
   0x2   :  { %v135_v1 = vld [vmem:[%s2053_s1] sm:$0xf]  ;;  %73 = vst [vmem:[#allocation1] sm:$0xf] %v72_v0  ;;  %297 = vst [vmem:[#allocation16] sm:$0xff] %v1769_v5  ;;  %v1834_v6 = vand.u32 127, %v300_v3 }
   0x3   :  { %v198_v2 = vld [vmem:[%s2054_s2] sm:$0xf]  ;;  %136 = vst [vmem:[#allocation3] sm:$0xf] %v135_v1  ;;  %298 = vst [vmem:[#allocation18] sm:$0xff] %v1769_v5  ;;  %v1836_v7 = vshrl.u32 %v300_v3, 7 }
   0x4   :  { %199 = vst [vmem:[#allocation5] sm:$0xf] %v198_v2  ;;  %v261_v4 = vld [vmem:[%s2055_s3] sm:$0xf]  ;;  %v302_v6 = vmov %v1834_v6  ;;  %s312_s1 = smov [#allocation18]  ;;  %s283_s2 = smov [#allocation20] }
   0x5   :  { %262 = vst [vmem:[#allocation7] sm:$0xf] %v261_v4  ;;  %v305_v7 = vmov %v1836_v7  ;;  %v315_v6 = vmov %v1834_v6  ;;  %s286_s3 = smov [#allocation21]  ;;  %vm1471_vm2 = vcmp.lt.s32.totalorder %v1834_v6, 4  ;;  %s1484_s20 = smov [#allocation21] }
   0x6   :  { %v318_v7 = vmov %v1836_v7  ;;  %vm309_vm0 = vcmp.eq.s32.totalorder %v305_v7, %v302_v6  ;;  %s1501_s21 = smov [#allocation22]  ;;  %s1518_s22 = smov [#allocation23] }
   0x7   :  { %vm322_vm1 = vcmp.eq.s32.totalorder %v318_v7, %v315_v6  ;;  %v1463_v6 = vmov %v1834_v6  ;;  %v1466_v7 = vmov %v1836_v7 }
   0x8   :  { %v306_v12 = vld [vmem:[%s299_s0] sm:$0xf]  ;;  %vm1476_vm3 = vcmp.eq.s32.totalorder %v1466_v7, %v1463_v6  ;;  %v1514_v6 = vmov %v1834_v6  ;;  %v1483_v7 = vmov %v1836_v7 }
   0x9   :  { %v266_v8 = vld [vmem:[#allocation1] sm:$0xf]  ;;  %v310_v14 = vsel %vm309_vm0, 1.0, %v306_v12  ;;  %v1480_v6 = vmov %v1834_v6  ;;  %v1517_v7 = vmov %v1836_v7 }
   0xa   :  { %v271_v9 = vld [vmem:[#allocation3] sm:$0xf]  ;;  %267 = vst [vmem:[#allocation0] sm:$0xf] %v266_v8  ;;  %v319_v13 = vld [vmem:[%s312_s1] sm:$0xf]  ;;  %v1497_v6 = vmov %v1834_v6  ;;  %v1500_v7 = vmov %v1836_v7  ;;  %vm1527_vm4 = vcmp.eq.s32.totalorder %v1517_v7, %v1514_v6 }
   0xb   :  { %v276_v10 = vld [vmem:[#allocation5] sm:$0xf]  ;;  %272 = vst [vmem:[#allocation2] sm:$0xf] %v271_v9  ;;  %v323_v15 = vsel %vm322_vm1, 1.0, %v319_v13  ;;  %311 = vst [vmem:[%s299_s0] sm:$0xf] %v310_v14 }
   0xc   :  { %277 = vst [vmem:[#allocation4] sm:$0xf] %v276_v10  ;;  %v281_v11 = vld [vmem:[#allocation7] sm:$0xf]  ;;  %324 = vst [vmem:[%s312_s1] sm:$0xf] %v323_v15 }
   0xd   :  { %282 = vst [vmem:[#allocation6] sm:$0xf] %v281_v11 }
  0x11   :  { %v284_v16 = vld [vmem:[#allocation0] sm:$0xff] }
  0x12   :  { %v287_v17 = vld [vmem:[#allocation2] sm:$0xff]  ;;  %285 = vst [vmem:[%s283_s2] sm:$0xff] %v284_v16 }
  0x13   :  { %v290_v18 = vld [vmem:[#allocation4] sm:$0xff]  ;;  %288 = vst [vmem:[%s286_s3] sm:$0xff] %v287_v17 }
  0x14   :  { %291 = vst [vmem:[%s289_s17] sm:$0xff] %v290_v18  ;;  %v293_v19 = vld [vmem:[#allocation6] sm:$0xff] }
  0x15   :  { %294 = vst [vmem:[%s292_s18] sm:$0xff] %v293_v19 }
  0x19   :  { %v1473_v20 = vld [vmem:[%s1467_s19] sm:$0xf] }
  0x1a   :  { %v1490_v21 = vld [vmem:[%s1484_s20] sm:$0xf]  ;;  %v1474_v22 = vsel %vm1471_vm2, %v1473_v20, 0.0 }
  0x1b   :  { %v1491_v23 = vsel %vm1471_vm2, %v1490_v21, 0.0  ;;  %v1507_v24 = vld [vmem:[%s1501_s21] sm:$0xf]  ;;  %v1475_v26 = vmul.f32 %v1474_v22, %v1474_v22 }
  0x1c   :  { %v1524_v25 = vld [vmem:[%s1518_s22] sm:$0xf]  ;;  %v1492_v27 = vmul.f32 %v1491_v23, %v1491_v23  ;;  %v1508_v28 = vsel %vm1471_vm2, %v1507_v24, 0.0 }
  0x1d   :  { %v1525_v29 = vsel %vm1471_vm2, %v1524_v25, 0.0  ;;  %v1509_v30 = vmul.f32 %v1508_v28, %v1508_v28  ;;  %v1477_v33 = vsel %vm1476_vm3, 0.0, %v1475_v26 }
  0x1e   :  { %v1494_v31 = vadd.f32 %v1492_v27, %v1475_v26  ;;  %v1526_v32 = vmul.f32 %v1525_v29, %v1525_v29  ;;  %v1493_v34 = vadd.f32 %v1492_v27, %v1477_v33 }
  0x20   :  { %v1511_v35 = vadd.f32 %v1509_v30, %v1494_v31  ;;  %v1510_v36 = vadd.f32 %v1509_v30, %v1493_v34  ;;  %v1528_v37 = vsel %vm1527_vm4, 0.0, %v1526_v32 }
  0x22   :  { %v1530_v38 = vadd.f32 %v1526_v32, %v1511_v35  ;;  %v1529_v39 = vadd.f32 %v1528_v37, %v1510_v36 }
  0x24   :  { %1531 = vadd.xlane.f32.xlu0 %v1530_v38 }
  0x28   :  { %1539 = vadd.xlane.f32.xlu0 %v1529_v39 }
  0xad   :  { %v1532_v40 = vpop.xlane.xlu0 %1531 }
  0xae   :  { %v1533_v41 = vrot.slane %v1532_v40, 4 }
  0xb0   :  { %v1534_v42 = vadd.f32 %v1533_v41, %v1532_v40 }
  0xb1   :  { %v1540_v43 = vpop.xlane.xlu0 %1539 }
  0xb2   :  { %v1535_v44 = vrot.slane %v1534_v42, 2  ;;  %v1541_v45 = vrot.slane %v1540_v43, 4 }
  0xb4   :  { %v1542_v46 = vadd.f32 %v1541_v45, %v1540_v43  ;;  %v1536_v47 = vadd.f32 %v1535_v44, %v1534_v42 }
  0xb6   :  { %v1543_v48 = vrot.slane %v1542_v46, 2  ;;  %v1537_v50 = vrot.slane %v1536_v47, 1 }
  0xb8   :  { %v1544_v49 = vadd.f32 %v1543_v48, %v1542_v46  ;;  %v1538_v53 = vadd.f32 %v1537_v50, %v1536_v47 }
  0xba   :  { %v1545_v51 = vrot.slane %v1544_v49, 1 }
  0xbc   :  { %v1546_v52 = vadd.f32 %v1545_v51, %v1544_v49 }
  0xbe   :  { %1718 = vpush %v1546_v52 }
  0xbf   :  { %1720 = vpush %v1538_v53 }
  0xef   :  { %s1719_s23 = spop %1718 }
  0xf0   :  { %s1721_s24 = spop %1720 }
  0xf1   :  { %s1549_s25 = smul.f32 1e-10, %s1721_s24 }
  0xf3   :  { %p1550_p0 = scmp.le.f32.partialorder %s1719_s23, %s1549_s25 }
  0xf4   :  { %s1860_s26 = smov (!%p1550_p0), 0  }
  0xf5   :  { %1553 = sbr.rel (%p1550_p0) target bundleno = 927 (0x39f), region = 440 }
  0xfa LB: > { %s1865_s27 = smov 0   ;;  %s1763_s26 = sphi %s1860_s26, %s2062_s26  }
  0xfb LB: >> { %s429_s28 = smov [#allocation20]  ;;  %v433_v6 = vmov %v1834_v6  ;;  %v436_v7 = vmov %v1836_v7  ;;  %s449_s29 = smov [#allocation21]  ;;  %vm752_vm14 = vcmp.eq.s32.totalorder %v1836_v7, 0  ;;  %vm764_vm15 = vcmp.eq.s32.totalorder %v1836_v7, 3  ;;  %s1767_s27 = sphi %s1865_s27, %s428_s27  }
  0xfc   : >> { %v453_v6 = vmov %v1834_v6  ;;  %v456_v7 = vmov %v1836_v7  ;;  %v437_v54 = vld [vmem:[%s429_s28] sm:$0xf]  ;;  %vm440_vm5 = vcmp.eq.s32.totalorder %v436_v7, %v433_v6  ;;  %s469_s30 = smov [#allocation23]  ;;  %s430_s10 = smov [#allocation24] }
  0xfd   : >> { %vm460_vm6 = vcmp.eq.s32.totalorder %v456_v7, %v453_v6  ;;  %v473_v6 = vmov %v1834_v6  ;;  %v476_v7 = vmov %v1836_v7  ;;  %v441_v55 = vsel %vm440_vm5, %v437_v54, 0.0  ;;  %v457_v56 = vld [vmem:[%s449_s29] sm:$0xf]  ;;  %s450_s11 = smov [#allocation25]  ;;  %s470_s12 = smov [#allocation26] }
  0xfe   : >> { %vm480_vm7 = vcmp.eq.s32.totalorder %v476_v7, %v473_v6  ;;  %v442_v57 = vrot.slane %v441_v55, 4  ;;  %v461_v58 = vsel %vm460_vm6, %v457_v56, 0.0  ;;  %v477_v59 = vld [vmem:[%s469_s30] sm:$0xf]  ;;  %s493_s13 = smov [#allocation25]  ;;  %s491_s14 = smov [#allocation24]  ;;  %v542_v6 = vmov %v1834_v6 }
  0xff   : >> { %v462_v60 = vrot.slane %v461_v58, 4  ;;  %v481_v61 = vsel %vm480_vm7, %v477_v59, 0.0  ;;  %s495_s15 = smov [#allocation26]  ;;  %s530_s16 = smov [#allocation27]  ;;  %v545_v7 = vmov %v1836_v7  ;;  %v557_v6 = vmov %v1834_v6 }
 0x100   : >> { %v443_v62 = vadd.f32 %v442_v57, %v441_v55  ;;  %v482_v63 = vrot.slane %v481_v61, 4  ;;  %s532_s0 = smov [#allocation28]  ;;  %s489_s1 = smov [#allocation29]  ;;  %v560_v7 = vmov %v1836_v7  ;;  %vm547_vm12 = vcmp.eq.s32.totalorder %v545_v7, %v542_v6 }
 0x101   : >> { %v463_v0 = vadd.f32 %v462_v60, %v461_v58  ;;  %s490_s2 = smov [#allocation30]  ;;  %s534_s1 = smov %s489_s1  ;;  %vm562_vm13 = vcmp.eq.s32.totalorder %v560_v7, %v557_v6  ;;  %v655_v6 = vmov %v1834_v6  ;;  %v658_v7 = vmov %v1836_v7 }
 0x102   : >> { %v444_v1 = vrot.slane %v443_v62, 2  ;;  %v483_v2 = vadd.f32 %v482_v63, %v481_v61  ;;  %s536_s2 = smov %s490_s2  ;;  %s538_s3 = smov [#allocation29]  ;;  %v669_v6 = vmov %v1834_v6  ;;  %v672_v7 = vmov %v1836_v7 }
 0x103   : >> { %v464_v3 = vrot.slane %v463_v0, 2  ;;  %s553_s17 = smov [#allocation30]  ;;  %s551_s18 = smov [#allocation31]  ;;  %vm662_vm0 = vcmp.eq.s32.totalorder %v658_v7, %v655_v6  ;;  %v628_v6 = vmov %v1834_v6  ;;  %v631_v7 = vmov %v1836_v7 }
 0x104   : >> { %v445_v4 = vadd.f32 %v444_v1, %v443_v62  ;;  %v484_v5 = vrot.slane %v483_v2, 2  ;;  %s568_s19 = smov [#allocation31]  ;;  %s1880_s20 = smov [#allocation20]  ;;  %v642_v6 = vmov %v1834_v6  ;;  %v645_v7 = vmov %v1836_v7 }
 0x105   : >> { %v465_v8 = vadd.f32 %v464_v3, %v463_v0  ;;  %s566_s21 = smov [#allocation32]  ;;  %s1882_s22 = smov [#allocation21]  ;;  %v576_v53 = vld [vmem:[%s1880_s20] sm:$0xf]  ;;  %vm677_vm1 = vcmp.eq.s32.totalorder %v672_v7, %v669_v6  ;;  %vm636_vm3 = vcmp.eq.s32.totalorder %v631_v7, %v628_v6  ;;  %vm649_vm4 = vcmp.eq.s32.totalorder %v645_v7, %v642_v6 }
 0x106   : >> { %v446_v9 = vrot.slane %v445_v4, 1  ;;  %v485_v10 = vadd.f32 %v484_v5, %v483_v2  ;;  %s1884_s23 = smov [#allocation22]  ;;  %s1886_s24 = smov [#allocation23]  ;;  %v577_v54 = vld [vmem:[%s1882_s22] sm:$0xf]  ;;  %vm691_vm5 = vcmp.eq.s32.totalorder %v1834_v6, 0 }
 0x107   : >> { %v466_v11 = vrot.slane %v465_v8, 1  ;;  %s1888_s25 = smov [#allocation12]  ;;  %s1890_s28 = smov [#allocation14]  ;;  %v578_v55 = vld [vmem:[%s1884_s23] sm:$0xf]  ;;  %vm695_vm6 = vcmp.eq.s32.totalorder %v1834_v6, 1 }
 0x108   : >> { %v447_v12 = vadd.f32 %v446_v9, %v445_v4  ;;  %v486_v13 = vrot.slane %v485_v10, 1  ;;  %s1892_s29 = smov [#allocation16]  ;;  %s792_s30 = smov [#allocation31]  ;;  %v579_v56 = vld [vmem:[%s1886_s24] sm:$0xf]  ;;  %vm708_vm7 = vcmp.eq.s32.totalorder %v1834_v6, 3 }
 0x109   : >> { %v467_v14 = vadd.f32 %v466_v11, %v465_v8  ;;  %v800_v57 = vld [vmem:[%s1888_s25] sm:$0xf]  ;;  %s428_s27 = sadd.s32 1, %s1767_s27  }
 0x10a   : >> { %448 = vst [vmem:[%s430_s10] sm:$0x1] %v447_v12  ;;  %v487_v15 = vadd.f32 %v486_v13, %v485_v10  ;;  %s1896_s10 = smov [#allocation18]  ;;  %v801_v58 = vld [vmem:[%s1890_s28] sm:$0xf]  ;;  %p425_p1 = scmp.ge.s32.totalorder %s428_s27, 7  }
 0x10b   : >> { %468 = vst [vmem:[%s450_s11] sm:$0x1] %v467_v14  ;;  %v802_v59 = vld [vmem:[%s1892_s29] sm:$0xf]  ;;  %s570_s11 = smov [#allocation32]  ;;  %v329_v6 = vmov (%p425_p1), %v1834_v6  ;;  %v332_v7 = vmov (%p425_p1), %v1836_v7 }
 0x10c   : >> { %488 = vst [vmem:[%s470_s12] sm:$0x1] %v487_v15  ;;  %v803_v61 = vld [vmem:[%s1896_s10] sm:$0xf]  ;;  %s794_s12 = smov [#allocation32]  ;;  %v382_v6 = vmov (%p425_p1), %v1834_v6 }
 0x111   : >> { %v492_v18 = vld [vmem:[%s491_s14] sm:$0xff]  ;;  %s598_s14 = smov [#allocation30] }
 0x112   : >> { %v494_v16 = vld [vmem:[%s493_s13] sm:$0xff]  ;;  %v515_v33 = vand.u32 2147483647, %v492_v18  ;;  %s596_s13 = smov [#allocation29] }
 0x113   : >> { %v498_v17 = vmul.f32 2.0, %v494_v16  ;;  %v496_v19 = vld [vmem:[%s495_s15] sm:$0xff]  ;;  %v516_v36 = vand.u32 2147483647, %v494_v16  ;;  %s1912_s15 = smov [#allocation12] }
 0x114   : >> { %v497_v20 = vsub.f32 %v496_v19, %v492_v18  ;;  %v517_v34 = vand.u32 2147483647, %v496_v19 }
 0x115   : >> { %1745 = vrcp.f32 %v498_v17 }
 0x116   : >> { %v518_v35 = vmin.f32 %v515_v33, %v517_v34 }
 0x118   : >> { %v519_v37 = vmul.f32 1.1920929e-08, %v518_v35 }
 0x11a   : >> { %vm520_vm11 = vcmp.le.f32.partialorder %v516_v36, %v519_v37 }
 0x122   : >> { %v1746_v21 = vpop.eup %1745 }
 0x123   : >> { %v500_v22 = vmul.f32 %v1746_v21, %v497_v20 }
 0x125   : >> { %v502_v23 = vmul.f32 %v500_v22, %v500_v22  ;;  %vm501_vm10 = vcmp.ge.f32.partialorder %v500_v22, 0.0 }
 0x127   : >> { %v503_v24 = vadd.f32 1.0, %v502_v23 }
 0x129   : >> { %1747 = vrsqrt.f32 %v503_v24  ;;  %vm506_vm8 = vcmp.eq.f32.partialorder %v503_v24, inf  ;;  %v509_v26 = vand.u32 2147483648, %v503_v24  ;;  %vm508_vm9 = vcmp.eq.f32.partialorder %v503_v24, 0.0 }
 0x136   : >> { %v1748_v25 = vpop.eup %1747 }
 0x137   : >> { %v505_v27 = vmul.f32 %v1748_v25, %v503_v24 }
 0x139   : >> { %v507_v28 = vsel %vm506_vm8, %v503_v24, %v505_v27  ;;  %vm344_vm8 = vcmp.eq.s32.totalorder (%p425_p1), %v332_v7, %v329_v6  ;;  %v385_v7 = vmov (%p425_p1), %v1836_v7  ;;  %v348_v6 = vmov (%p425_p1), %v1834_v6 }
 0x13a   : >> { %v510_v29 = vsel %vm508_vm9, %v509_v26, %v507_v28  ;;  %v351_v7 = vmov (%p425_p1), %v1836_v7  ;;  %v365_v6 = vmov (%p425_p1), %v1834_v6  ;;  %vm397_vm9 = vcmp.eq.s32.totalorder (%p425_p1), %v385_v7, %v382_v6 }
 0x13b   : >> { %v511_v30 = vxor.u32 2147483648, %v510_v29  ;;  %v368_v7 = vmov (%p425_p1), %v1836_v7 }
 0x13d   : >> { %v512_v31 = vsel %vm501_vm10, %v510_v29, %v511_v30 }
 0x13e   : >> { %v513_v32 = vadd.f32 %v512_v31, %v500_v22 }
 0x140   : >> { %1749 = vrcp.f32 %v513_v32 }
 0x14d   : >> { %v1750_v38 = vpop.eup %1749 }
 0x14e   : >> { %v521_v39 = vsel %vm520_vm11, 0.0, %v1750_v38 }
 0x14f   : >> { %v522_v40 = vmul.f32 %v521_v39, %v521_v39  ;;  %v526_v41 = vmul.f32 %v521_v39, %v494_v16 }
 0x151   : >> { %v523_v42 = vadd.f32 1.0, %v522_v40  ;;  %v527_v43 = vsub.f32 %v492_v18, %v526_v41  ;;  %v529_v44 = vadd.f32 %v526_v41, %v496_v19 }
 0x153   : >> { %1751 = vrsqrt.f32 %v523_v42  ;;  %531 = vst [vmem:[%s530_s16] sm:$0xff] %v527_v43  ;;  %533 = vst [vmem:[%s532_s0] sm:$0xff] %v529_v44  ;;  %s1914_s16 = smov [#allocation22]  ;;  %s1916_s0 = smov [#allocation23] }
 0x160   : >> { %v1752_v45 = vpop.eup %1751 }
 0x161   : >> { %535 = vst [vmem:[%s534_s1] sm:$0xff] %v1752_v45  ;;  %v525_v46 = vmul.f32 %v1752_v45, %v521_v39  ;;  %s1918_s1 = smov [#allocation20] }
 0x163   : >> { %537 = vst [vmem:[%s536_s2] sm:$0xff] %v525_v46  ;;  %s1920_s2 = smov [#allocation16] }
 0x168   : >> { %v539_v47 = vld [vmem:[%s538_s3] ss:$0 sm:$0xff]  ;;  %s1922_s3 = smov [#allocation14] }
 0x169   : >> { %v548_v48 = vsel %vm547_vm12, %v539_v47, 0.0  ;;  %v597_v27 = vld [vmem:[%s596_s13] ss:$0 sm:$0xff]  ;;  %s768_s13 = smov [#allocation21] }
 0x16a   : >> { %549 = vadd.xlane.f32.xlu0 %v548_v48  ;;  %v554_v49 = vld [vmem:[%s553_s17] ss:$0 sm:$0xff]  ;;  %s1926_s17 = smov [#allocation18] }
 0x16b   : >> { %v563_v50 = vsel %vm562_vm13, %v554_v49, 0.0  ;;  %v599_v28 = vld [vmem:[%s598_s14] ss:$0 sm:$0xff]  ;;  %s745_s14 = smov [#allocation22] }
 0x16e   : >> { %564 = vadd.xlane.f32.xlu0 %v563_v50 }
 0x1f3   : >> { %v550_v51 = vpop.xlane.xlu0 %549 }
 0x1f4   : >> { %552 = vst [vmem:[%s551_s18] sm:$0xff] %v550_v51  ;;  %s1928_s18 = smov [#allocation21] }
 0x1f7   : >> { %v565_v52 = vpop.xlane.xlu0 %564 }
 0x1f8   : >> { %567 = vst [vmem:[%s566_s21] sm:$0xff] %v565_v52  ;;  %s665_s21 = smov [#allocation23] }
 0x1fb   : >> { %v569_v60 = vld [vmem:[%s568_s19] sm:$0xff]  ;;  %s666_s19 = smov [#allocation28] }
 0x1fc   : >> { %v793_v62 = vld [vmem:[%s792_s30] sm:$0xff]  ;;  %v580_v63 = vmul.f32 %v576_v53, %v569_v60  ;;  %v583_v0 = vmul.f32 %v577_v54, %v569_v60  ;;  %v587_v1 = vmul.f32 %v578_v55, %v569_v60  ;;  %v590_v2 = vmul.f32 %v579_v56, %v569_v60  ;;  %s681_s30 = smov [#allocation21] }
 0x1fd   : >> { %v804_v3 = vmul.f32 %v800_v57, %v793_v62  ;;  %v807_v4 = vmul.f32 %v801_v58, %v793_v62  ;;  %v811_v5 = vmul.f32 %v802_v59, %v793_v62  ;;  %v814_v8 = vmul.f32 %v803_v61, %v793_v62 }
 0x1ff   : >> { %v571_v9 = vld [vmem:[%s570_s11] sm:$0xff]  ;;  %s1973_s11 = smov [#allocation23] }
 0x200   : >> { %v795_v10 = vld [vmem:[%s794_s12] sm:$0xff]  ;;  %v581_v11 = vmul.f32 %v578_v55, %v571_v9  ;;  %v584_v12 = vmul.f32 %v579_v56, %v571_v9  ;;  %v586_v13 = vmul.f32 %v576_v53, %v571_v9  ;;  %v589_v14 = vmul.f32 %v577_v54, %v571_v9  ;;  %s744_s12 = smov [#allocation20] }
 0x201   : >> { %v805_v15 = vmul.f32 %v802_v59, %v795_v10  ;;  %v808_v16 = vmul.f32 %v803_v61, %v795_v10  ;;  %v810_v17 = vmul.f32 %v800_v57, %v795_v10  ;;  %v813_v18 = vmul.f32 %v801_v58, %v795_v10  ;;  %v673_v59 = vld [vmem:[%s666_s19] ss:$0 sm:$0xff] }
 0x202   : >> { %v582_v19 = vsub.f32 %v580_v63, %v581_v11  ;;  %v585_v20 = vsub.f32 %v583_v0, %v584_v12  ;;  %v588_v21 = vadd.f32 %v587_v1, %v586_v13  ;;  %v591_v22 = vadd.f32 %v590_v2, %v589_v14 }
 0x203   : >> { %v806_v23 = vsub.f32 %v804_v3, %v805_v15  ;;  %v809_v24 = vsub.f32 %v807_v4, %v808_v16  ;;  %v812_v25 = vadd.f32 %v811_v5, %v810_v17  ;;  %v815_v26 = vadd.f32 %v814_v8, %v813_v18 }
 0x204   : >> { %593 = vst [vmem:[%s1882_s22] sm:$0xf] %v585_v20  ;;  %595 = vst [vmem:[%s1886_s24] sm:$0xf] %v591_v22  ;;  %s625_s22 = smov [#allocation27]  ;;  %s639_s24 = smov [#allocation21] }
 0x205   : >> { %592 = vst [vmem:[%s1880_s20] sm:$0xf] %v582_v19  ;;  %594 = vst [vmem:[%s1884_s23] sm:$0xf] %v588_v21  ;;  %s652_s20 = smov [#allocation22]  ;;  %s624_s23 = smov [#allocation20]  ;;  %v632_v63 = vld [vmem:[%s625_s22] ss:$0 sm:$0xff] }
 0x206   : >> { %816 = vst [vmem:[%s1888_s25] sm:$0xf] %v806_v23  ;;  %817 = vst [vmem:[%s1890_s28] sm:$0xf] %v809_v24  ;;  %s1970_s25 = smov [#allocation22]  ;;  %s1770_s28 = smov 1  }
 0x207   : >> { %818 = vst [vmem:[%s1892_s29] sm:$0xf] %v812_v25  ;;  %819 = vst [vmem:[%s1896_s10] sm:$0xf] %v815_v26  ;;  %s680_s29 = smov [#allocation20]  ;;  %s1771_s10 = smov 127  }
 0x20b   : >> { %v607_v30 = vld [vmem:[%s1916_s0] sm:$0xf] }
 0x20c   : >> { %v606_v29 = vld [vmem:[%s1914_s16] sm:$0xf]  ;;  %v615_v36 = vmul.f32 %v607_v30, %v599_v28  ;;  %v618_v42 = vmul.f32 %v607_v30, %v597_v27 }
 0x20d   : >> { %v604_v31 = vld [vmem:[%s1918_s1] sm:$0xf]  ;;  %v614_v35 = vmul.f32 %v606_v29, %v597_v27  ;;  %v617_v37 = vmul.f32 %v606_v29, %v599_v28 }
 0x20e   : >> { %v822_v32 = vld [vmem:[%s1912_s15] ss:$0 sm:$0xff]  ;;  %v1693_v34 = vld [vmem:[%s1912_s15 + $0x3] ss:$0 sm:$0xff]  ;;  %v608_v48 = vmul.f32 %v604_v31, %v597_v27  ;;  %v611_v49 = vmul.f32 %v604_v31, %v599_v28 }
 0x20f   : >> { %v1692_v33 = vld [vmem:[%s1912_s15 - $0x1] sm:$0xe]  ;;  %v1697_v45 = vld [vmem:[%s1922_s3 + $0x3] ss:$0 sm:$0xff]  ;;  %v616_v47 = vsub.f32 %v614_v35, %v615_v36  ;;  %v619_v53 = vadd.f32 %v618_v42, %v617_v37 }
 0x210   : >> { %v829_v38 = vsel %vm752_vm14, %v822_v32, %v1692_v33  ;;  %v833_v39 = vld [vmem:[%s1920_s2] ss:$0 sm:$0xff]  ;;  %v1695_v40 = vld [vmem:[%s1920_s2 + $0x1] sm:$0x7] }
 0x211   : >> { %v846_v41 = vld [vmem:[%s1922_s3] ss:$0 sm:$0xff]  ;;  %832 = vst [vmem:[%s1912_s15] sm:$0xf] %v829_v38  ;;  %v841_v43 = vsel %vm764_vm15, %v1693_v34, %v1695_v40  ;;  %v1699_v51 = vld [vmem:[%s1926_s17 + $0x1] sm:$0x7]  ;;  %622 = vst [vmem:[%s1914_s16] sm:$0xf] %v616_v47 }
 0x212   : >> { %v1696_v44 = vld [vmem:[%s1922_s3 - $0x1] sm:$0xe]  ;;  %1694 = vst [vmem:[%s1912_s15 + $0x1] sm:$0x1] %v833_v39  ;;  %843 = vst [vmem:[%s1920_s2] sm:$0xf] %v841_v43  ;;  %v865_v54 = vsel %vm764_vm15, %v1697_v45, %v1699_v51  ;;  %s769_s15 = smov [#allocation23] }
 0x213   : >> { %v857_v46 = vld [vmem:[%s1926_s17] ss:$0 sm:$0xff]  ;;  %v853_v50 = vsel %vm752_vm14, %v846_v41, %v1696_v44  ;;  %623 = vst [vmem:[%s1916_s0] sm:$0xf] %v619_v53  ;;  %s868_s16 = sadd.s32 (%p425_p1), 1, %s1763_s26   ;;  %s333_s0 = smov (%p425_p1), [#allocation20] }
 0x214   : >> { %v605_v52 = vld [vmem:[%s1928_s18] sm:$0xf]  ;;  %856 = vst [vmem:[%s1922_s3] sm:$0xf] %v853_v50  ;;  %867 = vst [vmem:[%s1926_s17] sm:$0xf] %v865_v54  ;;  %s369_s2 = smov (%p425_p1), [#allocation22]  ;;  %p421_p2 = scmp.ge.s32.totalorder (%p425_p1), %s868_s16, 15 }
 0x215   : >> { %v609_v55 = vmul.f32 %v605_v52, %v599_v28  ;;  %v612_v56 = vmul.f32 %v605_v52, %v597_v27  ;;  %1698 = vst [vmem:[%s1922_s3 + $0x1] sm:$0x1] %v857_v46  ;;  %s386_s3 = smov (%p425_p1), [#allocation23]  ;;  %s2062_s26 = smov (%p425_p1), %s868_s16 }
 0x217   : >> { %v610_v57 = vsub.f32 %v608_v48, %v609_v55  ;;  %v613_v58 = vadd.f32 %v612_v56, %v611_v49 }
 0x218   : >> { %v659_v60 = vld [vmem:[%s652_s20] sm:$0xf] }
 0x219   : >> { %620 = vst [vmem:[%s1918_s1] sm:$0xf] %v610_v57  ;;  %621 = vst [vmem:[%s1928_s18] sm:$0xf] %v613_v58  ;;  %v663_v61 = vsel %vm662_vm0, 0.0, %v659_v60  ;;  %s352_s1 = smov (%p425_p1), [#allocation21] }
 0x21a   : >> { %v674_v62 = vld [vmem:[%s665_s21] sm:$0xf]  ;;  %664 = vst [vmem:[%s652_s20] sm:$0xf] %v663_v61 }
 0x21b   : >> { %v678_v0 = vsel %vm677_vm1, %v673_v59, %v674_v62 }
 0x21c   : >> { %679 = vst [vmem:[%s665_s21] sm:$0xf] %v678_v0 }
 0x220   : >> { %v633_v1 = vld [vmem:[%s624_s23] sm:$0xf] }
 0x221   : >> { %v646_v2 = vld [vmem:[%s639_s24] sm:$0xf]  ;;  %v637_v3 = vsel %vm636_vm3, %v632_v63, %v633_v1 }
 0x222   : >> { %v650_v4 = vsel %vm649_vm4, 0.0, %v646_v2  ;;  %638 = vst [vmem:[%s624_s23] sm:$0xf] %v637_v3  ;;  %v718_v5 = vld [vmem:[%s1970_s25] sm:$0xf] }
 0x223   : >> { %651 = vst [vmem:[%s639_s24] sm:$0xf] %v650_v4  ;;  %719 = vrot.lane.b32.xlu0 %v718_v5, %s1770_s28  ;;  %v714_v11 = vld [vmem:[%s1973_s11] sm:$0xf] }
 0x224   : >> { %v735_v12 = vld [vmem:[%s1973_s11] sm:$0xf] }
 0x225   : >> { %v717_v30 = vld [vmem:[%s1970_s25] sm:$0xf] }
 0x229   : >> { %v686_v8 = vld [vmem:[%s680_s29] sm:$0xf] }
 0x22a   : >> { %687 = vrot.lane.b32.xlu1 %v686_v8, %s1770_s28  ;;  %v682_v9 = vld [vmem:[%s681_s30] sm:$0xf] }
 0x22b   : >> { %v703_v10 = vld [vmem:[%s681_s30] sm:$0xf] }
 0x22c   : >> { %v685_v18 = vld [vmem:[%s680_s29] sm:$0xf] }
 0x22e   : >> { %683 = vrot.lane.b32.xlu1 %v682_v9, %s1770_s28 }
 0x232   : >> { %704 = vrot.lane.b32.xlu1 %v703_v10, %s1771_s10 }
 0x236   : >> { %715 = vrot.lane.b32.xlu1 %v714_v11, %s1770_s28 }
 0x23a   : >> { %736 = vrot.lane.b32.xlu1 %v735_v12, %s1771_s10 }
 0x295   : >> { %v720_v20 = vpop.permute.xlu0 %719 }
 0x296   : >> { %v724_v22 = vsel %vm691_vm5, %v718_v5, %v720_v20 }
 0x29c   : >> { %v688_v13 = vpop.permute.xlu1 %687 }
 0x29d   : >> { %v692_v14 = vsel %vm691_vm5, %v686_v8, %v688_v13 }
 0x2a0   : >> { %v684_v15 = vpop.permute.xlu1 %683 }
 0x2a1   : >> { %v696_v16 = vsel %vm695_vm6, %v684_v15, %v692_v14 }
 0x2a2   : >> { %v702_v17 = vsel %vm1471_vm2, %v696_v16, 0.0 }
 0x2a3   : >> { %710 = vst [vmem:[%s680_s29] sm:$0xf] %v702_v17 }
 0x2a4   : >> { %v705_v19 = vpop.permute.xlu1 %704 }
 0x2a5   : >> { %v709_v21 = vsel %vm708_vm7, %v685_v18, %v705_v19 }
 0x2a6   : >> { %711 = vst [vmem:[%s681_s30] sm:$0xf] %v709_v21 }
 0x2a8   : >> { %v716_v23 = vpop.permute.xlu1 %715 }
 0x2a9   : >> { %v728_v24 = vsel %vm695_vm6, %v716_v23, %v724_v22 }
 0x2aa   : >> { %v746_v25 = vld [vmem:[%s744_s12] ss:$0 sm:$0xff]  ;;  %v1685_v27 = vld [vmem:[%s744_s12 + $0x3] ss:$0 sm:$0xff]  ;;  %v734_v29 = vsel %vm1471_vm2, %v728_v24, 0.0 }
 0x2ab   : >> { %v1684_v26 = vld [vmem:[%s744_s12 - $0x1] sm:$0xe]  ;;  %742 = vst [vmem:[%s1970_s25] sm:$0xf] %v734_v29 }
 0x2ac   : >> { %v753_v28 = vsel %vm752_vm14, %v746_v25, %v1684_v26  ;;  %v737_v31 = vpop.permute.xlu1 %736 }
 0x2ad   : >> { %756 = vst [vmem:[%s744_s12] sm:$0xf] %v753_v28  ;;  %v770_v32 = vld [vmem:[%s768_s13] ss:$0 sm:$0xff]  ;;  %v1689_v34 = vld [vmem:[%s768_s13 + $0x3] ss:$0 sm:$0xff]  ;;  %v741_v35 = vsel %vm708_vm7, %v717_v30, %v737_v31 }
 0x2ae   : >> { %v1688_v33 = vld [vmem:[%s768_s13 - $0x1] sm:$0xe]  ;;  %743 = vst [vmem:[%s1973_s11] sm:$0xf] %v741_v35 }
 0x2af   : >> { %v777_v36 = vsel %vm752_vm14, %v770_v32, %v1688_v33 }
 0x2b0   : >> { %780 = vst [vmem:[%s768_s13] sm:$0xf] %v777_v36 }
 0x2b2   : >> { %v757_v37 = vld [vmem:[%s745_s14] ss:$0 sm:$0xff]  ;;  %v1687_v38 = vld [vmem:[%s745_s14 + $0x1] sm:$0x7] }
 0x2b3   : >> { %1686 = vst [vmem:[%s744_s12 + $0x1] sm:$0x1] %v757_v37  ;;  %v765_v39 = vsel %vm764_vm15, %v1685_v27, %v1687_v38 }
 0x2b4   : >> { %767 = vst [vmem:[%s745_s14] sm:$0xf] %v765_v39 }
 0x2b5   : >> { %v781_v40 = vld [vmem:[%s769_s15] ss:$0 sm:$0xff]  ;;  %v1691_v41 = vld [vmem:[%s769_s15 + $0x1] sm:$0x7] }
 0x2b6   : >> { %1690 = vst [vmem:[%s768_s13 + $0x1] sm:$0x1] %v781_v40  ;;  %v789_v42 = vsel %vm764_vm15, %v1689_v34, %v1691_v41 }
 0x2b7   : >> { %791 = vst [vmem:[%s769_s15] sm:$0xf] %v789_v42  ;;  %427 = sbr.rel (!%p425_p1) target bundleno = 251 (0xfb), region = 435 }
 0x2ba   : > { %v339_v43 = vld [vmem:[%s333_s0] sm:$0xf] (%p425_p1) }
 0x2bb   : > { %v340_v45 = vsel (%p425_p1), %vm1471_vm2, %v339_v43, 0.0  ;;  %v375_v47 = vld [vmem:[%s369_s2] sm:$0xf] (%p425_p1) }
 0x2bc   : > { %v341_v49 = vmul.f32 %v340_v45, %v340_v45  ;;  %v376_v51 = vsel %vm1471_vm2, %v375_v47, 0.0 }
 0x2bd   : > { %v358_v44 = vld [vmem:[%s352_s1] sm:$0xf]  ;;  %v377_v53 = vmul.f32 %v376_v51, %v376_v51 }
 0x2be   : > { %v359_v46 = vsel %vm1471_vm2, %v358_v44, 0.0  ;;  %v392_v48 = vld [vmem:[%s386_s3] sm:$0xf]  ;;  %v345_v56 = vsel %vm344_vm8, 0.0, %v341_v49 }
 0x2bf   : > { %v360_v50 = vmul.f32 %v359_v46, %v359_v46  ;;  %v393_v52 = vsel %vm1471_vm2, %v392_v48, 0.0 }
 0x2c0   : > { %v394_v55 = vmul.f32 %v393_v52, %v393_v52 }
 0x2c1   : > { %v362_v54 = vadd.f32 %v360_v50, %v341_v49  ;;  %v361_v57 = vadd.f32 %v360_v50, %v345_v56 }
 0x2c2   : > { %v398_v60 = vsel %vm397_vm9, 0.0, %v394_v55 }
 0x2c3   : > { %v379_v58 = vadd.f32 %v377_v53, %v362_v54  ;;  %v378_v59 = vadd.f32 %v377_v53, %v361_v57 }
 0x2c5   : > { %v400_v61 = vadd.f32 %v394_v55, %v379_v58  ;;  %v399_v62 = vadd.f32 %v398_v60, %v378_v59 }
 0x2c7   : > { %401 = vadd.xlane.f32.xlu0 %v400_v61 }
 0x2cb   : > { %409 = vadd.xlane.f32.xlu0 %v399_v62 }
 0x350   : > { %v402_v63 = vpop.xlane.xlu0 %401 }
 0x351   : > { %v403_v0 = vrot.slane %v402_v63, 4 }
 0x353   : > { %v404_v1 = vadd.f32 %v403_v0, %v402_v63 }
 0x354   : > { %v410_v2 = vpop.xlane.xlu0 %409 }
 0x355   : > { %v405_v3 = vrot.slane %v404_v1, 2  ;;  %v411_v4 = vrot.slane %v410_v2, 4 }
 0x357   : > { %v412_v5 = vadd.f32 %v411_v4, %v410_v2  ;;  %v406_v8 = vadd.f32 %v405_v3, %v404_v1 }
 0x359   : > { %v413_v9 = vrot.slane %v412_v5, 2  ;;  %v407_v11 = vrot.slane %v406_v8, 1 }
 0x35b   : > { %v414_v10 = vadd.f32 %v413_v9, %v412_v5  ;;  %v408_v14 = vadd.f32 %v407_v11, %v406_v8 }
 0x35d   : > { %v415_v12 = vrot.slane %v414_v10, 1 }
 0x35f   : > { %v416_v13 = vadd.f32 %v415_v12, %v414_v10 }
 0x361   : > { %1722 = vpush %v416_v13 }
 0x362   : > { %1724 = vpush %v408_v14 }
 0x392   : > { %s1723_s27 = spop %1722 }
 0x393   : > { %s1725_s17 = spop %1724 }
 0x394   : > { %s419_s18 = smul.f32 1e-10, %s1725_s17 }
 0x396   : > { %p420_p3 = scmp.le.f32.partialorder %s1723_s27, %s419_s18 }
 0x398   : > { %p422_p4 = por %p421_p2, %p420_p3 }
 0x39a   :  { %870 = sbr.rel (!%p422_p4) target bundleno = 250 (0xfa), region = 446 }
 0x39f PF:  { %s871_s19 = smov [#allocation20]  ;;  %v875_v6 = vmov %v1834_v6  ;;  %v878_v7 = vmov %v1836_v7  ;;  %v931_v15 = vld [vmem:[#allocation12] sm:$0xf]  ;;  %v939_v16 = vld [vmem:[#allocation14] sm:$0xf]  ;;  %s891_s20 = smov [#allocation23] }
 0x3a0   :  { %v895_v6 = vmov %v1834_v6  ;;  %v898_v7 = vmov %v1836_v7  ;;  %v879_v17 = vld [vmem:[%s871_s19] sm:$0xf]  ;;  %vm882_vm10 = vcmp.eq.s32.totalorder %v878_v7, %v875_v6  ;;  %934 = vst [vmem:[#allocation13] sm:$0xf] %v931_v15  ;;  %942 = vst [vmem:[#allocation15] sm:$0xf] %v939_v16 }
 0x3a1   :  { %vm902_vm11 = vcmp.eq.s32.totalorder %v898_v7, %v895_v6  ;;  %v947_v18 = vld [vmem:[#allocation16] sm:$0xf]  ;;  %v883_v19 = vsel %vm882_vm10, %v879_v17, 0.0  ;;  %v899_v20 = vld [vmem:[%s891_s20] sm:$0xf]  ;;  %s872_s30 = smov [#allocation8] }
 0x3a2   :  { %950 = vst [vmem:[#allocation17] sm:$0xf] %v947_v18  ;;  %v955_v21 = vld [vmem:[#allocation18] sm:$0xf]  ;;  %v884_v22 = vrot.slane %v883_v19, 4  ;;  %v903_v23 = vsel %vm902_vm11, %v899_v20, 0.0 }
 0x3a3   :  { %958 = vst [vmem:[#allocation19] sm:$0xf] %v955_v21  ;;  %v904_v24 = vrot.slane %v903_v23, 4 }
 0x3a4   :  { %v885_v25 = vadd.f32 %v884_v22, %v883_v19 }
 0x3a5   :  { %v905_v26 = vadd.f32 %v904_v24, %v903_v23 }
 0x3a6   :  { %v886_v27 = vrot.slane %v885_v25, 2 }
 0x3a7   :  { %v906_v28 = vrot.slane %v905_v26, 2  ;;  %v1150_v29 = vld [vmem:[#allocation13] sm:$0xf]  ;;  %v1213_v30 = vld [vmem:[#allocation15] sm:$0xf] }
 0x3a8   :  { %v887_v31 = vadd.f32 %v886_v27, %v885_v25  ;;  %1151 = vst [vmem:[%s2058_s6] sm:$0xf] %v1150_v29  ;;  %1214 = vst [vmem:[%s2059_s7] sm:$0xf] %v1213_v30  ;;  %s892_s6 = smov [#allocation10] }
 0x3a9   :  { %v1276_v6 = vld [vmem:[#allocation17] sm:$0xf]  ;;  %v907_v7 = vadd.f32 %v906_v28, %v905_v26 }
 0x3aa   :  { %1277 = vst [vmem:[%s2060_s8] sm:$0xf] %v1276_v6  ;;  %v1339_v32 = vld [vmem:[#allocation19] sm:$0xf]  ;;  %v888_v33 = vrot.slane %v887_v31, 1 }
 0x3ab   :  { %1340 = vst [vmem:[%s2061_s9] sm:$0xf] %v1339_v32  ;;  %v908_v34 = vrot.slane %v907_v7, 1 }
 0x3ac   :  { %v889_v35 = vadd.f32 %v888_v33, %v887_v31 }
 0x3ad   :  { %v909_v36 = vadd.f32 %v908_v34, %v907_v7 }
 0x3ae   :  { %890 = vst [vmem:[%s872_s30] sm:$0x1] %v889_v35 }
 0x3af   :  { %910 = vst [vmem:[%s892_s6] sm:$0x1] %v909_v36 }
 0x3b5   :  { %v915_v37 = vld [vmem:[#allocation8] sm:$0x1] }
 0x3b6   :  { %918 = vst [vmem:[#allocation9] sm:$0x1] %v915_v37  ;;  %v923_v38 = vld [vmem:[#allocation10] sm:$0x1] }
 0x3b7   :  { %926 = vst [vmem:[#allocation11] sm:$0x1] %v923_v38 }
 0x3bd   :  { %v1022_v39 = vld [vmem:[#allocation9] sm:$0x1] }
 0x3be   :  { %1023 = vst [vmem:[%s2056_s4] sm:$0x1] %v1022_v39  ;;  %v1087_v40 = vld [vmem:[#allocation11] sm:$0x1] }
 0x3bf   :  { %1088 = vst [vmem:[%s2057_s5] sm:$0x1] %v1087_v40 }

// kernel: shape_model_forward.8
= control target key start
LH: loop header
LB: loop body
LE: loop exit
PB: predicated region body
PF: predicated region fallthrough
CT: control target
= control target key end

     0   :  { %v349_v15 = vmov 1966171168   ;;  %v78_v17 = vlaneseq  ;;  %vm334_vm1 = vcmask 64512   ;;  %s419_s0 = inlined_call_operand.vmem [shape: f32[8,768], index: 0, kind: input, shape index: {}]   ;;  %s420_s2 = inlined_call_operand.vmem [shape: f32[8,768], index: 2, kind: output, shape index: {1}]   ;;  %s421_s1 = inlined_call_operand.vmem [shape: f32[1,768], index: 1, kind: output, shape index: {0}]   ;;  %s422_s3 = inlined_call_operand.vmem [shape: f32[8,8], index: 3, kind: output, shape index: {2}]  }
   0x1   :  { %v12_v0 = vld [vmem:[%s419_s0 + $0x8] sm:$0xff]  ;;  %v11_v1 = vld [vmem:[%s419_s0] sm:$0xff]  ;;  %v14_v2 = vld [vmem:[%s419_s0 + $0x18] sm:$0xff]  ;;  %v76_v16 = vunpack.c.l.s4 %v349_v15 }
   0x2   :  { %v23_v3 = vrot.slane %v12_v0, 4  ;;  %v17_v4 = vrot.slane %v11_v1, 4  ;;  %v35_v5 = vrot.slane %v14_v2, 4  ;;  %v13_v6 = vld [vmem:[%s419_s0 + $0x10] sm:$0xff]  ;;  %v15_v7 = vld [vmem:[%s419_s0 + $0x20] sm:$0xff]  ;;  %v388_v9 = vld [vmem:[%s419_s0 + $0x28] sm:$0xff] }
   0x3   :  { %v29_v8 = vrot.slane %v13_v6, 4  ;;  %v41_v10 = vrot.slane %v15_v7, 4  ;;  %v47_v14 = vrot.slane %v388_v9, 4  ;;  %v77_v30 = vunpack.c.0.s8 %v76_v16 }
   0x4   :  { %v24_v11 = vadd.f32 %v23_v3, %v12_v0  ;;  %v18_v12 = vadd.f32 %v17_v4, %v11_v1  ;;  %v36_v13 = vadd.f32 %v35_v5, %v14_v2  ;;  %v79_v31 = vshrl.u32 %v78_v17, 7 }
   0x5   :  { %v30_v18 = vadd.f32 %v29_v8, %v13_v6  ;;  %v42_v19 = vadd.f32 %v41_v10, %v15_v7  ;;  %v48_v23 = vadd.f32 %v47_v14, %v388_v9  ;;  %vm115_vm0 = vcmp.lt.s32.totalorder %v78_v17, 768 }
   0x6   :  { %v25_v20 = vrot.slane %v24_v11, 2  ;;  %v19_v21 = vrot.slane %v18_v12, 2  ;;  %v37_v22 = vrot.slane %v36_v13, 2  ;;  %v80_v44 = vsub.s32 %v77_v30, %v79_v31 }
   0x7   :  { %v31_v24 = vrot.slane %v30_v18, 2  ;;  %v43_v25 = vrot.slane %v42_v19, 2  ;;  %v49_v29 = vrot.slane %v48_v23, 2 }
   0x8   :  { %v26_v26 = vadd.f32 %v25_v20, %v24_v11  ;;  %v20_v27 = vadd.f32 %v19_v21, %v18_v12  ;;  %v38_v28 = vadd.f32 %v37_v22, %v36_v13 }
   0x9   :  { %v32_v32 = vadd.f32 %v31_v24, %v30_v18  ;;  %v44_v33 = vadd.f32 %v43_v25, %v42_v19  ;;  %v50_v37 = vadd.f32 %v49_v29, %v48_v23 }
   0xa   :  { %v27_v34 = vrot.slane %v26_v26, 1  ;;  %v21_v35 = vrot.slane %v20_v27, 1  ;;  %v39_v36 = vrot.slane %v38_v28, 1 }
   0xb   :  { %v33_v38 = vrot.slane %v32_v32, 1  ;;  %v45_v39 = vrot.slane %v44_v33, 1  ;;  %v51_v43 = vrot.slane %v50_v37, 1 }
   0xc   :  { %v28_v40 = vadd.f32 %v27_v34, %v26_v26  ;;  %v22_v41 = vadd.f32 %v21_v35, %v20_v27  ;;  %v40_v42 = vadd.f32 %v39_v36, %v38_v28 }
   0xd   :  { %v34_v45 = vadd.f32 %v33_v38, %v32_v32  ;;  %v46_v46 = vadd.f32 %v45_v39, %v44_v33  ;;  %v52_v50 = vadd.f32 %v51_v43, %v50_v37 }
   0xe   :  { %v55_v47 = vmul.f32 0.125, %v28_v40  ;;  %v54_v48 = vmul.f32 0.125, %v22_v41  ;;  %v57_v49 = vmul.f32 0.125, %v40_v42 }
   0xf   :  { %v56_v51 = vmul.f32 0.125, %v34_v45  ;;  %v58_v52 = vmul.f32 0.125, %v46_v46  ;;  %v59_v59 = vmul.f32 0.125, %v52_v50 }
  0x10   :  { %v61_v53 = vsub.f32 %v12_v0, %v55_v47  ;;  %v60_v54 = vsub.f32 %v11_v1, %v54_v48  ;;  %v72_v55 = vcombine.low %v54_v48, %v55_v47  ;;  %v63_v56 = vsub.f32 %v14_v2, %v57_v49 }
  0x11   :  { %v62_v57 = vsub.f32 %v13_v6, %v56_v51  ;;  %v73_v58 = vcombine.low %v56_v51, %v57_v49  ;;  %v64_v60 = vsub.f32 %v15_v7, %v58_v52  ;;  %v65_v63 = vsub.f32 %v388_v9, %v59_v59 }
  0x12   :  { %119 = vst [vmem:[%s420_s2 + $0x8] sm:$0xff] %v61_v53  ;;  %154 = vmatprep.subr.mxu0 %v61_v53  ;;  %v81_v61 = vrot.slane %v72_v55, %v80_v44  ;;  %118 = vst [vmem:[%s420_s2] sm:$0xff] %v60_v54  ;;  %224 = vmatprep.subr.mxu1 %v63_v56  ;;  %v74_v0 = vcombine.low %v58_v52, %v59_v59 }
  0x13   :  { %121 = vst [vmem:[%s420_s2 + $0x18] sm:$0xff] %v63_v56  ;;  %155 = vmatpush1.xpose.msra.mxu0 %v60_v54  ;;  %v88_v62 = vrot.slane %v73_v58, %v80_v44  ;;  %120 = vst [vmem:[%s420_s2 + $0x10] sm:$0xff] %v62_v57  ;;  %225 = vmatpush1.xpose.msra.mxu1 %v62_v57 }
  0x14   :  { %122 = vst [vmem:[%s420_s2 + $0x20] sm:$0xff] %v64_v60  ;;  %188 = vmatprep.mubr.f32.mxu0 %v61_v53  ;;  %258 = vmatprep.mubr.f32.mxu1 %v63_v56  ;;  %v95_v2 = vrot.slane %v74_v0, %v80_v44  ;;  %123 = vst [vmem:[%s420_s2 + $0x28] sm:$0xff] %v65_v63 }
  0x15   :  { %v96_v1 = vcombine.low %v81_v61, %v88_v62  ;;  %294 = vmatprep.subr.mxu0 %v65_v63 }
  0x16   :  { %189 = vmatmul.mubr.f32.vlgmr.msra.gmra.mxu0 %v60_v54  ;;  %259 = vmatmul.mubr.f32.vlgmr.msra.gmra.mxu1 %v62_v57  ;;  %v110_v4 = vrot.slane %v95_v2, %v80_v44 }
  0x17   :  { %v103_v3 = vrot.slane %v96_v1, %v80_v44  ;;  %295 = vmatpush1.xpose.msra.mxu0 %v64_v60  ;;  %328 = vmatprep.mubr.f32.mxu0 %v65_v63 }
  0x19   :  { %v111_v5 = vcombine.low %v103_v3, %v110_v4 }
  0x1a   :  { %329 = vmatmul.mubr.f32.vlgmr.msra.gmra.mxu0 %v64_v60 }
  0x1b   :  { %117 = vst.msk [vmem:[%s421_s1] sm:$0x3f] %vm115_vm0, %v111_v5 }
  0xd6   :  { %v190_v6 = vpop.f32.mrf.mxu0  ;;  %v260_v7 = vpop.f32.mrf.mxu1 }
  0xd7   :  { %v261_v10 = vadd.f32 %v260_v7, %v190_v6 }
  0xd8   :  { %v192_v8 = vpop.f32.mrf.mxu0  ;;  %v262_v9 = vpop.f32.mrf.mxu1 }
  0xda   :  { %v330_v11 = vpop.f32.mrf.mxu0 }
  0xdb   :  { %v331_v12 = vadd.f32 %v330_v11, %v261_v10 }
  0xdc   :  { %v332_v13 = vpop.f32.mrf.mxu0 }
  0xdd   :  { %335 = vst.msk [vmem:[%s422_s3] sm:$0xff] %vm334_vm1, %v331_v12 }

// kernel: shape_model_forward.9
= control target key start
LH: loop header
LB: loop body
LE: loop exit
PB: predicated region body
PF: predicated region fallthrough
CT: control target
= control target key end

     0   :  { %s382_s0 = inlined_call_operand.vmem [shape: f32[8,8], index: 0, kind: input, shape index: {}]   ;;  %s383_s1 = inlined_call_operand.vmem [shape: f32[8,768], index: 1, kind: input, shape index: {}]   ;;  %s384_s2 = inlined_call_operand.vmem [shape: f32[8,1], index: 2, kind: input, shape index: {}]   ;;  %s385_s3 = inlined_call_operand.hbm [shape: f32[8,768], index: 3, kind: output, shape index: {}]  }
   0x1   :  { %v16_v0 = vld [vmem:[%s382_s0] sm:$0xff]  ;;  %v18_v1 = vld [vmem:[%s383_s1 + $0x8] sm:$0xff]  ;;  %v20_v3 = vld [vmem:[%s383_s1 + $0x18] sm:$0xff] }
   0x2   :  { %v17_v2 = vld [vmem:[%s383_s1] sm:$0xff]  ;;  %23 = vxpose.xlu0.b32.start.end [1/1] (short) (narrow) %v16_v0, 8  ;;  %89 = vmatprep.subr.mxu0 %v18_v1  ;;  %v19_v4 = vld [vmem:[%s383_s1 + $0x10] sm:$0xff]  ;;  %v22_v5 = vld [vmem:[%s383_s1 + $0x28] sm:$0xff] }
   0x3   :  { %90 = vmatpush1.msra.mxu0 %v17_v2  ;;  %160 = vmatprep.subr.mxu1 %v20_v3 }
   0x4   :  { %8 = vsyncpa [#allocation3], 0  ;;  %v332_v6 = vmov 0.0   ;;  %161 = vmatpush1.msra.mxu1 %v19_v4  ;;  %231 = vmatprep.subr.mxu0 %v22_v5  ;;  %v15_v7 = vld [vmem:[%s384_s2] sm:$0xff]  ;;  %v333_v8 = vmov 0   ;;  %vm55_vm0 = vcmask 64512  }
   0x5   :  { %123 = vmatprep.mubr.f32.mxu0 %v332_v6  ;;  %194 = vmatprep.mubr.f32.mxu1 %v332_v6  ;;  %v21_v9 = vld [vmem:[%s383_s1 + $0x20] sm:$0xff]  ;;  %s334_s2 = smov [#allocation2]  }
   0x6   :  { %s295_s1 = sshll.u32 %s334_s2, 4  ;;  %s296_s1 = int_to_ptr.vmem [resolvable:$true] %s295_s1 }
   0x7   :  { %s310_s27 = scalar_lea.vmem %s296_s1, 768  ;;  %p315_p1 = scmp.lt.s32.totalorder %s296_s1, %s296_s1 }
   0x8   :  { %p311_p0 = scmp.ne.s32.totalorder %s296_s1, %s310_s27  ;;  %p316_p2 = scmp.lt.s32.totalorder %s310_s27, %s310_s27 }
   0xa   :  { %p317_p3 = por %p316_p2, %p315_p1 }
   0xc   :  { %p318_p4 = pnand %p317_p3, %p311_p0 }
  0x2b   :  { %309 = vset.pattern.permute.xlu0 %v333_v8 }
  0x2c   :  { %274 = vperm.xlu0 %309, %v15_v7  }
  0x7e   :  { %v39_v10 = vpop.trf.xlu0 }
  0x7f   :  { %303 = vmatmul.mubr.msk.f32.vlgmr.msra.gmra.mxu0 %vm55_vm0, %v39_v10  ;;  %304 = vmatmul.mubr.msk.f32.vlgmr.msra.gmra.mxu1 %vm55_vm0, %v39_v10 }
  0x80   :  { %232 = vmatpush1.msra.mxu0 %v21_v9  ;;  %265 = vmatprep.mubr.f32.mxu0 %v332_v6 }
  0x83   :  { %305 = vmatmul.mubr.msk.f32.vlgmr.msra.gmra.mxu0 %vm55_vm0, %v39_v10 }
  0xa7   :  { %v275_v11 = vpop.permute.xlu0 %274 }
 0x13f   :  { %v125_v12 = vpop.f32.mrf.mxu0  ;;  %v196_v13 = vpop.f32.mrf.mxu1 }
 0x140   :  { %v277_v14 = vmul.f32 %v275_v11, %v125_v12  ;;  %v279_v15 = vmul.f32 %v275_v11, %v196_v13 }
 0x141   :  { %v127_v16 = vpop.f32.mrf.mxu0  ;;  %v198_v17 = vpop.f32.mrf.mxu1 }
 0x142   :  { %283 = vst [vmem:[#allocation2] sm:$0xff] %v277_v14  ;;  %285 = vst [vmem:[#allocation2 + $0x10] sm:$0xff] %v279_v15  ;;  %v278_v18 = vmul.f32 %v275_v11, %v127_v16  ;;  %v280_v19 = vmul.f32 %v275_v11, %v198_v17 }
 0x143   :  { %v267_v20 = vpop.f32.mrf.mxu0 }
 0x144   :  { %284 = vst [vmem:[#allocation2 + $0x8] sm:$0xff] %v278_v18  ;;  %286 = vst [vmem:[#allocation2 + $0x18] sm:$0xff] %v280_v19  ;;  %v281_v21 = vmul.f32 %v275_v11, %v267_v20 }
 0x145   :  { %v269_v22 = vpop.f32.mrf.mxu0 }
 0x146   :  { %287 = vst [vmem:[#allocation2 + $0x20] sm:$0xff] %v281_v21  ;;  %v282_v23 = vmul.f32 %v275_v11, %v269_v22 }
 0x148   :  { %288 = vst [vmem:[#allocation2 + $0x28] sm:$0xff] %v282_v23 }
 0x149   :  { %321 = shalt.err (!%p318_p4)
}
 0x14a   :  { %298 = dma.vmem_to_hbm [thread:$0]  %s296_s1, 768, %s385_s3, [#allocation3]  }
 0x14b   :  { %330 = dma.done.wait [#allocation3], 768  }
 0x14c   :  { %331 = vsyncadd [#allocation3], 4294966528 }
 0x14d   :  { %302 = vsyncpa [#allocation3], 1 }

</bundles_post_ra>
